<compile_context>
chip_gen: v7x
topology: tpu7x:2x2x1
jax: 0.10.0
libtpu: 0.0.40
codegen_flags: <defaults>
</compile_context>

<pallas_src>
import math

import numpy as np

import jax
import jax.numpy as jnp
from jax.experimental import pallas as pl
from jax.experimental.pallas import tpu as pltpu

EPS = 1e-5  # PyTorch BatchNorm2d default


# ------------------------------ Pallas kernel ------------------------------ #

def _conv_bn_relu(a_t, g_ref, w_ref, gamma_ref, beta_ref):
    """Conv2d(k3,s2,p1) + BatchNorm(train stats) + ReLU, transposed layout.

    a_t:       (C_in, M_in)      activations, pixels on the lane axis
    g_ref:     (9, M_in, M_out)  constant 0/1 tap-gather matrices (im2col + pad)
    w_ref:     (9, C_out, C_in)  conv weight, one (C_out, C_in) slice per tap
    gamma_ref: (C_out, 1)        BN gamma
    beta_ref:  (C_out, 1)        BN beta
    returns:   (C_out, M_out)
    """
    n_taps, c_out, _ = w_ref.shape
    m_out = g_ref.shape[2]

    y = jnp.zeros((c_out, m_out), jnp.float32)
    for t in range(n_taps):                                   # unrolled, 9 taps
        patches_t = jnp.dot(a_t, g_ref[t], preferred_element_type=jnp.float32)
        y = y + jnp.dot(w_ref[t], patches_t,
                        preferred_element_type=jnp.float32)

    # BatchNorm2d training-mode batch stats (biased variance) in ONE pass, with
    # gamma/beta folded into a single per-channel scale + shift.  The conv bias
    # is intentionally omitted: train-mode BN cancels it exactly.
    inv_m = 1.0 / m_out
    mu = jnp.sum(y, axis=1, keepdims=True) * inv_m
    ex2 = jnp.sum(y * y, axis=1, keepdims=True) * inv_m
    var = ex2 - mu * mu
    inv = jax.lax.rsqrt(var + EPS)
    scale = gamma_ref[...] * inv
    shift = beta_ref[...] - mu * scale
    return jnp.maximum(y * scale + shift, 0.0)


def conv2dnet_kernel(a0_ref, g1_ref, g2_ref, g3_ref, w1_ref, w2_ref, w3_ref,
                     gm1_ref, bt1_ref, gm2_ref, bt2_ref, gm3_ref, bt3_ref,
                     wf_ref, ef_ref, bf_ref, out_ref):
    a1 = _conv_bn_relu(a0_ref[...], g1_ref, w1_ref, gm1_ref, bt1_ref)
    a2 = _conv_bn_relu(a1, g2_ref, w2_ref, gm2_ref, bt2_ref)
    a3 = _conv_bn_relu(a2, g3_ref, w3_ref, gm3_ref, bt3_ref)   # (C3, B*T3h*T3w)

    # FC head, computed transposed: out^T[n, b].  ef_ref[o] selects (as a GEMM)
    # the a3 columns holding spatial position o for every batch element;
    # wf_ref[o] is the matching slice of the FC weight, already permuted for
    # PyTorch's (C, H, W) flatten order.
    n_pos = ef_ref.shape[0]
    n_cls = wf_ref.shape[1]
    batch = ef_ref.shape[2]
    acc = jnp.zeros((n_cls, batch), jnp.float32)
    for o in range(n_pos):                                     # unrolled, 4 pos
        cols = jnp.dot(a3, ef_ref[o], preferred_element_type=jnp.float32)
        acc = acc + jnp.dot(wf_ref[o], cols,
                            preferred_element_type=jnp.float32)
    out_ref[...] = acc + bf_ref[...]


_VMEM = pl.BlockSpec(memory_space=pltpu.MemorySpace.VMEM)


# ------------------------------- JAX wrapper -------------------------------- #

def conv2dnet_forward(x, prep):
    """x: (B, C, H, W) float32 NCHW.  prep: output of prepare_params()."""
    B, C, H, W = x.shape
    # Single layout change for the whole net: pixels onto the lane axis.
    a0 = jnp.transpose(x, (1, 0, 2, 3)).reshape(C, B * H * W)
    n_cls = prep["wf"].shape[1]

    operands = (a0, prep["g1"], prep["g2"], prep["g3"],
                prep["w1"], prep["w2"], prep["w3"],
                prep["gm1"], prep["bt1"], prep["gm2"], prep["bt2"],
                prep["gm3"], prep["bt3"],
                prep["wf"], prep["ef"], prep["bf"])

    # Advisory cost estimate (selection GEMMs + conv GEMMs + FC).
    flops = 0
    for g_mat, w_tap in ((prep["g1"], prep["w1"]),
                         (prep["g2"], prep["w2"]),
                         (prep["g3"], prep["w3"])):
        _, m_in, m_out = g_mat.shape
        _, oc, ic = w_tap.shape
        flops += 2 * 9 * (ic * m_in * m_out + oc * ic * m_out)
    n_pos, _, oc3 = prep["wf"].shape
    m3 = prep["ef"].shape[1]
    flops += 2 * n_pos * (oc3 * m3 * B + n_cls * oc3 * B)
    trans = int(prep["gm1"].shape[0] + prep["gm2"].shape[0]
                + prep["gm3"].shape[0])
    bytes_accessed = sum(int(np.prod(o.shape)) * 4 for o in operands) \
        + n_cls * B * 4

    out_t = pl.pallas_call(
        conv2dnet_kernel,
        out_shape=jax.ShapeDtypeStruct((n_cls, B), jnp.float32),
        in_specs=[_VMEM] * len(operands),
        out_specs=_VMEM,
        compiler_params=pltpu.CompilerParams(
            vmem_limit_bytes=32 * 1024 * 1024),
        cost_estimate=pl.CostEstimate(flops=int(flops), transcendentals=trans,
                                      bytes_accessed=int(bytes_accessed)),
    )(*operands)
    return out_t.T                                             # (B, num_classes)


# -------------------------- one-time parameter prep ------------------------- #

def _tap_gather_matrices(B, H, W):
    """0/1 matrices implementing k3/s2/p1 im2col (zero padding folded in)."""
    TH = (H + 2 - 3) // 2 + 1
    TW = (W + 2 - 3) // 2 + 1
    G = np.zeros((9, B * H * W, B * TH * TW), np.float32)
    for ki in range(3):
        for kj in range(3):
            t = ki * 3 + kj
            for b in range(B):
                for oh in range(TH):
                    ih = 2 * oh + ki - 1
                    if not (0 <= ih < H):
                        continue
                    for ow in range(TW):
                        iw = 2 * ow + kj - 1
                        if 0 <= iw < W:
                            G[t, b * H * W + ih * W + iw,
                              b * TH * TW + oh * TW + ow] = 1.0
    return G, TH, TW


def prepare_params(params, B, H, W):
    """Per-model setup (runs once): per-tap conv weights, BN params as columns,
    FC weight permuted for the PyTorch (C, H, W) flatten order, and the constant
    im2col gather matrices.  Conv biases are dropped (train-mode BN cancels
    them exactly)."""
    def conv_taps(w):                       # (OC, IC, 3, 3) -> (9, OC, IC)
        oc, ic = w.shape[0], w.shape[1]
        return jnp.transpose(w, (2, 3, 0, 1)).reshape(9, oc, ic)

    def col(v):                             # (N,) -> (N, 1)
        return v.reshape(-1, 1).astype(jnp.float32)

    g1, th1, tw1 = _tap_gather_matrices(B, H, W)
    g2, th2, tw2 = _tap_gather_matrices(B, th1, tw1)
    g3, th3, tw3 = _tap_gather_matrices(B, th2, tw2)

    oc3 = params["w3"].shape[0]
    n_cls = params["wfc"].shape[0]
    n_pos = th3 * tw3
    # PyTorch flatten order is (C, H, W): wfc[n, c*n_pos + o] -> wf[o, n, c]
    wf = jnp.transpose(
        params["wfc"].reshape(n_cls, oc3, th3, tw3), (2, 3, 0, 1)
    ).reshape(n_pos, n_cls, oc3)

    m3 = B * n_pos
    ef = np.zeros((n_pos, m3, B), np.float32)
    for b in range(B):
        for o in range(n_pos):
            ef[o, b * n_pos + o, b] = 1.0

    return dict(
        g1=jnp.asarray(g1), g2=jnp.asarray(g2), g3=jnp.asarray(g3),
        w1=conv_taps(params["w1"]), w2=conv_taps(params["w2"]),
        w3=conv_taps(params["w3"]),
        gm1=col(params["g1"]), bt1=col(params["be1"]),
        gm2=col(params["g2"]), bt2=col(params["be2"]),
        gm3=col(params["g3"]), bt3=col(params["be3"]),
        wf=wf, ef=jnp.asarray(ef),
        bf=params["bfc"].reshape(-1, 1).astype(jnp.float32),
    )


# ---------------------------- pure-JAX reference ---------------------------- #

def _ref_forward(x, params):
    def block(x, w, b, g, be):
        y = jax.lax.conv_general_dilated(
            x, w, window_strides=(2, 2), padding=((1, 1), (1, 1)),
            dimension_numbers=("NCHW", "OIHW", "NCHW"))
        y = y + b.reshape(1, -1, 1, 1)
        mu = jnp.mean(y, axis=(0, 2, 3), keepdims=True)
        var = jnp.mean((y - mu) ** 2, axis=(0, 2, 3), keepdims=True)
        y = (y - mu) * jax.lax.rsqrt(var + EPS)
        y = y * g.reshape(1, -1, 1, 1) + be.reshape(1, -1, 1, 1)
        return jnp.maximum(y, 0.0)

    x = block(x, params["w1"], params["b1"], params["g1"], params["be1"])
    x = block(x, params["w2"], params["b2"], params["g2"], params["be2"])
    x = block(x, params["w3"], params["b3"], params["g3"], params["be3"])
    x = x.reshape(x.shape[0], -1)
    return x @ params["wfc"].T + params["bfc"]


# ----------------------------------- init ----------------------------------- #

def init_params(key, input_channels, num_classes, width, height):
    in_c = input_channels
    out_c = in_c * 2
    in_fc = out_c * 4 * math.ceil(width / 8) * math.ceil(height / 8)

    def conv_init(k, oc, ic):
        kw, kb = jax.random.split(k)
        bound = 1.0 / math.sqrt(ic * 9)
        w = jax.random.uniform(kw, (oc, ic, 3, 3), jnp.float32, -bound, bound)
        b = jax.random.uniform(kb, (oc,), jnp.float32, -bound, bound)
        return w, b

    k1, k2, k3, k4 = jax.random.split(key, 4)
    w1, b1 = conv_init(k1, out_c, in_c)
    w2, b2 = conv_init(k2, out_c * 2, out_c)
    w3, b3 = conv_init(k3, out_c * 4, out_c * 2)
    kfw, kfb = jax.random.split(k4)
    bound = 1.0 / math.sqrt(in_fc)
    wfc = jax.random.uniform(kfw, (num_classes, in_fc), jnp.float32, -bound, bound)
    bfc = jax.random.uniform(kfb, (num_classes,), jnp.float32, -bound, bound)

    return dict(
        w1=w1, b1=b1, g1=jnp.ones(out_c), be1=jnp.zeros(out_c),
        w2=w2, b2=b2, g2=jnp.ones(out_c * 2), be2=jnp.zeros(out_c * 2),
        w3=w3, b3=b3, g3=jnp.ones(out_c * 4), be3=jnp.zeros(out_c * 4),
        wfc=wfc, bfc=bfc,
    )


# ----------------------------------- main ------------------------------------ #

if __name__ == "__main__":
    B, C, H, W = 2, 4, 16, 16
    NUM_CLASSES = 10

    key = jax.random.PRNGKey(0)
    kx, kp = jax.random.split(key)
    x = jax.random.uniform(kx, (B, C, H, W), jnp.float32)
    params = init_params(kp, C, NUM_CLASSES, W, H)
    prep = prepare_params(params, B, H, W)

    fwd = jax.jit(conv2dnet_forward)
    out = jax.block_until_ready(fwd(x, prep))
    assert out.shape == (B, NUM_CLASSES), out.shape

    ref = jax.block_until_ready(_ref_forward(x, params))
    assert jnp.allclose(out, ref, atol=1e-4, rtol=1e-4), (
        "mismatch vs pure-JAX reference, max abs err = "
        f"{float(jnp.max(jnp.abs(out - ref)))}")

    print("KERNEL_OK")
</pallas_src>

<mosaic_0001>
module attributes {stable_mosaic.version = 11 : i64} {
  func.func @conv2dnet_kernel(%arg0: memref<4x512xf32, #tpu.memory_space<vmem>>, %arg1: memref<9x512x128xf32, #tpu.memory_space<vmem>>, %arg2: memref<9x128x32xf32, #tpu.memory_space<vmem>>, %arg3: memref<9x32x8xf32, #tpu.memory_space<vmem>>, %arg4: memref<9x8x4xf32, #tpu.memory_space<vmem>>, %arg5: memref<9x16x8xf32, #tpu.memory_space<vmem>>, %arg6: memref<9x32x16xf32, #tpu.memory_space<vmem>>, %arg7: memref<8x1xf32, #tpu.memory_space<vmem>>, %arg8: memref<8x1xf32, #tpu.memory_space<vmem>>, %arg9: memref<16x1xf32, #tpu.memory_space<vmem>>, %arg10: memref<16x1xf32, #tpu.memory_space<vmem>>, %arg11: memref<32x1xf32, #tpu.memory_space<vmem>>, %arg12: memref<32x1xf32, #tpu.memory_space<vmem>>, %arg13: memref<4x10x32xf32, #tpu.memory_space<vmem>>, %arg14: memref<4x8x2xf32, #tpu.memory_space<vmem>>, %arg15: memref<10x1xf32, #tpu.memory_space<vmem>>, %arg16: memref<10x2xf32, #tpu.memory_space<vmem>>) attributes {dimension_semantics = [], scalar_prefetch = 0 : i64, scratch_operands = 0 : i64, tpu.core_type = #tpu.core_type<tc>} {
    %c0 = arith.constant 0 : index
    %c0_0 = arith.constant 0 : index
    %0 = vector.load %arg0[%c0, %c0_0] : memref<4x512xf32, #tpu.memory_space<vmem>>, vector<4x512xf32>
    %cst = arith.constant 0.000000e+00 : f32
    %1 = vector.broadcast %cst : f32 to vector<8x128xf32>
    %c0_1 = arith.constant 0 : index
    %c0_2 = arith.constant 0 : index
    %c0_3 = arith.constant 0 : index
    %2 = vector.load %arg1[%c0_1, %c0_2, %c0_3] : memref<9x512x128xf32, #tpu.memory_space<vmem>>, vector<1x512x128xf32>
    %3 = vector.shape_cast %2 : vector<1x512x128xf32> to vector<512x128xf32>
    %cst_4 = arith.constant dense<0.000000e+00> : vector<4x128xf32>
    %4 = tpu.matmul %0, %3, %cst_4 {dimension_numbers = #tpu.dot_dimension_numbers<[1], [0], [0], [1], [0, 0, 1, 1], [], []>} : vector<4x512xf32>, vector<512x128xf32>, vector<4x128xf32> -> vector<4x128xf32>
    %c0_5 = arith.constant 0 : index
    %c0_6 = arith.constant 0 : index
    %c0_7 = arith.constant 0 : index
    %5 = vector.load %arg4[%c0_5, %c0_6, %c0_7] : memref<9x8x4xf32, #tpu.memory_space<vmem>>, vector<1x8x4xf32>
    %6 = vector.shape_cast %5 : vector<1x8x4xf32> to vector<8x4xf32>
    %cst_8 = arith.constant dense<0.000000e+00> : vector<8x128xf32>
    %7 = tpu.matmul %6, %4, %cst_8 {dimension_numbers = #tpu.dot_dimension_numbers<[1], [0], [0], [1], [0, 0, 1, 1], [], []>} : vector<8x4xf32>, vector<4x128xf32>, vector<8x128xf32> -> vector<8x128xf32>
    %8 = arith.addf %1, %7 : vector<8x128xf32>
    %c1 = arith.constant 1 : index
    %c0_9 = arith.constant 0 : index
    %c0_10 = arith.constant 0 : index
    %9 = vector.load %arg1[%c1, %c0_9, %c0_10] : memref<9x512x128xf32, #tpu.memory_space<vmem>>, vector<1x512x128xf32>
    %10 = vector.shape_cast %9 : vector<1x512x128xf32> to vector<512x128xf32>
    %cst_11 = arith.constant dense<0.000000e+00> : vector<4x128xf32>
    %11 = tpu.matmul %0, %10, %cst_11 {dimension_numbers = #tpu.dot_dimension_numbers<[1], [0], [0], [1], [0, 0, 1, 1], [], []>} : vector<4x512xf32>, vector<512x128xf32>, vector<4x128xf32> -> vector<4x128xf32>
    %c1_12 = arith.constant 1 : index
    %c0_13 = arith.constant 0 : index
    %c0_14 = arith.constant 0 : index
    %12 = vector.load %arg4[%c1_12, %c0_13, %c0_14] : memref<9x8x4xf32, #tpu.memory_space<vmem>>, vector<1x8x4xf32>
    %13 = vector.shape_cast %12 : vector<1x8x4xf32> to vector<8x4xf32>
    %cst_15 = arith.constant dense<0.000000e+00> : vector<8x128xf32>
    %14 = tpu.matmul %13, %11, %cst_15 {dimension_numbers = #tpu.dot_dimension_numbers<[1], [0], [0], [1], [0, 0, 1, 1], [], []>} : vector<8x4xf32>, vector<4x128xf32>, vector<8x128xf32> -> vector<8x128xf32>
    %15 = arith.addf %8, %14 : vector<8x128xf32>
    %c2 = arith.constant 2 : index
    %c0_16 = arith.constant 0 : index
    %c0_17 = arith.constant 0 : index
    %16 = vector.load %arg1[%c2, %c0_16, %c0_17] : memref<9x512x128xf32, #tpu.memory_space<vmem>>, vector<1x512x128xf32>
    %17 = vector.shape_cast %16 : vector<1x512x128xf32> to vector<512x128xf32>
    %cst_18 = arith.constant dense<0.000000e+00> : vector<4x128xf32>
    %18 = tpu.matmul %0, %17, %cst_18 {dimension_numbers = #tpu.dot_dimension_numbers<[1], [0], [0], [1], [0, 0, 1, 1], [], []>} : vector<4x512xf32>, vector<512x128xf32>, vector<4x128xf32> -> vector<4x128xf32>
    %c2_19 = arith.constant 2 : index
    %c0_20 = arith.constant 0 : index
    %c0_21 = arith.constant 0 : index
    %19 = vector.load %arg4[%c2_19, %c0_20, %c0_21] : memref<9x8x4xf32, #tpu.memory_space<vmem>>, vector<1x8x4xf32>
    %20 = vector.shape_cast %19 : vector<1x8x4xf32> to vector<8x4xf32>
    %cst_22 = arith.constant dense<0.000000e+00> : vector<8x128xf32>
    %21 = tpu.matmul %20, %18, %cst_22 {dimension_numbers = #tpu.dot_dimension_numbers<[1], [0], [0], [1], [0, 0, 1, 1], [], []>} : vector<8x4xf32>, vector<4x128xf32>, vector<8x128xf32> -> vector<8x128xf32>
    %22 = arith.addf %15, %21 : vector<8x128xf32>
    %c3 = arith.constant 3 : index
    %c0_23 = arith.constant 0 : index
    %c0_24 = arith.constant 0 : index
    %23 = vector.load %arg1[%c3, %c0_23, %c0_24] : memref<9x512x128xf32, #tpu.memory_space<vmem>>, vector<1x512x128xf32>
    %24 = vector.shape_cast %23 : vector<1x512x128xf32> to vector<512x128xf32>
    %cst_25 = arith.constant dense<0.000000e+00> : vector<4x128xf32>
    %25 = tpu.matmul %0, %24, %cst_25 {dimension_numbers = #tpu.dot_dimension_numbers<[1], [0], [0], [1], [0, 0, 1, 1], [], []>} : vector<4x512xf32>, vector<512x128xf32>, vector<4x128xf32> -> vector<4x128xf32>
    %c3_26 = arith.constant 3 : index
    %c0_27 = arith.constant 0 : index
    %c0_28 = arith.constant 0 : index
    %26 = vector.load %arg4[%c3_26, %c0_27, %c0_28] : memref<9x8x4xf32, #tpu.memory_space<vmem>>, vector<1x8x4xf32>
    %27 = vector.shape_cast %26 : vector<1x8x4xf32> to vector<8x4xf32>
    %cst_29 = arith.constant dense<0.000000e+00> : vector<8x128xf32>
    %28 = tpu.matmul %27, %25, %cst_29 {dimension_numbers = #tpu.dot_dimension_numbers<[1], [0], [0], [1], [0, 0, 1, 1], [], []>} : vector<8x4xf32>, vector<4x128xf32>, vector<8x128xf32> -> vector<8x128xf32>
    %29 = arith.addf %22, %28 : vector<8x128xf32>
    %c4 = arith.constant 4 : index
    %c0_30 = arith.constant 0 : index
    %c0_31 = arith.constant 0 : index
    %30 = vector.load %arg1[%c4, %c0_30, %c0_31] : memref<9x512x128xf32, #tpu.memory_space<vmem>>, vector<1x512x128xf32>
    %31 = vector.shape_cast %30 : vector<1x512x128xf32> to vector<512x128xf32>
    %cst_32 = arith.constant dense<0.000000e+00> : vector<4x128xf32>
    %32 = tpu.matmul %0, %31, %cst_32 {dimension_numbers = #tpu.dot_dimension_numbers<[1], [0], [0], [1], [0, 0, 1, 1], [], []>} : vector<4x512xf32>, vector<512x128xf32>, vector<4x128xf32> -> vector<4x128xf32>
    %c4_33 = arith.constant 4 : index
    %c0_34 = arith.constant 0 : index
    %c0_35 = arith.constant 0 : index
    %33 = vector.load %arg4[%c4_33, %c0_34, %c0_35] : memref<9x8x4xf32, #tpu.memory_space<vmem>>, vector<1x8x4xf32>
    %34 = vector.shape_cast %33 : vector<1x8x4xf32> to vector<8x4xf32>
    %cst_36 = arith.constant dense<0.000000e+00> : vector<8x128xf32>
    %35 = tpu.matmul %34, %32, %cst_36 {dimension_numbers = #tpu.dot_dimension_numbers<[1], [0], [0], [1], [0, 0, 1, 1], [], []>} : vector<8x4xf32>, vector<4x128xf32>, vector<8x128xf32> -> vector<8x128xf32>
    %36 = arith.addf %29, %35 : vector<8x128xf32>
    %c5 = arith.constant 5 : index
    %c0_37 = arith.constant 0 : index
    %c0_38 = arith.constant 0 : index
    %37 = vector.load %arg1[%c5, %c0_37, %c0_38] : memref<9x512x128xf32, #tpu.memory_space<vmem>>, vector<1x512x128xf32>
    %38 = vector.shape_cast %37 : vector<1x512x128xf32> to vector<512x128xf32>
    %cst_39 = arith.constant dense<0.000000e+00> : vector<4x128xf32>
    %39 = tpu.matmul %0, %38, %cst_39 {dimension_numbers = #tpu.dot_dimension_numbers<[1], [0], [0], [1], [0, 0, 1, 1], [], []>} : vector<4x512xf32>, vector<512x128xf32>, vector<4x128xf32> -> vector<4x128xf32>
    %c5_40 = arith.constant 5 : index
    %c0_41 = arith.constant 0 : index
    %c0_42 = arith.constant 0 : index
    %40 = vector.load %arg4[%c5_40, %c0_41, %c0_42] : memref<9x8x4xf32, #tpu.memory_space<vmem>>, vector<1x8x4xf32>
    %41 = vector.shape_cast %40 : vector<1x8x4xf32> to vector<8x4xf32>
    %cst_43 = arith.constant dense<0.000000e+00> : vector<8x128xf32>
    %42 = tpu.matmul %41, %39, %cst_43 {dimension_numbers = #tpu.dot_dimension_numbers<[1], [0], [0], [1], [0, 0, 1, 1], [], []>} : vector<8x4xf32>, vector<4x128xf32>, vector<8x128xf32> -> vector<8x128xf32>
    %43 = arith.addf %36, %42 : vector<8x128xf32>
    %c6 = arith.constant 6 : index
    %c0_44 = arith.constant 0 : index
    %c0_45 = arith.constant 0 : index
    %44 = vector.load %arg1[%c6, %c0_44, %c0_45] : memref<9x512x128xf32, #tpu.memory_space<vmem>>, vector<1x512x128xf32>
    %45 = vector.shape_cast %44 : vector<1x512x128xf32> to vector<512x128xf32>
    %cst_46 = arith.constant dense<0.000000e+00> : vector<4x128xf32>
    %46 = tpu.matmul %0, %45, %cst_46 {dimension_numbers = #tpu.dot_dimension_numbers<[1], [0], [0], [1], [0, 0, 1, 1], [], []>} : vector<4x512xf32>, vector<512x128xf32>, vector<4x128xf32> -> vector<4x128xf32>
    %c6_47 = arith.constant 6 : index
    %c0_48 = arith.constant 0 : index
    %c0_49 = arith.constant 0 : index
    %47 = vector.load %arg4[%c6_47, %c0_48, %c0_49] : memref<9x8x4xf32, #tpu.memory_space<vmem>>, vector<1x8x4xf32>
    %48 = vector.shape_cast %47 : vector<1x8x4xf32> to vector<8x4xf32>
    %cst_50 = arith.constant dense<0.000000e+00> : vector<8x128xf32>
    %49 = tpu.matmul %48, %46, %cst_50 {dimension_numbers = #tpu.dot_dimension_numbers<[1], [0], [0], [1], [0, 0, 1, 1], [], []>} : vector<8x4xf32>, vector<4x128xf32>, vector<8x128xf32> -> vector<8x128xf32>
    %50 = arith.addf %43, %49 : vector<8x128xf32>
    %c7 = arith.constant 7 : index
    %c0_51 = arith.constant 0 : index
    %c0_52 = arith.constant 0 : index
    %51 = vector.load %arg1[%c7, %c0_51, %c0_52] : memref<9x512x128xf32, #tpu.memory_space<vmem>>, vector<1x512x128xf32>
    %52 = vector.shape_cast %51 : vector<1x512x128xf32> to vector<512x128xf32>
    %cst_53 = arith.constant dense<0.000000e+00> : vector<4x128xf32>
    %53 = tpu.matmul %0, %52, %cst_53 {dimension_numbers = #tpu.dot_dimension_numbers<[1], [0], [0], [1], [0, 0, 1, 1], [], []>} : vector<4x512xf32>, vector<512x128xf32>, vector<4x128xf32> -> vector<4x128xf32>
    %c7_54 = arith.constant 7 : index
    %c0_55 = arith.constant 0 : index
    %c0_56 = arith.constant 0 : index
    %54 = vector.load %arg4[%c7_54, %c0_55, %c0_56] : memref<9x8x4xf32, #tpu.memory_space<vmem>>, vector<1x8x4xf32>
    %55 = vector.shape_cast %54 : vector<1x8x4xf32> to vector<8x4xf32>
    %cst_57 = arith.constant dense<0.000000e+00> : vector<8x128xf32>
    %56 = tpu.matmul %55, %53, %cst_57 {dimension_numbers = #tpu.dot_dimension_numbers<[1], [0], [0], [1], [0, 0, 1, 1], [], []>} : vector<8x4xf32>, vector<4x128xf32>, vector<8x128xf32> -> vector<8x128xf32>
    %57 = arith.addf %50, %56 : vector<8x128xf32>
    %c8 = arith.constant 8 : index
    %c0_58 = arith.constant 0 : index
    %c0_59 = arith.constant 0 : index
    %58 = vector.load %arg1[%c8, %c0_58, %c0_59] : memref<9x512x128xf32, #tpu.memory_space<vmem>>, vector<1x512x128xf32>
    %59 = vector.shape_cast %58 : vector<1x512x128xf32> to vector<512x128xf32>
    %cst_60 = arith.constant dense<0.000000e+00> : vector<4x128xf32>
    %60 = tpu.matmul %0, %59, %cst_60 {dimension_numbers = #tpu.dot_dimension_numbers<[1], [0], [0], [1], [0, 0, 1, 1], [], []>} : vector<4x512xf32>, vector<512x128xf32>, vector<4x128xf32> -> vector<4x128xf32>
    %c8_61 = arith.constant 8 : index
    %c0_62 = arith.constant 0 : index
    %c0_63 = arith.constant 0 : index
    %61 = vector.load %arg4[%c8_61, %c0_62, %c0_63] : memref<9x8x4xf32, #tpu.memory_space<vmem>>, vector<1x8x4xf32>
    %62 = vector.shape_cast %61 : vector<1x8x4xf32> to vector<8x4xf32>
    %cst_64 = arith.constant dense<0.000000e+00> : vector<8x128xf32>
    %63 = tpu.matmul %62, %60, %cst_64 {dimension_numbers = #tpu.dot_dimension_numbers<[1], [0], [0], [1], [0, 0, 1, 1], [], []>} : vector<8x4xf32>, vector<4x128xf32>, vector<8x128xf32> -> vector<8x128xf32>
    %64 = arith.addf %57, %63 : vector<8x128xf32>
    %cst_65 = arith.constant dense<0.000000e+00> : vector<8xf32>
    %65 = vector.multi_reduction <add>, %64, %cst_65 [1] : vector<8x128xf32> to vector<8xf32>
    %66 = vector.shape_cast %65 : vector<8xf32> to vector<8x1xf32>
    %cst_66 = arith.constant 7.812500e-03 : f32
    %67 = vector.broadcast %cst_66 : f32 to vector<8x1xf32>
    %68 = arith.mulf %66, %67 : vector<8x1xf32>
    %69 = arith.mulf %64, %64 : vector<8x128xf32>
    %cst_67 = arith.constant dense<0.000000e+00> : vector<8xf32>
    %70 = vector.multi_reduction <add>, %69, %cst_67 [1] : vector<8x128xf32> to vector<8xf32>
    %71 = vector.shape_cast %70 : vector<8xf32> to vector<8x1xf32>
    %cst_68 = arith.constant 7.812500e-03 : f32
    %72 = vector.broadcast %cst_68 : f32 to vector<8x1xf32>
    %73 = arith.mulf %71, %72 : vector<8x1xf32>
    %74 = arith.mulf %68, %68 : vector<8x1xf32>
    %75 = arith.subf %73, %74 : vector<8x1xf32>
    %cst_69 = arith.constant 9.99999974E-6 : f32
    %76 = vector.broadcast %cst_69 : f32 to vector<8x1xf32>
    %77 = arith.addf %75, %76 : vector<8x1xf32>
    %78 = math.rsqrt %77 : vector<8x1xf32>
    %c0_70 = arith.constant 0 : index
    %c0_71 = arith.constant 0 : index
    %79 = vector.load %arg7[%c0_70, %c0_71] : memref<8x1xf32, #tpu.memory_space<vmem>>, vector<8x1xf32>
    %80 = arith.mulf %79, %78 : vector<8x1xf32>
    %c0_72 = arith.constant 0 : index
    %c0_73 = arith.constant 0 : index
    %81 = vector.load %arg8[%c0_72, %c0_73] : memref<8x1xf32, #tpu.memory_space<vmem>>, vector<8x1xf32>
    %82 = arith.mulf %68, %80 : vector<8x1xf32>
    %83 = arith.subf %81, %82 : vector<8x1xf32>
    %84 = vector.broadcast %80 : vector<8x1xf32> to vector<8x128xf32>
    %85 = arith.mulf %64, %84 : vector<8x128xf32>
    %86 = vector.broadcast %83 : vector<8x1xf32> to vector<8x128xf32>
    %87 = arith.addf %85, %86 : vector<8x128xf32>
    %cst_74 = arith.constant 0.000000e+00 : f32
    %88 = vector.broadcast %cst_74 : f32 to vector<8x128xf32>
    %89 = arith.maximumf %87, %88 : vector<8x128xf32>
    %cst_75 = arith.constant 0.000000e+00 : f32
    %90 = vector.broadcast %cst_75 : f32 to vector<16x32xf32>
    %c0_76 = arith.constant 0 : index
    %c0_77 = arith.constant 0 : index
    %c0_78 = arith.constant 0 : index
    %91 = vector.load %arg2[%c0_76, %c0_77, %c0_78] : memref<9x128x32xf32, #tpu.memory_space<vmem>>, vector<1x128x32xf32>
    %92 = vector.shape_cast %91 : vector<1x128x32xf32> to vector<128x32xf32>
    %cst_79 = arith.constant dense<0.000000e+00> : vector<8x32xf32>
    %93 = tpu.matmul %89, %92, %cst_79 {dimension_numbers = #tpu.dot_dimension_numbers<[1], [0], [0], [1], [0, 0, 1, 1], [], []>} : vector<8x128xf32>, vector<128x32xf32>, vector<8x32xf32> -> vector<8x32xf32>
    %c0_80 = arith.constant 0 : index
    %c0_81 = arith.constant 0 : index
    %c0_82 = arith.constant 0 : index
    %94 = vector.load %arg5[%c0_80, %c0_81, %c0_82] : memref<9x16x8xf32, #tpu.memory_space<vmem>>, vector<1x16x8xf32>
    %95 = vector.shape_cast %94 : vector<1x16x8xf32> to vector<16x8xf32>
    %cst_83 = arith.constant dense<0.000000e+00> : vector<16x32xf32>
    %96 = tpu.matmul %95, %93, %cst_83 {dimension_numbers = #tpu.dot_dimension_numbers<[1], [0], [0], [1], [0, 0, 1, 1], [], []>} : vector<16x8xf32>, vector<8x32xf32>, vector<16x32xf32> -> vector<16x32xf32>
    %97 = arith.addf %90, %96 : vector<16x32xf32>
    %c1_84 = arith.constant 1 : index
    %c0_85 = arith.constant 0 : index
    %c0_86 = arith.constant 0 : index
    %98 = vector.load %arg2[%c1_84, %c0_85, %c0_86] : memref<9x128x32xf32, #tpu.memory_space<vmem>>, vector<1x128x32xf32>
    %99 = vector.shape_cast %98 : vector<1x128x32xf32> to vector<128x32xf32>
    %cst_87 = arith.constant dense<0.000000e+00> : vector<8x32xf32>
    %100 = tpu.matmul %89, %99, %cst_87 {dimension_numbers = #tpu.dot_dimension_numbers<[1], [0], [0], [1], [0, 0, 1, 1], [], []>} : vector<8x128xf32>, vector<128x32xf32>, vector<8x32xf32> -> vector<8x32xf32>
    %c1_88 = arith.constant 1 : index
    %c0_89 = arith.constant 0 : index
    %c0_90 = arith.constant 0 : index
    %101 = vector.load %arg5[%c1_88, %c0_89, %c0_90] : memref<9x16x8xf32, #tpu.memory_space<vmem>>, vector<1x16x8xf32>
    %102 = vector.shape_cast %101 : vector<1x16x8xf32> to vector<16x8xf32>
    %cst_91 = arith.constant dense<0.000000e+00> : vector<16x32xf32>
    %103 = tpu.matmul %102, %100, %cst_91 {dimension_numbers = #tpu.dot_dimension_numbers<[1], [0], [0], [1], [0, 0, 1, 1], [], []>} : vector<16x8xf32>, vector<8x32xf32>, vector<16x32xf32> -> vector<16x32xf32>
    %104 = arith.addf %97, %103 : vector<16x32xf32>
    %c2_92 = arith.constant 2 : index
    %c0_93 = arith.constant 0 : index
    %c0_94 = arith.constant 0 : index
    %105 = vector.load %arg2[%c2_92, %c0_93, %c0_94] : memref<9x128x32xf32, #tpu.memory_space<vmem>>, vector<1x128x32xf32>
    %106 = vector.shape_cast %105 : vector<1x128x32xf32> to vector<128x32xf32>
    %cst_95 = arith.constant dense<0.000000e+00> : vector<8x32xf32>
    %107 = tpu.matmul %89, %106, %cst_95 {dimension_numbers = #tpu.dot_dimension_numbers<[1], [0], [0], [1], [0, 0, 1, 1], [], []>} : vector<8x128xf32>, vector<128x32xf32>, vector<8x32xf32> -> vector<8x32xf32>
    %c2_96 = arith.constant 2 : index
    %c0_97 = arith.constant 0 : index
    %c0_98 = arith.constant 0 : index
    %108 = vector.load %arg5[%c2_96, %c0_97, %c0_98] : memref<9x16x8xf32, #tpu.memory_space<vmem>>, vector<1x16x8xf32>
    %109 = vector.shape_cast %108 : vector<1x16x8xf32> to vector<16x8xf32>
    %cst_99 = arith.constant dense<0.000000e+00> : vector<16x32xf32>
    %110 = tpu.matmul %109, %107, %cst_99 {dimension_numbers = #tpu.dot_dimension_numbers<[1], [0], [0], [1], [0, 0, 1, 1], [], []>} : vector<16x8xf32>, vector<8x32xf32>, vector<16x32xf32> -> vector<16x32xf32>
    %111 = arith.addf %104, %110 : vector<16x32xf32>
    %c3_100 = arith.constant 3 : index
    %c0_101 = arith.constant 0 : index
    %c0_102 = arith.constant 0 : index
    %112 = vector.load %arg2[%c3_100, %c0_101, %c0_102] : memref<9x128x32xf32, #tpu.memory_space<vmem>>, vector<1x128x32xf32>
    %113 = vector.shape_cast %112 : vector<1x128x32xf32> to vector<128x32xf32>
    %cst_103 = arith.constant dense<0.000000e+00> : vector<8x32xf32>
    %114 = tpu.matmul %89, %113, %cst_103 {dimension_numbers = #tpu.dot_dimension_numbers<[1], [0], [0], [1], [0, 0, 1, 1], [], []>} : vector<8x128xf32>, vector<128x32xf32>, vector<8x32xf32> -> vector<8x32xf32>
    %c3_104 = arith.constant 3 : index
    %c0_105 = arith.constant 0 : index
    %c0_106 = arith.constant 0 : index
    %115 = vector.load %arg5[%c3_104, %c0_105, %c0_106] : memref<9x16x8xf32, #tpu.memory_space<vmem>>, vector<1x16x8xf32>
    %116 = vector.shape_cast %115 : vector<1x16x8xf32> to vector<16x8xf32>
    %cst_107 = arith.constant dense<0.000000e+00> : vector<16x32xf32>
    %117 = tpu.matmul %116, %114, %cst_107 {dimension_numbers = #tpu.dot_dimension_numbers<[1], [0], [0], [1], [0, 0, 1, 1], [], []>} : vector<16x8xf32>, vector<8x32xf32>, vector<16x32xf32> -> vector<16x32xf32>
    %118 = arith.addf %111, %117 : vector<16x32xf32>
    %c4_108 = arith.constant 4 : index
    %c0_109 = arith.constant 0 : index
    %c0_110 = arith.constant 0 : index
    %119 = vector.load %arg2[%c4_108, %c0_109, %c0_110] : memref<9x128x32xf32, #tpu.memory_space<vmem>>, vector<1x128x32xf32>
    %120 = vector.shape_cast %119 : vector<1x128x32xf32> to vector<128x32xf32>
    %cst_111 = arith.constant dense<0.000000e+00> : vector<8x32xf32>
    %121 = tpu.matmul %89, %120, %cst_111 {dimension_numbers = #tpu.dot_dimension_numbers<[1], [0], [0], [1], [0, 0, 1, 1], [], []>} : vector<8x128xf32>, vector<128x32xf32>, vector<8x32xf32> -> vector<8x32xf32>
    %c4_112 = arith.constant 4 : index
    %c0_113 = arith.constant 0 : index
    %c0_114 = arith.constant 0 : index
    %122 = vector.load %arg5[%c4_112, %c0_113, %c0_114] : memref<9x16x8xf32, #tpu.memory_space<vmem>>, vector<1x16x8xf32>
    %123 = vector.shape_cast %122 : vector<1x16x8xf32> to vector<16x8xf32>
    %cst_115 = arith.constant dense<0.000000e+00> : vector<16x32xf32>
    %124 = tpu.matmul %123, %121, %cst_115 {dimension_numbers = #tpu.dot_dimension_numbers<[1], [0], [0], [1], [0, 0, 1, 1], [], []>} : vector<16x8xf32>, vector<8x32xf32>, vector<16x32xf32> -> vector<16x32xf32>
    %125 = arith.addf %118, %124 : vector<16x32xf32>
    %c5_116 = arith.constant 5 : index
    %c0_117 = arith.constant 0 : index
    %c0_118 = arith.constant 0 : index
    %126 = vector.load %arg2[%c5_116, %c0_117, %c0_118] : memref<9x128x32xf32, #tpu.memory_space<vmem>>, vector<1x128x32xf32>
    %127 = vector.shape_cast %126 : vector<1x128x32xf32> to vector<128x32xf32>
    %cst_119 = arith.constant dense<0.000000e+00> : vector<8x32xf32>
    %128 = tpu.matmul %89, %127, %cst_119 {dimension_numbers = #tpu.dot_dimension_numbers<[1], [0], [0], [1], [0, 0, 1, 1], [], []>} : vector<8x128xf32>, vector<128x32xf32>, vector<8x32xf32> -> vector<8x32xf32>
    %c5_120 = arith.constant 5 : index
    %c0_121 = arith.constant 0 : index
    %c0_122 = arith.constant 0 : index
    %129 = vector.load %arg5[%c5_120, %c0_121, %c0_122] : memref<9x16x8xf32, #tpu.memory_space<vmem>>, vector<1x16x8xf32>
    %130 = vector.shape_cast %129 : vector<1x16x8xf32> to vector<16x8xf32>
    %cst_123 = arith.constant dense<0.000000e+00> : vector<16x32xf32>
    %131 = tpu.matmul %130, %128, %cst_123 {dimension_numbers = #tpu.dot_dimension_numbers<[1], [0], [0], [1], [0, 0, 1, 1], [], []>} : vector<16x8xf32>, vector<8x32xf32>, vector<16x32xf32> -> vector<16x32xf32>
    %132 = arith.addf %125, %131 : vector<16x32xf32>
    %c6_124 = arith.constant 6 : index
    %c0_125 = arith.constant 0 : index
    %c0_126 = arith.constant 0 : index
    %133 = vector.load %arg2[%c6_124, %c0_125, %c0_126] : memref<9x128x32xf32, #tpu.memory_space<vmem>>, vector<1x128x32xf32>
    %134 = vector.shape_cast %133 : vector<1x128x32xf32> to vector<128x32xf32>
    %cst_127 = arith.constant dense<0.000000e+00> : vector<8x32xf32>
    %135 = tpu.matmul %89, %134, %cst_127 {dimension_numbers = #tpu.dot_dimension_numbers<[1], [0], [0], [1], [0, 0, 1, 1], [], []>} : vector<8x128xf32>, vector<128x32xf32>, vector<8x32xf32> -> vector<8x32xf32>
    %c6_128 = arith.constant 6 : index
    %c0_129 = arith.constant 0 : index
    %c0_130 = arith.constant 0 : index
    %136 = vector.load %arg5[%c6_128, %c0_129, %c0_130] : memref<9x16x8xf32, #tpu.memory_space<vmem>>, vector<1x16x8xf32>
    %137 = vector.shape_cast %136 : vector<1x16x8xf32> to vector<16x8xf32>
    %cst_131 = arith.constant dense<0.000000e+00> : vector<16x32xf32>
    %138 = tpu.matmul %137, %135, %cst_131 {dimension_numbers = #tpu.dot_dimension_numbers<[1], [0], [0], [1], [0, 0, 1, 1], [], []>} : vector<16x8xf32>, vector<8x32xf32>, vector<16x32xf32> -> vector<16x32xf32>
    %139 = arith.addf %132, %138 : vector<16x32xf32>
    %c7_132 = arith.constant 7 : index
    %c0_133 = arith.constant 0 : index
    %c0_134 = arith.constant 0 : index
    %140 = vector.load %arg2[%c7_132, %c0_133, %c0_134] : memref<9x128x32xf32, #tpu.memory_space<vmem>>, vector<1x128x32xf32>
    %141 = vector.shape_cast %140 : vector<1x128x32xf32> to vector<128x32xf32>
    %cst_135 = arith.constant dense<0.000000e+00> : vector<8x32xf32>
    %142 = tpu.matmul %89, %141, %cst_135 {dimension_numbers = #tpu.dot_dimension_numbers<[1], [0], [0], [1], [0, 0, 1, 1], [], []>} : vector<8x128xf32>, vector<128x32xf32>, vector<8x32xf32> -> vector<8x32xf32>
    %c7_136 = arith.constant 7 : index
    %c0_137 = arith.constant 0 : index
    %c0_138 = arith.constant 0 : index
    %143 = vector.load %arg5[%c7_136, %c0_137, %c0_138] : memref<9x16x8xf32, #tpu.memory_space<vmem>>, vector<1x16x8xf32>
    %144 = vector.shape_cast %143 : vector<1x16x8xf32> to vector<16x8xf32>
    %cst_139 = arith.constant dense<0.000000e+00> : vector<16x32xf32>
    %145 = tpu.matmul %144, %142, %cst_139 {dimension_numbers = #tpu.dot_dimension_numbers<[1], [0], [0], [1], [0, 0, 1, 1], [], []>} : vector<16x8xf32>, vector<8x32xf32>, vector<16x32xf32> -> vector<16x32xf32>
    %146 = arith.addf %139, %145 : vector<16x32xf32>
    %c8_140 = arith.constant 8 : index
    %c0_141 = arith.constant 0 : index
    %c0_142 = arith.constant 0 : index
    %147 = vector.load %arg2[%c8_140, %c0_141, %c0_142] : memref<9x128x32xf32, #tpu.memory_space<vmem>>, vector<1x128x32xf32>
    %148 = vector.shape_cast %147 : vector<1x128x32xf32> to vector<128x32xf32>
    %cst_143 = arith.constant dense<0.000000e+00> : vector<8x32xf32>
    %149 = tpu.matmul %89, %148, %cst_143 {dimension_numbers = #tpu.dot_dimension_numbers<[1], [0], [0], [1], [0, 0, 1, 1], [], []>} : vector<8x128xf32>, vector<128x32xf32>, vector<8x32xf32> -> vector<8x32xf32>
    %c8_144 = arith.constant 8 : index
    %c0_145 = arith.constant 0 : index
    %c0_146 = arith.constant 0 : index
    %150 = vector.load %arg5[%c8_144, %c0_145, %c0_146] : memref<9x16x8xf32, #tpu.memory_space<vmem>>, vector<1x16x8xf32>
    %151 = vector.shape_cast %150 : vector<1x16x8xf32> to vector<16x8xf32>
    %cst_147 = arith.constant dense<0.000000e+00> : vector<16x32xf32>
    %152 = tpu.matmul %151, %149, %cst_147 {dimension_numbers = #tpu.dot_dimension_numbers<[1], [0], [0], [1], [0, 0, 1, 1], [], []>} : vector<16x8xf32>, vector<8x32xf32>, vector<16x32xf32> -> vector<16x32xf32>
    %153 = arith.addf %146, %152 : vector<16x32xf32>
    %cst_148 = arith.constant dense<0.000000e+00> : vector<16xf32>
    %154 = vector.multi_reduction <add>, %153, %cst_148 [1] : vector<16x32xf32> to vector<16xf32>
    %155 = vector.shape_cast %154 : vector<16xf32> to vector<16x1xf32>
    %cst_149 = arith.constant 3.125000e-02 : f32
    %156 = vector.broadcast %cst_149 : f32 to vector<16x1xf32>
    %157 = arith.mulf %155, %156 : vector<16x1xf32>
    %158 = arith.mulf %153, %153 : vector<16x32xf32>
    %cst_150 = arith.constant dense<0.000000e+00> : vector<16xf32>
    %159 = vector.multi_reduction <add>, %158, %cst_150 [1] : vector<16x32xf32> to vector<16xf32>
    %160 = vector.shape_cast %159 : vector<16xf32> to vector<16x1xf32>
    %cst_151 = arith.constant 3.125000e-02 : f32
    %161 = vector.broadcast %cst_151 : f32 to vector<16x1xf32>
    %162 = arith.mulf %160, %161 : vector<16x1xf32>
    %163 = arith.mulf %157, %157 : vector<16x1xf32>
    %164 = arith.subf %162, %163 : vector<16x1xf32>
    %cst_152 = arith.constant 9.99999974E-6 : f32
    %165 = vector.broadcast %cst_152 : f32 to vector<16x1xf32>
    %166 = arith.addf %164, %165 : vector<16x1xf32>
    %167 = math.rsqrt %166 : vector<16x1xf32>
    %c0_153 = arith.constant 0 : index
    %c0_154 = arith.constant 0 : index
    %168 = vector.load %arg9[%c0_153, %c0_154] : memref<16x1xf32, #tpu.memory_space<vmem>>, vector<16x1xf32>
    %169 = arith.mulf %168, %167 : vector<16x1xf32>
    %c0_155 = arith.constant 0 : index
    %c0_156 = arith.constant 0 : index
    %170 = vector.load %arg10[%c0_155, %c0_156] : memref<16x1xf32, #tpu.memory_space<vmem>>, vector<16x1xf32>
    %171 = arith.mulf %157, %169 : vector<16x1xf32>
    %172 = arith.subf %170, %171 : vector<16x1xf32>
    %173 = vector.broadcast %169 : vector<16x1xf32> to vector<16x32xf32>
    %174 = arith.mulf %153, %173 : vector<16x32xf32>
    %175 = vector.broadcast %172 : vector<16x1xf32> to vector<16x32xf32>
    %176 = arith.addf %174, %175 : vector<16x32xf32>
    %cst_157 = arith.constant 0.000000e+00 : f32
    %177 = vector.broadcast %cst_157 : f32 to vector<16x32xf32>
    %178 = arith.maximumf %176, %177 : vector<16x32xf32>
    %cst_158 = arith.constant 0.000000e+00 : f32
    %179 = vector.broadcast %cst_158 : f32 to vector<32x8xf32>
    %c0_159 = arith.constant 0 : index
    %c0_160 = arith.constant 0 : index
    %c0_161 = arith.constant 0 : index
    %180 = vector.load %arg3[%c0_159, %c0_160, %c0_161] : memref<9x32x8xf32, #tpu.memory_space<vmem>>, vector<1x32x8xf32>
    %181 = vector.shape_cast %180 : vector<1x32x8xf32> to vector<32x8xf32>
    %cst_162 = arith.constant dense<0.000000e+00> : vector<16x8xf32>
    %182 = tpu.matmul %178, %181, %cst_162 {dimension_numbers = #tpu.dot_dimension_numbers<[1], [0], [0], [1], [0, 0, 1, 1], [], []>} : vector<16x32xf32>, vector<32x8xf32>, vector<16x8xf32> -> vector<16x8xf32>
    %c0_163 = arith.constant 0 : index
    %c0_164 = arith.constant 0 : index
    %c0_165 = arith.constant 0 : index
    %183 = vector.load %arg6[%c0_163, %c0_164, %c0_165] : memref<9x32x16xf32, #tpu.memory_space<vmem>>, vector<1x32x16xf32>
    %184 = vector.shape_cast %183 : vector<1x32x16xf32> to vector<32x16xf32>
    %cst_166 = arith.constant dense<0.000000e+00> : vector<32x8xf32>
    %185 = tpu.matmul %184, %182, %cst_166 {dimension_numbers = #tpu.dot_dimension_numbers<[1], [0], [0], [1], [0, 0, 1, 1], [], []>} : vector<32x16xf32>, vector<16x8xf32>, vector<32x8xf32> -> vector<32x8xf32>
    %186 = arith.addf %179, %185 : vector<32x8xf32>
    %c1_167 = arith.constant 1 : index
    %c0_168 = arith.constant 0 : index
    %c0_169 = arith.constant 0 : index
    %187 = vector.load %arg3[%c1_167, %c0_168, %c0_169] : memref<9x32x8xf32, #tpu.memory_space<vmem>>, vector<1x32x8xf32>
    %188 = vector.shape_cast %187 : vector<1x32x8xf32> to vector<32x8xf32>
    %cst_170 = arith.constant dense<0.000000e+00> : vector<16x8xf32>
    %189 = tpu.matmul %178, %188, %cst_170 {dimension_numbers = #tpu.dot_dimension_numbers<[1], [0], [0], [1], [0, 0, 1, 1], [], []>} : vector<16x32xf32>, vector<32x8xf32>, vector<16x8xf32> -> vector<16x8xf32>
    %c1_171 = arith.constant 1 : index
    %c0_172 = arith.constant 0 : index
    %c0_173 = arith.constant 0 : index
    %190 = vector.load %arg6[%c1_171, %c0_172, %c0_173] : memref<9x32x16xf32, #tpu.memory_space<vmem>>, vector<1x32x16xf32>
    %191 = vector.shape_cast %190 : vector<1x32x16xf32> to vector<32x16xf32>
    %cst_174 = arith.constant dense<0.000000e+00> : vector<32x8xf32>
    %192 = tpu.matmul %191, %189, %cst_174 {dimension_numbers = #tpu.dot_dimension_numbers<[1], [0], [0], [1], [0, 0, 1, 1], [], []>} : vector<32x16xf32>, vector<16x8xf32>, vector<32x8xf32> -> vector<32x8xf32>
    %193 = arith.addf %186, %192 : vector<32x8xf32>
    %c2_175 = arith.constant 2 : index
    %c0_176 = arith.constant 0 : index
    %c0_177 = arith.constant 0 : index
    %194 = vector.load %arg3[%c2_175, %c0_176, %c0_177] : memref<9x32x8xf32, #tpu.memory_space<vmem>>, vector<1x32x8xf32>
    %195 = vector.shape_cast %194 : vector<1x32x8xf32> to vector<32x8xf32>
    %cst_178 = arith.constant dense<0.000000e+00> : vector<16x8xf32>
    %196 = tpu.matmul %178, %195, %cst_178 {dimension_numbers = #tpu.dot_dimension_numbers<[1], [0], [0], [1], [0, 0, 1, 1], [], []>} : vector<16x32xf32>, vector<32x8xf32>, vector<16x8xf32> -> vector<16x8xf32>
    %c2_179 = arith.constant 2 : index
    %c0_180 = arith.constant 0 : index
    %c0_181 = arith.constant 0 : index
    %197 = vector.load %arg6[%c2_179, %c0_180, %c0_181] : memref<9x32x16xf32, #tpu.memory_space<vmem>>, vector<1x32x16xf32>
    %198 = vector.shape_cast %197 : vector<1x32x16xf32> to vector<32x16xf32>
    %cst_182 = arith.constant dense<0.000000e+00> : vector<32x8xf32>
    %199 = tpu.matmul %198, %196, %cst_182 {dimension_numbers = #tpu.dot_dimension_numbers<[1], [0], [0], [1], [0, 0, 1, 1], [], []>} : vector<32x16xf32>, vector<16x8xf32>, vector<32x8xf32> -> vector<32x8xf32>
    %200 = arith.addf %193, %199 : vector<32x8xf32>
    %c3_183 = arith.constant 3 : index
    %c0_184 = arith.constant 0 : index
    %c0_185 = arith.constant 0 : index
    %201 = vector.load %arg3[%c3_183, %c0_184, %c0_185] : memref<9x32x8xf32, #tpu.memory_space<vmem>>, vector<1x32x8xf32>
    %202 = vector.shape_cast %201 : vector<1x32x8xf32> to vector<32x8xf32>
    %cst_186 = arith.constant dense<0.000000e+00> : vector<16x8xf32>
    %203 = tpu.matmul %178, %202, %cst_186 {dimension_numbers = #tpu.dot_dimension_numbers<[1], [0], [0], [1], [0, 0, 1, 1], [], []>} : vector<16x32xf32>, vector<32x8xf32>, vector<16x8xf32> -> vector<16x8xf32>
    %c3_187 = arith.constant 3 : index
    %c0_188 = arith.constant 0 : index
    %c0_189 = arith.constant 0 : index
    %204 = vector.load %arg6[%c3_187, %c0_188, %c0_189] : memref<9x32x16xf32, #tpu.memory_space<vmem>>, vector<1x32x16xf32>
    %205 = vector.shape_cast %204 : vector<1x32x16xf32> to vector<32x16xf32>
    %cst_190 = arith.constant dense<0.000000e+00> : vector<32x8xf32>
    %206 = tpu.matmul %205, %203, %cst_190 {dimension_numbers = #tpu.dot_dimension_numbers<[1], [0], [0], [1], [0, 0, 1, 1], [], []>} : vector<32x16xf32>, vector<16x8xf32>, vector<32x8xf32> -> vector<32x8xf32>
    %207 = arith.addf %200, %206 : vector<32x8xf32>
    %c4_191 = arith.constant 4 : index
    %c0_192 = arith.constant 0 : index
    %c0_193 = arith.constant 0 : index
    %208 = vector.load %arg3[%c4_191, %c0_192, %c0_193] : memref<9x32x8xf32, #tpu.memory_space<vmem>>, vector<1x32x8xf32>
    %209 = vector.shape_cast %208 : vector<1x32x8xf32> to vector<32x8xf32>
    %cst_194 = arith.constant dense<0.000000e+00> : vector<16x8xf32>
    %210 = tpu.matmul %178, %209, %cst_194 {dimension_numbers = #tpu.dot_dimension_numbers<[1], [0], [0], [1], [0, 0, 1, 1], [], []>} : vector<16x32xf32>, vector<32x8xf32>, vector<16x8xf32> -> vector<16x8xf32>
    %c4_195 = arith.constant 4 : index
    %c0_196 = arith.constant 0 : index
    %c0_197 = arith.constant 0 : index
    %211 = vector.load %arg6[%c4_195, %c0_196, %c0_197] : memref<9x32x16xf32, #tpu.memory_space<vmem>>, vector<1x32x16xf32>
    %212 = vector.shape_cast %211 : vector<1x32x16xf32> to vector<32x16xf32>
    %cst_198 = arith.constant dense<0.000000e+00> : vector<32x8xf32>
    %213 = tpu.matmul %212, %210, %cst_198 {dimension_numbers = #tpu.dot_dimension_numbers<[1], [0], [0], [1], [0, 0, 1, 1], [], []>} : vector<32x16xf32>, vector<16x8xf32>, vector<32x8xf32> -> vector<32x8xf32>
    %214 = arith.addf %207, %213 : vector<32x8xf32>
    %c5_199 = arith.constant 5 : index
    %c0_200 = arith.constant 0 : index
    %c0_201 = arith.constant 0 : index
    %215 = vector.load %arg3[%c5_199, %c0_200, %c0_201] : memref<9x32x8xf32, #tpu.memory_space<vmem>>, vector<1x32x8xf32>
    %216 = vector.shape_cast %215 : vector<1x32x8xf32> to vector<32x8xf32>
    %cst_202 = arith.constant dense<0.000000e+00> : vector<16x8xf32>
    %217 = tpu.matmul %178, %216, %cst_202 {dimension_numbers = #tpu.dot_dimension_numbers<[1], [0], [0], [1], [0, 0, 1, 1], [], []>} : vector<16x32xf32>, vector<32x8xf32>, vector<16x8xf32> -> vector<16x8xf32>
    %c5_203 = arith.constant 5 : index
    %c0_204 = arith.constant 0 : index
    %c0_205 = arith.constant 0 : index
    %218 = vector.load %arg6[%c5_203, %c0_204, %c0_205] : memref<9x32x16xf32, #tpu.memory_space<vmem>>, vector<1x32x16xf32>
    %219 = vector.shape_cast %218 : vector<1x32x16xf32> to vector<32x16xf32>
    %cst_206 = arith.constant dense<0.000000e+00> : vector<32x8xf32>
    %220 = tpu.matmul %219, %217, %cst_206 {dimension_numbers = #tpu.dot_dimension_numbers<[1], [0], [0], [1], [0, 0, 1, 1], [], []>} : vector<32x16xf32>, vector<16x8xf32>, vector<32x8xf32> -> vector<32x8xf32>
    %221 = arith.addf %214, %220 : vector<32x8xf32>
    %c6_207 = arith.constant 6 : index
    %c0_208 = arith.constant 0 : index
    %c0_209 = arith.constant 0 : index
    %222 = vector.load %arg3[%c6_207, %c0_208, %c0_209] : memref<9x32x8xf32, #tpu.memory_space<vmem>>, vector<1x32x8xf32>
    %223 = vector.shape_cast %222 : vector<1x32x8xf32> to vector<32x8xf32>
    %cst_210 = arith.constant dense<0.000000e+00> : vector<16x8xf32>
    %224 = tpu.matmul %178, %223, %cst_210 {dimension_numbers = #tpu.dot_dimension_numbers<[1], [0], [0], [1], [0, 0, 1, 1], [], []>} : vector<16x32xf32>, vector<32x8xf32>, vector<16x8xf32> -> vector<16x8xf32>
    %c6_211 = arith.constant 6 : index
    %c0_212 = arith.constant 0 : index
    %c0_213 = arith.constant 0 : index
    %225 = vector.load %arg6[%c6_211, %c0_212, %c0_213] : memref<9x32x16xf32, #tpu.memory_space<vmem>>, vector<1x32x16xf32>
    %226 = vector.shape_cast %225 : vector<1x32x16xf32> to vector<32x16xf32>
    %cst_214 = arith.constant dense<0.000000e+00> : vector<32x8xf32>
    %227 = tpu.matmul %226, %224, %cst_214 {dimension_numbers = #tpu.dot_dimension_numbers<[1], [0], [0], [1], [0, 0, 1, 1], [], []>} : vector<32x16xf32>, vector<16x8xf32>, vector<32x8xf32> -> vector<32x8xf32>
    %228 = arith.addf %221, %227 : vector<32x8xf32>
    %c7_215 = arith.constant 7 : index
    %c0_216 = arith.constant 0 : index
    %c0_217 = arith.constant 0 : index
    %229 = vector.load %arg3[%c7_215, %c0_216, %c0_217] : memref<9x32x8xf32, #tpu.memory_space<vmem>>, vector<1x32x8xf32>
    %230 = vector.shape_cast %229 : vector<1x32x8xf32> to vector<32x8xf32>
    %cst_218 = arith.constant dense<0.000000e+00> : vector<16x8xf32>
    %231 = tpu.matmul %178, %230, %cst_218 {dimension_numbers = #tpu.dot_dimension_numbers<[1], [0], [0], [1], [0, 0, 1, 1], [], []>} : vector<16x32xf32>, vector<32x8xf32>, vector<16x8xf32> -> vector<16x8xf32>
    %c7_219 = arith.constant 7 : index
    %c0_220 = arith.constant 0 : index
    %c0_221 = arith.constant 0 : index
    %232 = vector.load %arg6[%c7_219, %c0_220, %c0_221] : memref<9x32x16xf32, #tpu.memory_space<vmem>>, vector<1x32x16xf32>
    %233 = vector.shape_cast %232 : vector<1x32x16xf32> to vector<32x16xf32>
    %cst_222 = arith.constant dense<0.000000e+00> : vector<32x8xf32>
    %234 = tpu.matmul %233, %231, %cst_222 {dimension_numbers = #tpu.dot_dimension_numbers<[1], [0], [0], [1], [0, 0, 1, 1], [], []>} : vector<32x16xf32>, vector<16x8xf32>, vector<32x8xf32> -> vector<32x8xf32>
    %235 = arith.addf %228, %234 : vector<32x8xf32>
    %c8_223 = arith.constant 8 : index
    %c0_224 = arith.constant 0 : index
    %c0_225 = arith.constant 0 : index
    %236 = vector.load %arg3[%c8_223, %c0_224, %c0_225] : memref<9x32x8xf32, #tpu.memory_space<vmem>>, vector<1x32x8xf32>
    %237 = vector.shape_cast %236 : vector<1x32x8xf32> to vector<32x8xf32>
    %cst_226 = arith.constant dense<0.000000e+00> : vector<16x8xf32>
    %238 = tpu.matmul %178, %237, %cst_226 {dimension_numbers = #tpu.dot_dimension_numbers<[1], [0], [0], [1], [0, 0, 1, 1], [], []>} : vector<16x32xf32>, vector<32x8xf32>, vector<16x8xf32> -> vector<16x8xf32>
    %c8_227 = arith.constant 8 : index
    %c0_228 = arith.constant 0 : index
    %c0_229 = arith.constant 0 : index
    %239 = vector.load %arg6[%c8_227, %c0_228, %c0_229] : memref<9x32x16xf32, #tpu.memory_space<vmem>>, vector<1x32x16xf32>
    %240 = vector.shape_cast %239 : vector<1x32x16xf32> to vector<32x16xf32>
    %cst_230 = arith.constant dense<0.000000e+00> : vector<32x8xf32>
    %241 = tpu.matmul %240, %238, %cst_230 {dimension_numbers = #tpu.dot_dimension_numbers<[1], [0], [0], [1], [0, 0, 1, 1], [], []>} : vector<32x16xf32>, vector<16x8xf32>, vector<32x8xf32> -> vector<32x8xf32>
    %242 = arith.addf %235, %241 : vector<32x8xf32>
    %cst_231 = arith.constant dense<0.000000e+00> : vector<32xf32>
    %243 = vector.multi_reduction <add>, %242, %cst_231 [1] : vector<32x8xf32> to vector<32xf32>
    %244 = vector.shape_cast %243 : vector<32xf32> to vector<32x1xf32>
    %cst_232 = arith.constant 1.250000e-01 : f32
    %245 = vector.broadcast %cst_232 : f32 to vector<32x1xf32>
    %246 = arith.mulf %244, %245 : vector<32x1xf32>
    %247 = arith.mulf %242, %242 : vector<32x8xf32>
    %cst_233 = arith.constant dense<0.000000e+00> : vector<32xf32>
    %248 = vector.multi_reduction <add>, %247, %cst_233 [1] : vector<32x8xf32> to vector<32xf32>
    %249 = vector.shape_cast %248 : vector<32xf32> to vector<32x1xf32>
    %cst_234 = arith.constant 1.250000e-01 : f32
    %250 = vector.broadcast %cst_234 : f32 to vector<32x1xf32>
    %251 = arith.mulf %249, %250 : vector<32x1xf32>
    %252 = arith.mulf %246, %246 : vector<32x1xf32>
    %253 = arith.subf %251, %252 : vector<32x1xf32>
    %cst_235 = arith.constant 9.99999974E-6 : f32
    %254 = vector.broadcast %cst_235 : f32 to vector<32x1xf32>
    %255 = arith.addf %253, %254 : vector<32x1xf32>
    %256 = math.rsqrt %255 : vector<32x1xf32>
    %c0_236 = arith.constant 0 : index
    %c0_237 = arith.constant 0 : index
    %257 = vector.load %arg11[%c0_236, %c0_237] : memref<32x1xf32, #tpu.memory_space<vmem>>, vector<32x1xf32>
    %258 = arith.mulf %257, %256 : vector<32x1xf32>
    %c0_238 = arith.constant 0 : index
    %c0_239 = arith.constant 0 : index
    %259 = vector.load %arg12[%c0_238, %c0_239] : memref<32x1xf32, #tpu.memory_space<vmem>>, vector<32x1xf32>
    %260 = arith.mulf %246, %258 : vector<32x1xf32>
    %261 = arith.subf %259, %260 : vector<32x1xf32>
    %262 = vector.broadcast %258 : vector<32x1xf32> to vector<32x8xf32>
    %263 = arith.mulf %242, %262 : vector<32x8xf32>
    %264 = vector.broadcast %261 : vector<32x1xf32> to vector<32x8xf32>
    %265 = arith.addf %263, %264 : vector<32x8xf32>
    %cst_240 = arith.constant 0.000000e+00 : f32
    %266 = vector.broadcast %cst_240 : f32 to vector<32x8xf32>
    %267 = arith.maximumf %265, %266 : vector<32x8xf32>
    %cst_241 = arith.constant 0.000000e+00 : f32
    %268 = vector.broadcast %cst_241 : f32 to vector<10x2xf32>
    %c0_242 = arith.constant 0 : index
    %c0_243 = arith.constant 0 : index
    %c0_244 = arith.constant 0 : index
    %269 = vector.load %arg14[%c0_242, %c0_243, %c0_244] : memref<4x8x2xf32, #tpu.memory_space<vmem>>, vector<1x8x2xf32>
    %270 = vector.shape_cast %269 : vector<1x8x2xf32> to vector<8x2xf32>
    %cst_245 = arith.constant dense<0.000000e+00> : vector<32x2xf32>
    %271 = tpu.matmul %267, %270, %cst_245 {dimension_numbers = #tpu.dot_dimension_numbers<[1], [0], [0], [1], [0, 0, 1, 1], [], []>} : vector<32x8xf32>, vector<8x2xf32>, vector<32x2xf32> -> vector<32x2xf32>
    %c0_246 = arith.constant 0 : index
    %c0_247 = arith.constant 0 : index
    %c0_248 = arith.constant 0 : index
    %272 = vector.load %arg13[%c0_246, %c0_247, %c0_248] : memref<4x10x32xf32, #tpu.memory_space<vmem>>, vector<1x10x32xf32>
    %273 = vector.shape_cast %272 : vector<1x10x32xf32> to vector<10x32xf32>
    %cst_249 = arith.constant dense<0.000000e+00> : vector<10x2xf32>
    %274 = tpu.matmul %273, %271, %cst_249 {dimension_numbers = #tpu.dot_dimension_numbers<[1], [0], [0], [1], [0, 0, 1, 1], [], []>} : vector<10x32xf32>, vector<32x2xf32>, vector<10x2xf32> -> vector<10x2xf32>
    %275 = arith.addf %268, %274 : vector<10x2xf32>
    %c1_250 = arith.constant 1 : index
    %c0_251 = arith.constant 0 : index
    %c0_252 = arith.constant 0 : index
    %276 = vector.load %arg14[%c1_250, %c0_251, %c0_252] : memref<4x8x2xf32, #tpu.memory_space<vmem>>, vector<1x8x2xf32>
    %277 = vector.shape_cast %276 : vector<1x8x2xf32> to vector<8x2xf32>
    %cst_253 = arith.constant dense<0.000000e+00> : vector<32x2xf32>
    %278 = tpu.matmul %267, %277, %cst_253 {dimension_numbers = #tpu.dot_dimension_numbers<[1], [0], [0], [1], [0, 0, 1, 1], [], []>} : vector<32x8xf32>, vector<8x2xf32>, vector<32x2xf32> -> vector<32x2xf32>
    %c1_254 = arith.constant 1 : index
    %c0_255 = arith.constant 0 : index
    %c0_256 = arith.constant 0 : index
    %279 = vector.load %arg13[%c1_254, %c0_255, %c0_256] : memref<4x10x32xf32, #tpu.memory_space<vmem>>, vector<1x10x32xf32>
    %280 = vector.shape_cast %279 : vector<1x10x32xf32> to vector<10x32xf32>
    %cst_257 = arith.constant dense<0.000000e+00> : vector<10x2xf32>
    %281 = tpu.matmul %280, %278, %cst_257 {dimension_numbers = #tpu.dot_dimension_numbers<[1], [0], [0], [1], [0, 0, 1, 1], [], []>} : vector<10x32xf32>, vector<32x2xf32>, vector<10x2xf32> -> vector<10x2xf32>
    %282 = arith.addf %275, %281 : vector<10x2xf32>
    %c2_258 = arith.constant 2 : index
    %c0_259 = arith.constant 0 : index
    %c0_260 = arith.constant 0 : index
    %283 = vector.load %arg14[%c2_258, %c0_259, %c0_260] : memref<4x8x2xf32, #tpu.memory_space<vmem>>, vector<1x8x2xf32>
    %284 = vector.shape_cast %283 : vector<1x8x2xf32> to vector<8x2xf32>
    %cst_261 = arith.constant dense<0.000000e+00> : vector<32x2xf32>
    %285 = tpu.matmul %267, %284, %cst_261 {dimension_numbers = #tpu.dot_dimension_numbers<[1], [0], [0], [1], [0, 0, 1, 1], [], []>} : vector<32x8xf32>, vector<8x2xf32>, vector<32x2xf32> -> vector<32x2xf32>
    %c2_262 = arith.constant 2 : index
    %c0_263 = arith.constant 0 : index
    %c0_264 = arith.constant 0 : index
    %286 = vector.load %arg13[%c2_262, %c0_263, %c0_264] : memref<4x10x32xf32, #tpu.memory_space<vmem>>, vector<1x10x32xf32>
    %287 = vector.shape_cast %286 : vector<1x10x32xf32> to vector<10x32xf32>
    %cst_265 = arith.constant dense<0.000000e+00> : vector<10x2xf32>
    %288 = tpu.matmul %287, %285, %cst_265 {dimension_numbers = #tpu.dot_dimension_numbers<[1], [0], [0], [1], [0, 0, 1, 1], [], []>} : vector<10x32xf32>, vector<32x2xf32>, vector<10x2xf32> -> vector<10x2xf32>
    %289 = arith.addf %282, %288 : vector<10x2xf32>
    %c3_266 = arith.constant 3 : index
    %c0_267 = arith.constant 0 : index
    %c0_268 = arith.constant 0 : index
    %290 = vector.load %arg14[%c3_266, %c0_267, %c0_268] : memref<4x8x2xf32, #tpu.memory_space<vmem>>, vector<1x8x2xf32>
    %291 = vector.shape_cast %290 : vector<1x8x2xf32> to vector<8x2xf32>
    %cst_269 = arith.constant dense<0.000000e+00> : vector<32x2xf32>
    %292 = tpu.matmul %267, %291, %cst_269 {dimension_numbers = #tpu.dot_dimension_numbers<[1], [0], [0], [1], [0, 0, 1, 1], [], []>} : vector<32x8xf32>, vector<8x2xf32>, vector<32x2xf32> -> vector<32x2xf32>
    %c3_270 = arith.constant 3 : index
    %c0_271 = arith.constant 0 : index
    %c0_272 = arith.constant 0 : index
    %293 = vector.load %arg13[%c3_270, %c0_271, %c0_272] : memref<4x10x32xf32, #tpu.memory_space<vmem>>, vector<1x10x32xf32>
    %294 = vector.shape_cast %293 : vector<1x10x32xf32> to vector<10x32xf32>
    %cst_273 = arith.constant dense<0.000000e+00> : vector<10x2xf32>
    %295 = tpu.matmul %294, %292, %cst_273 {dimension_numbers = #tpu.dot_dimension_numbers<[1], [0], [0], [1], [0, 0, 1, 1], [], []>} : vector<10x32xf32>, vector<32x2xf32>, vector<10x2xf32> -> vector<10x2xf32>
    %296 = arith.addf %289, %295 : vector<10x2xf32>
    %c0_274 = arith.constant 0 : index
    %c0_275 = arith.constant 0 : index
    %297 = vector.load %arg15[%c0_274, %c0_275] : memref<10x1xf32, #tpu.memory_space<vmem>>, vector<10x1xf32>
    %298 = vector.broadcast %297 : vector<10x1xf32> to vector<10x2xf32>
    %299 = arith.addf %296, %298 : vector<10x2xf32>
    %c0_276 = arith.constant 0 : index
    %c0_277 = arith.constant 0 : index
    %300 = vector.load %arg16[%c0_276, %c0_277] : memref<10x2xf32, #tpu.memory_space<vmem>>, vector<10x2xf32>
    tpu.vector_store %arg16[%c0_276, %c0_277], %299 {strides = array<i32>} : memref<10x2xf32, #tpu.memory_space<vmem>>, vector<10x2xf32>,
    return
  }
}

</mosaic_0001>

<bundles_post_ra>
// kernel: conv2dnet_forward.1
= control target key start
LH: loop header
LB: loop body
LE: loop exit
PB: predicated region body
PF: predicated region fallthrough
CT: control target
= control target key end

     0   :  { %s11172_s0 = inlined_call_operand.vmem [shape: f32[4,512], index: 0, kind: input, shape index: {}]   ;;  %s11173_s1 = inlined_call_operand.hbm [shape: f32[9,512,128], index: 1, kind: input, shape index: {}]   ;;  %s11174_s2 = inlined_call_operand.vmem [shape: f32[9,128,32], index: 2, kind: input, shape index: {}]   ;;  %s11175_s3 = inlined_call_operand.vmem [shape: f32[9,32,8], index: 3, kind: input, shape index: {}]   ;;  %s11176_s4 = inlined_call_operand.vmem [shape: f32[9,8,4], index: 4, kind: input, shape index: {}]   ;;  %s11177_s5 = inlined_call_operand.vmem [shape: f32[9,16,8], index: 5, kind: input, shape index: {}]   ;;  %s11178_s6 = inlined_call_operand.vmem [shape: f32[9,32,16], index: 6, kind: input, shape index: {}]   ;;  %s11179_s7 = inlined_call_operand.vmem [shape: f32[8,1], index: 7, kind: input, shape index: {}]   ;;  %s11180_s8 = inlined_call_operand.vmem [shape: f32[8,1], index: 8, kind: input, shape index: {}]   ;;  %s11181_s9 = inlined_call_operand.vmem [shape: f32[16,1], index: 9, kind: input, shape index: {}]   ;;  %s11182_s10 = inlined_call_operand.vmem [shape: f32[16,1], index: 10, kind: input, shape index: {}]   ;;  %s11183_s11 = inlined_call_operand.vmem [shape: f32[32,1], index: 11, kind: input, shape index: {}]   ;;  %s11184_s12 = inlined_call_operand.vmem [shape: f32[32,1], index: 12, kind: input, shape index: {}]   ;;  %s11185_s13 = inlined_call_operand.vmem [shape: f32[4,10,32], index: 13, kind: input, shape index: {}]   ;;  %s11186_s14 = inlined_call_operand.vmem [shape: f32[4,8,2], index: 14, kind: input, shape index: {}]   ;;  %s11187_s15 = inlined_call_operand.vmem [shape: f32[10,1], index: 15, kind: input, shape index: {}]   ;;  %s11188_s16 = inlined_call_operand.vmem [shape: f32[10,2], index: 16, kind: output, shape index: {}]  }
   0x1   :  { %11190 = sst [smem:[#allocation5_spill]] %s11172_s0 }
   0x2   :  { %21 = vsyncpa [#allocation3], 0  ;;  %s9833_s21 = smov [#allocation2]   ;;  %s9809_s25 = scalar_lea.hbm %s11173_s1, 73728 }
   0x3   :  { %s29_s22 = sshll.u32 %s9833_s21, 4  ;;  %p9810_p0 = scmp.ne.s32.totalorder %s11173_s1, %s9809_s25  ;;  %s30_s22 = int_to_ptr.vmem [resolvable:$true] %s29_s22 }
   0x4   :  { %p9813_p1 = scmp.lt.u32.totalorder %s9809_s25, %s11173_s1 }
   0x6   :  { %p9815_p2 = pnand %p9813_p1, %p9810_p0 }
   0x8   :  { %9818 = shalt.err (!%p9815_p2)
}
   0x9   :  { %s9819_s30 = scalar_lea.vmem %s30_s22, 73728  ;;  %p9824_p4 = scmp.lt.s32.totalorder %s30_s22, %s30_s22 }
   0xa   :  { %p9820_p3 = scmp.ne.s32.totalorder %s30_s22, %s9819_s30  ;;  %p9825_p5 = scmp.lt.s32.totalorder %s9819_s30, %s9819_s30 }
   0xc   :  { %p9826_p6 = por %p9825_p5, %p9824_p4 }
   0xe   :  { %p9827_p7 = pnand %p9826_p6, %p9820_p3 }
  0x10   :  { %9830 = shalt.err (!%p9827_p7)
}
  0x11   :  { %s9834_s0 = smov 128   ;;  %s9835_s17 = smov 8  }
  0x12   :  { %35 = dma.hbm_to_vmem [thread:$0]  %s11173_s1, 73728, %s30_s22, [#allocation3], %s9834_s0, %s9834_s0, %s9835_s17  }
  0x13   :  { %9831 = dma.done.wait [#allocation3], 73728  }
  0x14   :  { %9832 = vsyncadd [#allocation3], 4294893568  ;;  %v85_v0 = vld [vmem:[#allocation2 + $0x80] sm:$0xff]  ;;  %v86_v1 = vld [vmem:[#allocation2 + $0x88] sm:$0xff]  ;;  %s11191_s21 = sld [smem:[#allocation5_spill]]  ;;  %vm9837_vm0 = vmmov 0  }
  0x15   :  { %v117_v2 = vld [vmem:[#allocation2 + $0x180] sm:$0xff]  ;;  %v8778_v3 = vpack.c.bf16 %v86_v1, %v85_v0  ;;  %v118_v4 = vld [vmem:[#allocation2 + $0x188] sm:$0xff]  ;;  %v87_v11 = vld [vmem:[#allocation2 + $0x90] sm:$0xff]  ;;  %vm491_vm1 = vcmask 1043456   ;;  %vm487_vm2 = vcmask 31744   ;;  %vm2836_vm3 = vcmask 64512  }
  0x16   :  { %v69_v5 = vld [vmem:[#allocation2] sm:$0xff]  ;;  %v70_v6 = vld [vmem:[#allocation2 + $0x8] sm:$0xff]  ;;  %v8810_v7 = vpack.c.bf16 %v118_v4, %v117_v2  ;;  %v88_v13 = vld [vmem:[#allocation2 + $0x98] sm:$0xff]  ;;  %vm4210_vm4 = vcmask 261120   ;;  %vm4447_vm5 = vcmask 130048   ;;  %vm6782_vm6 = vcmask 9216  }
  0x17   :  { %v8780_v8 = vpack.c.bf16 %v70_v6, %v69_v5  ;;  %v101_v9 = vld [vmem:[#allocation2 + $0x100] sm:$0xff]  ;;  %v102_v10 = vld [vmem:[#allocation2 + $0x108] sm:$0xff]  ;;  %8779 = vmatprep.subr.bf16.mxu0 %v8778_v3  ;;  %v119_v14 = vld [vmem:[#allocation2 + $0x190] sm:$0xff]  ;;  %v8782_v16 = vpack.c.bf16 %v88_v13, %v87_v11  ;;  %vm6780_vm7 = vcmask 15360  }
  0x18   :  { %v8812_v12 = vpack.c.bf16 %v102_v10, %v101_v9  ;;  %v120_v15 = vld [vmem:[#allocation2 + $0x198] sm:$0xff]  ;;  %8811 = vmatprep.subr.bf16.mxu1 %v8810_v7  ;;  %v71_v18 = vld [vmem:[#allocation2 + $0x10] sm:$0xff]  ;;  %v89_v23 = vld [vmem:[#allocation2 + $0xa0] sm:$0xff] }
  0x19   :  { %8781 = vmatpush3.bf16.msra.mxu0 %v8780_v8  ;;  %v8814_v17 = vpack.c.bf16 %v120_v15, %v119_v14  ;;  %v72_v19 = vld [vmem:[#allocation2 + $0x18] sm:$0xff]  ;;  %v103_v20 = vld [vmem:[#allocation2 + $0x110] sm:$0xff]  ;;  %v90_v24 = vld [vmem:[#allocation2 + $0xa8] sm:$0xff] }
  0x1a   :  { %8813 = vmatpush3.bf16.msra.mxu1 %v8812_v12  ;;  %v8784_v21 = vpack.c.bf16 %v72_v19, %v71_v18  ;;  %v104_v22 = vld [vmem:[#allocation2 + $0x118] sm:$0xff]  ;;  %8783 = vmatprep.subr.bf16.mxu0 %v8782_v16  ;;  %v8786_v26 = vpack.c.bf16 %v90_v24, %v89_v23  ;;  %v121_v27 = vld [vmem:[#allocation2 + $0x1a0] sm:$0xff]  ;;  %v122_v28 = vld [vmem:[#allocation2 + $0x1a8] sm:$0xff] }
  0x1b   :  { %8815 = vmatprep.subr.bf16.mxu1 %v8814_v17  ;;  %v8816_v25 = vpack.c.bf16 %v104_v22, %v103_v20  ;;  %v73_v29 = vld [vmem:[#allocation2 + $0x20] sm:$0xff]  ;;  %v8818_v30 = vpack.c.bf16 %v122_v28, %v121_v27  ;;  %v74_v31 = vld [vmem:[#allocation2 + $0x28] sm:$0xff]  ;;  %v91_v35 = vld [vmem:[#allocation2 + $0xb0] sm:$0xff] }
  0x1c   :  { %v105_v32 = vld [vmem:[#allocation2 + $0x120] sm:$0xff]  ;;  %v106_v33 = vld [vmem:[#allocation2 + $0x128] sm:$0xff]  ;;  %v8788_v34 = vpack.c.bf16 %v74_v31, %v73_v29  ;;  %v92_v36 = vld [vmem:[#allocation2 + $0xb8] sm:$0xff] }
  0x1d   :  { %8785 = vmatpush3.bf16.msra.mxu0 %v8784_v21  ;;  %v123_v37 = vld [vmem:[#allocation2 + $0x1b0] sm:$0xff]  ;;  %v8820_v38 = vpack.c.bf16 %v106_v33, %v105_v32  ;;  %v8790_v39 = vpack.c.bf16 %v92_v36, %v91_v35  ;;  %v124_v40 = vld [vmem:[#allocation2 + $0x1b8] sm:$0xff]  ;;  %v93_v46 = vld [vmem:[#allocation2 + $0xc0] sm:$0xff] }
  0x1e   :  { %8817 = vmatpush3.bf16.msra.mxu1 %v8816_v25  ;;  %8787 = vmatprep.subr.bf16.mxu0 %v8786_v26  ;;  %v75_v41 = vld [vmem:[#allocation2 + $0x30] sm:$0xff]  ;;  %v76_v42 = vld [vmem:[#allocation2 + $0x38] sm:$0xff]  ;;  %v8822_v43 = vpack.c.bf16 %v124_v40, %v123_v37  ;;  %v94_v47 = vld [vmem:[#allocation2 + $0xc8] sm:$0xff] }
  0x1f   :  { %8819 = vmatprep.subr.bf16.mxu1 %v8818_v30  ;;  %v107_v44 = vld [vmem:[#allocation2 + $0x130] sm:$0xff]  ;;  %v108_v45 = vld [vmem:[#allocation2 + $0x138] sm:$0xff]  ;;  %v125_v48 = vld [vmem:[#allocation2 + $0x1c0] sm:$0xff]  ;;  %v8792_v50 = vpack.c.bf16 %v76_v42, %v75_v41  ;;  %v8794_v52 = vpack.c.bf16 %v94_v47, %v93_v46 }
  0x20   :  { %v126_v49 = vld [vmem:[#allocation2 + $0x1c8] sm:$0xff]  ;;  %v8824_v51 = vpack.c.bf16 %v108_v45, %v107_v44  ;;  %v77_v53 = vld [vmem:[#allocation2 + $0x40] sm:$0xff]  ;;  %v95_v58 = vld [vmem:[#allocation2 + $0xd0] sm:$0xff] }
  0x21   :  { %8789 = vmatpush3.bf16.msra.mxu0 %v8788_v34  ;;  %v78_v54 = vld [vmem:[#allocation2 + $0x48] sm:$0xff]  ;;  %v109_v55 = vld [vmem:[#allocation2 + $0x140] sm:$0xff]  ;;  %v8826_v56 = vpack.c.bf16 %v126_v49, %v125_v48  ;;  %v96_v59 = vld [vmem:[#allocation2 + $0xd8] sm:$0xff] }
  0x22   :  { %8821 = vmatpush3.bf16.msra.mxu1 %v8820_v38  ;;  %8791 = vmatprep.subr.bf16.mxu0 %v8790_v39  ;;  %v110_v57 = vld [vmem:[#allocation2 + $0x148] sm:$0xff]  ;;  %v127_v60 = vld [vmem:[#allocation2 + $0x1d0] sm:$0xff]  ;;  %v128_v61 = vld [vmem:[#allocation2 + $0x1d8] sm:$0xff]  ;;  %v8796_v62 = vpack.c.bf16 %v78_v54, %v77_v53  ;;  %v8798_v0 = vpack.c.bf16 %v96_v59, %v95_v58 }
  0x23   :  { %8823 = vmatprep.subr.bf16.mxu1 %v8822_v43  ;;  %v8828_v63 = vpack.c.bf16 %v110_v57, %v109_v55  ;;  %v79_v1 = vld [vmem:[#allocation2 + $0x50] sm:$0xff]  ;;  %v80_v2 = vld [vmem:[#allocation2 + $0x58] sm:$0xff]  ;;  %v8830_v4 = vpack.c.bf16 %v128_v61, %v127_v60  ;;  %v97_v6 = vld [vmem:[#allocation2 + $0xe0] sm:$0xff] }
  0x24   :  { %v111_v3 = vld [vmem:[#allocation2 + $0x150] sm:$0xff]  ;;  %v112_v5 = vld [vmem:[#allocation2 + $0x158] sm:$0xff]  ;;  %v98_v7 = vld [vmem:[#allocation2 + $0xe8] sm:$0xff]  ;;  %v8800_v10 = vpack.c.bf16 %v80_v2, %v79_v1 }
  0x25   :  { %8793 = vmatpush3.bf16.msra.mxu0 %v8792_v50  ;;  %v129_v8 = vld [vmem:[#allocation2 + $0x1e0] sm:$0xff]  ;;  %v130_v9 = vld [vmem:[#allocation2 + $0x1e8] sm:$0xff]  ;;  %v8832_v13 = vpack.c.bf16 %v112_v5, %v111_v3  ;;  %v8802_v14 = vpack.c.bf16 %v98_v7, %v97_v6  ;;  %v99_v20 = vld [vmem:[#allocation2 + $0xf0] sm:$0xff] }
  0x26   :  { %8825 = vmatpush3.bf16.msra.mxu1 %v8824_v51  ;;  %8795 = vmatprep.subr.bf16.mxu0 %v8794_v52  ;;  %v81_v11 = vld [vmem:[#allocation2 + $0x60] sm:$0xff]  ;;  %v82_v12 = vld [vmem:[#allocation2 + $0x68] sm:$0xff]  ;;  %v8834_v18 = vpack.c.bf16 %v130_v9, %v129_v8  ;;  %v100_v21 = vld [vmem:[#allocation2 + $0xf8] sm:$0xff] }
  0x27   :  { %8827 = vmatprep.subr.bf16.mxu1 %v8826_v56  ;;  %v113_v15 = vld [vmem:[#allocation2 + $0x160] sm:$0xff]  ;;  %v9945_v17 = vld [vmem:[%s11191_s21 + $0x8] sm:$0xff]  ;;  %v131_v24 = vld [vmem:[#allocation2 + $0x1f0] sm:$0xff]  ;;  %v8804_v26 = vpack.c.bf16 %v82_v12, %v81_v11  ;;  %v8806_v28 = vpack.c.bf16 %v100_v21, %v99_v20 }
  0x28   :  { %v9940_v16 = vld [vmem:[%s11191_s21] sm:$0xff]  ;;  %v114_v19 = vld [vmem:[#allocation2 + $0x168] sm:$0xff]  ;;  %v9953_v23 = vcombine.high %v9945_v17, %v9945_v17  ;;  %v132_v25 = vld [vmem:[#allocation2 + $0x1f8] sm:$0xff] }
  0x29   :  { %8797 = vmatpush3.bf16.msra.mxu0 %v8796_v62  ;;  %v9949_v22 = vcombine.high %v9940_v16, %v9940_v16  ;;  %v8836_v27 = vpack.c.bf16 %v114_v19, %v113_v15  ;;  %v83_v29 = vld [vmem:[#allocation2 + $0x70] sm:$0xff]  ;;  %v84_v30 = vld [vmem:[#allocation2 + $0x78] sm:$0xff]  ;;  %v8838_v32 = vpack.c.bf16 %v132_v25, %v131_v24  ;;  %v297_v34 = vld [vmem:[#allocation2 + $0x280] sm:$0xff] }
  0x2a   :  { %8829 = vmatpush3.bf16.msra.mxu1 %v8828_v63  ;;  %8799 = vmatprep.subr.bf16.mxu0 %v8798_v0  ;;  %v115_v31 = vld [vmem:[#allocation2 + $0x170] sm:$0xff]  ;;  %v116_v33 = vld [vmem:[#allocation2 + $0x178] sm:$0xff]  ;;  %v298_v35 = vld [vmem:[#allocation2 + $0x288] sm:$0xff]  ;;  %v8808_v38 = vpack.c.bf16 %v84_v30, %v83_v29 }
  0x2b   :  { %8831 = vmatprep.subr.bf16.mxu1 %v8830_v4  ;;  %203 = vmatprep.mubr.f32.mxu0 %v9949_v22  ;;  %v329_v36 = vld [vmem:[#allocation2 + $0x380] sm:$0xff]  ;;  %v330_v37 = vld [vmem:[#allocation2 + $0x388] sm:$0xff]  ;;  %v8840_v39 = vpack.c.bf16 %v116_v33, %v115_v31  ;;  %v8842_v40 = vpack.c.bf16 %v298_v35, %v297_v34  ;;  %v299_v46 = vld [vmem:[#allocation2 + $0x290] sm:$0xff] }
  0x2c   :  { %273 = vmatprep.mubr.f32.mxu1 %v9953_v23  ;;  %v281_v41 = vld [vmem:[#allocation2 + $0x200] sm:$0xff]  ;;  %v282_v42 = vld [vmem:[#allocation2 + $0x208] sm:$0xff]  ;;  %v8874_v44 = vpack.c.bf16 %v330_v37, %v329_v36  ;;  %v300_v47 = vld [vmem:[#allocation2 + $0x298] sm:$0xff] }
  0x2d   :  { %8801 = vmatpush3.bf16.msra.mxu0 %v8800_v10  ;;  %v313_v43 = vld [vmem:[#allocation2 + $0x300] sm:$0xff]  ;;  %v314_v45 = vld [vmem:[#allocation2 + $0x308] sm:$0xff]  ;;  %v331_v48 = vld [vmem:[#allocation2 + $0x390] sm:$0xff]  ;;  %v8844_v50 = vpack.c.bf16 %v282_v42, %v281_v41  ;;  %v8846_v52 = vpack.c.bf16 %v300_v47, %v299_v46 }
  0x2e   :  { %8833 = vmatpush3.bf16.msra.mxu1 %v8832_v13  ;;  %8803 = vmatprep.subr.bf16.mxu0 %v8802_v14  ;;  %v332_v49 = vld [vmem:[#allocation2 + $0x398] sm:$0xff]  ;;  %v8876_v51 = vpack.c.bf16 %v314_v45, %v313_v43  ;;  %v283_v53 = vld [vmem:[#allocation2 + $0x210] sm:$0xff]  ;;  %v301_v58 = vld [vmem:[#allocation2 + $0x2a0] sm:$0xff] }
  0x2f   :  { %8835 = vmatprep.subr.bf16.mxu1 %v8834_v18  ;;  %v284_v54 = vld [vmem:[#allocation2 + $0x218] sm:$0xff]  ;;  %v315_v55 = vld [vmem:[#allocation2 + $0x310] sm:$0xff]  ;;  %v8878_v56 = vpack.c.bf16 %v332_v49, %v331_v48  ;;  %v302_v59 = vld [vmem:[#allocation2 + $0x2a8] sm:$0xff] }
  0x30   :  { %v316_v57 = vld [vmem:[#allocation2 + $0x318] sm:$0xff]  ;;  %v333_v60 = vld [vmem:[#allocation2 + $0x3a0] sm:$0xff]  ;;  %v334_v61 = vld [vmem:[#allocation2 + $0x3a8] sm:$0xff]  ;;  %v8848_v62 = vpack.c.bf16 %v284_v54, %v283_v53  ;;  %v8850_v0 = vpack.c.bf16 %v302_v59, %v301_v58 }
  0x31   :  { %8805 = vmatpush3.bf16.msra.mxu0 %v8804_v26  ;;  %v8880_v63 = vpack.c.bf16 %v316_v57, %v315_v55  ;;  %v285_v1 = vld [vmem:[#allocation2 + $0x220] sm:$0xff]  ;;  %v286_v2 = vld [vmem:[#allocation2 + $0x228] sm:$0xff]  ;;  %v8882_v4 = vpack.c.bf16 %v334_v61, %v333_v60  ;;  %v303_v6 = vld [vmem:[#allocation2 + $0x2b0] sm:$0xff] }
  0x32   :  { %8837 = vmatpush3.bf16.msra.mxu1 %v8836_v27  ;;  %8807 = vmatprep.subr.bf16.mxu0 %v8806_v28  ;;  %v317_v3 = vld [vmem:[#allocation2 + $0x320] sm:$0xff]  ;;  %v318_v5 = vld [vmem:[#allocation2 + $0x328] sm:$0xff]  ;;  %v304_v7 = vld [vmem:[#allocation2 + $0x2b8] sm:$0xff]  ;;  %v8852_v10 = vpack.c.bf16 %v286_v2, %v285_v1 }
  0x33   :  { %8839 = vmatprep.subr.bf16.mxu1 %v8838_v32  ;;  %v335_v8 = vld [vmem:[#allocation2 + $0x3b0] sm:$0xff]  ;;  %v336_v9 = vld [vmem:[#allocation2 + $0x3b8] sm:$0xff]  ;;  %v8884_v11 = vpack.c.bf16 %v318_v5, %v317_v3  ;;  %v8854_v12 = vpack.c.bf16 %v304_v7, %v303_v6  ;;  %v305_v20 = vld [vmem:[#allocation2 + $0x2c0] sm:$0xff] }
  0x34   :  { %v287_v13 = vld [vmem:[#allocation2 + $0x230] sm:$0xff]  ;;  %v288_v14 = vld [vmem:[#allocation2 + $0x238] sm:$0xff]  ;;  %v8886_v18 = vpack.c.bf16 %v336_v9, %v335_v8  ;;  %v306_v21 = vld [vmem:[#allocation2 + $0x2c8] sm:$0xff]  ;;  %v9836_v8 = vmov 0.0  }
  0x35   :  { %8809 = vmatpush3.bf16.msra.mxu0 %v8808_v38  ;;  %v319_v15 = vld [vmem:[#allocation2 + $0x330] sm:$0xff]  ;;  %v320_v19 = vld [vmem:[#allocation2 + $0x338] sm:$0xff]  ;;  %v337_v24 = vld [vmem:[#allocation2 + $0x3c0] sm:$0xff]  ;;  %v8856_v26 = vpack.c.bf16 %v288_v14, %v287_v13  ;;  %v8858_v28 = vpack.c.bf16 %v306_v21, %v305_v20 }
  0x36   :  { %8841 = vmatpush3.bf16.msra.mxu1 %v8840_v39  ;;  %8843 = vmatprep.subr.bf16.mxu0 %v8842_v40  ;;  %v338_v25 = vld [vmem:[#allocation2 + $0x3c8] sm:$0xff]  ;;  %v8888_v27 = vpack.c.bf16 %v320_v19, %v319_v15  ;;  %v289_v29 = vld [vmem:[#allocation2 + $0x240] sm:$0xff]  ;;  %v307_v34 = vld [vmem:[#allocation2 + $0x2d0] sm:$0xff] }
  0x37   :  { %8875 = vmatprep.subr.bf16.mxu1 %v8874_v44  ;;  %v290_v30 = vld [vmem:[#allocation2 + $0x248] sm:$0xff]  ;;  %v321_v31 = vld [vmem:[#allocation2 + $0x340] sm:$0xff]  ;;  %v8890_v32 = vpack.c.bf16 %v338_v25, %v337_v24  ;;  %v308_v35 = vld [vmem:[#allocation2 + $0x2d8] sm:$0xff] }
  0x38   :  { %204 = vmatmul.mubr.f32.vlgmr.msra.gmra.mrb[0].mxu0 %v9940_v16  ;;  %v322_v33 = vld [vmem:[#allocation2 + $0x348] sm:$0xff]  ;;  %v339_v36 = vld [vmem:[#allocation2 + $0x3d0] sm:$0xff]  ;;  %v340_v37 = vld [vmem:[#allocation2 + $0x3d8] sm:$0xff]  ;;  %v8860_v38 = vpack.c.bf16 %v290_v30, %v289_v29  ;;  %v8862_v40 = vpack.c.bf16 %v308_v35, %v307_v34 }
  0x39   :  { %274 = vmatmul.mubr.f32.vlgmr.msra.gmra.mrb[0].mxu1 %v9945_v17  ;;  %8845 = vmatpush3.bf16.msra.mxu0 %v8844_v50  ;;  %v8892_v39 = vpack.c.bf16 %v322_v33, %v321_v31  ;;  %v291_v41 = vld [vmem:[#allocation2 + $0x250] sm:$0xff]  ;;  %v292_v42 = vld [vmem:[#allocation2 + $0x258] sm:$0xff]  ;;  %v8894_v44 = vpack.c.bf16 %v340_v37, %v339_v36  ;;  %v309_v46 = vld [vmem:[#allocation2 + $0x2e0] sm:$0xff] }
  0x3a   :  { %8877 = vmatpush3.bf16.msra.mxu1 %v8876_v51  ;;  %8847 = vmatprep.subr.bf16.mxu0 %v8846_v52  ;;  %v323_v43 = vld [vmem:[#allocation2 + $0x350] sm:$0xff]  ;;  %v324_v45 = vld [vmem:[#allocation2 + $0x358] sm:$0xff]  ;;  %v310_v47 = vld [vmem:[#allocation2 + $0x2e8] sm:$0xff]  ;;  %v8864_v50 = vpack.c.bf16 %v292_v42, %v291_v41 }
  0x3b   :  { %8879 = vmatprep.subr.bf16.mxu1 %v8878_v56  ;;  %409 = vmatprep.mubr.f32.mxu0 %v9949_v22  ;;  %v341_v48 = vld [vmem:[#allocation2 + $0x3e0] sm:$0xff]  ;;  %v342_v49 = vld [vmem:[#allocation2 + $0x3e8] sm:$0xff]  ;;  %v8896_v51 = vpack.c.bf16 %v324_v45, %v323_v43  ;;  %v8866_v52 = vpack.c.bf16 %v310_v47, %v309_v46  ;;  %v311_v58 = vld [vmem:[#allocation2 + $0x2f0] sm:$0xff] }
  0x3c   :  { %479 = vmatprep.mubr.f32.mxu1 %v9953_v23  ;;  %v293_v53 = vld [vmem:[#allocation2 + $0x260] sm:$0xff]  ;;  %v294_v54 = vld [vmem:[#allocation2 + $0x268] sm:$0xff]  ;;  %v8898_v56 = vpack.c.bf16 %v342_v49, %v341_v48  ;;  %v312_v59 = vld [vmem:[#allocation2 + $0x2f8] sm:$0xff] }
  0x3d   :  { %8849 = vmatpush3.bf16.msra.mxu0 %v8848_v62  ;;  %v325_v55 = vld [vmem:[#allocation2 + $0x360] sm:$0xff]  ;;  %v326_v57 = vld [vmem:[#allocation2 + $0x368] sm:$0xff]  ;;  %v343_v60 = vld [vmem:[#allocation2 + $0x3f0] sm:$0xff]  ;;  %v8868_v62 = vpack.c.bf16 %v294_v54, %v293_v53 }
  0x3e   :  { %8881 = vmatpush3.bf16.msra.mxu1 %v8880_v63  ;;  %8851 = vmatprep.subr.bf16.mxu0 %v8850_v0  ;;  %v344_v61 = vld [vmem:[#allocation2 + $0x3f8] sm:$0xff]  ;;  %v8900_v63 = vpack.c.bf16 %v326_v57, %v325_v55  ;;  %v8870_v0 = vpack.c.bf16 %v312_v59, %v311_v58  ;;  %v295_v1 = vld [vmem:[#allocation2 + $0x270] sm:$0xff]  ;;  %v658_v9 = vld [vmem:[#allocation2 + $0x480] sm:$0xff] }
  0x3f   :  { %8883 = vmatprep.subr.bf16.mxu1 %v8882_v4  ;;  %v296_v2 = vld [vmem:[#allocation2 + $0x278] sm:$0xff]  ;;  %v8902_v3 = vpack.c.bf16 %v344_v61, %v343_v60  ;;  %v327_v4 = vld [vmem:[#allocation2 + $0x370] sm:$0xff]  ;;  %v643_v13 = vld [vmem:[#allocation2 + $0x408] sm:$0xff] }
  0x40   :  { %v328_v5 = vld [vmem:[#allocation2 + $0x378] sm:$0xff]  ;;  %v8872_v6 = vpack.c.bf16 %v296_v2, %v295_v1  ;;  %v660_v15 = vld [vmem:[#allocation2 + $0x490] sm:$0xff]  ;;  %v662_v25 = vld [vmem:[#allocation2 + $0x4a0] sm:$0xff] }
  0x41   :  { %8853 = vmatpush3.bf16.msra.mxu0 %v8852_v10  ;;  %v8904_v7 = vpack.c.bf16 %v328_v5, %v327_v4  ;;  %v659_v10 = vld [vmem:[#allocation2 + $0x488] sm:$0xff]  ;;  %v644_v20 = vld [vmem:[#allocation2 + $0x410] sm:$0xff]  ;;  %v645_v21 = vld [vmem:[#allocation2 + $0x418] sm:$0xff] }
  0x42   :  { %8885 = vmatpush3.bf16.msra.mxu1 %v8884_v11  ;;  %8855 = vmatprep.subr.bf16.mxu0 %v8854_v12  ;;  %v642_v11 = vld [vmem:[#allocation2 + $0x400] sm:$0xff]  ;;  %v8906_v12 = vpack.c.bf16 %v659_v10, %v658_v9  ;;  %v8912_v24 = vpack.c.bf16 %v645_v21, %v644_v20  ;;  %v647_v29 = vld [vmem:[#allocation2 + $0x428] sm:$0xff]  ;;  %v664_v31 = vld [vmem:[#allocation2 + $0x4b0] sm:$0xff] }
  0x43   :  { %8887 = vmatprep.subr.bf16.mxu1 %v8886_v18  ;;  %v8908_v14 = vpack.c.bf16 %v643_v13, %v642_v11  ;;  %v661_v18 = vld [vmem:[#allocation2 + $0x498] sm:$0xff]  ;;  %v648_v34 = vld [vmem:[#allocation2 + $0x430] sm:$0xff]  ;;  %v666_v37 = vld [vmem:[#allocation2 + $0x4c0] sm:$0xff] }
  0x44   :  { %v8910_v19 = vpack.c.bf16 %v661_v18, %v660_v15  ;;  %v649_v35 = vld [vmem:[#allocation2 + $0x438] sm:$0xff]  ;;  %v651_v41 = vld [vmem:[#allocation2 + $0x448] sm:$0xff]  ;;  %v668_v43 = vld [vmem:[#allocation2 + $0x4d0] sm:$0xff] }
  0x45   :  { %8857 = vmatpush3.bf16.msra.mxu0 %v8856_v26  ;;  %v663_v26 = vld [vmem:[#allocation2 + $0x4a8] sm:$0xff]  ;;  %v8920_v36 = vpack.c.bf16 %v649_v35, %v648_v34  ;;  %v652_v46 = vld [vmem:[#allocation2 + $0x450] sm:$0xff]  ;;  %v653_v47 = vld [vmem:[#allocation2 + $0x458] sm:$0xff] }
  0x46   :  { %8889 = vmatpush3.bf16.msra.mxu1 %v8888_v27  ;;  %8859 = vmatprep.subr.bf16.mxu0 %v8858_v28  ;;  %v8914_v27 = vpack.c.bf16 %v663_v26, %v662_v25  ;;  %v646_v28 = vld [vmem:[#allocation2 + $0x420] sm:$0xff]  ;;  %v8928_v48 = vpack.c.bf16 %v653_v47, %v652_v46  ;;  %v655_v53 = vld [vmem:[#allocation2 + $0x468] sm:$0xff]  ;;  %v672_v55 = vld [vmem:[#allocation2 + $0x4f0] sm:$0xff] }
  0x47   :  { %8891 = vmatprep.subr.bf16.mxu1 %v8890_v32  ;;  %v8916_v30 = vpack.c.bf16 %v647_v29, %v646_v28  ;;  %v665_v32 = vld [vmem:[#allocation2 + $0x4b8] sm:$0xff]  ;;  %v670_v49 = vld [vmem:[#allocation2 + $0x4e0] sm:$0xff]  ;;  %v656_v58 = vld [vmem:[#allocation2 + $0x470] sm:$0xff] }
  0x48   :  { %v8918_v33 = vpack.c.bf16 %v665_v32, %v664_v31  ;;  %v657_v59 = vld [vmem:[#allocation2 + $0x478] sm:$0xff]  ;;  %v690_v11 = vld [vmem:[#allocation2 + $0x580] sm:$0xff]  ;;  %v692_v20 = vld [vmem:[#allocation2 + $0x590] sm:$0xff] }
  0x49   :  { %8861 = vmatpush3.bf16.msra.mxu0 %v8860_v38  ;;  %v667_v38 = vld [vmem:[#allocation2 + $0x4c8] sm:$0xff]  ;;  %v8936_v60 = vpack.c.bf16 %v657_v59, %v656_v58  ;;  %v674_v18 = vld [vmem:[#allocation2 + $0x500] sm:$0xff]  ;;  %v693_v21 = vld [vmem:[#allocation2 + $0x598] sm:$0xff] }
  0x4a   :  { %8893 = vmatpush3.bf16.msra.mxu1 %v8892_v39  ;;  %8863 = vmatprep.subr.bf16.mxu0 %v8862_v40  ;;  %v8922_v39 = vpack.c.bf16 %v667_v38, %v666_v37  ;;  %v650_v40 = vld [vmem:[#allocation2 + $0x440] sm:$0xff]  ;;  %v8942_v26 = vpack.c.bf16 %v693_v21, %v692_v20  ;;  %v677_v28 = vld [vmem:[#allocation2 + $0x518] sm:$0xff]  ;;  %v679_v34 = vld [vmem:[#allocation2 + $0x528] sm:$0xff] }
  0x4b   :  { %8895 = vmatprep.subr.bf16.mxu1 %v8894_v44  ;;  %v8924_v42 = vpack.c.bf16 %v651_v41, %v650_v40  ;;  %v669_v44 = vld [vmem:[#allocation2 + $0x4d8] sm:$0xff]  ;;  %v694_v29 = vld [vmem:[#allocation2 + $0x5a0] sm:$0xff]  ;;  %v696_v35 = vld [vmem:[#allocation2 + $0x5b0] sm:$0xff] }
  0x4c   :  { %v8926_v45 = vpack.c.bf16 %v669_v44, %v668_v43  ;;  %v681_v40 = vld [vmem:[#allocation2 + $0x538] sm:$0xff]  ;;  %v698_v41 = vld [vmem:[#allocation2 + $0x5c0] sm:$0xff]  ;;  %v683_v46 = vld [vmem:[#allocation2 + $0x548] sm:$0xff] }
  0x4d   :  { %8865 = vmatpush3.bf16.msra.mxu0 %v8864_v50  ;;  %v671_v50 = vld [vmem:[#allocation2 + $0x4e8] sm:$0xff]  ;;  %v700_v47 = vld [vmem:[#allocation2 + $0x5d0] sm:$0xff]  ;;  %v946_v20 = vld [vmem:[#allocation2 + $0x6a0] sm:$0xff] }
  0x4e   :  { %8897 = vmatpush3.bf16.msra.mxu1 %v8896_v51  ;;  %8867 = vmatprep.subr.bf16.mxu0 %v8866_v52  ;;  %v8930_v51 = vpack.c.bf16 %v671_v50, %v670_v49  ;;  %v654_v52 = vld [vmem:[#allocation2 + $0x460] sm:$0xff]  ;;  %v687_v58 = vld [vmem:[#allocation2 + $0x568] sm:$0xff]  ;;  %v704_v59 = vld [vmem:[#allocation2 + $0x5f0] sm:$0xff] }
  0x4f   :  { %8899 = vmatprep.subr.bf16.mxu1 %v8898_v56  ;;  %v8932_v54 = vpack.c.bf16 %v655_v53, %v654_v52  ;;  %v673_v56 = vld [vmem:[#allocation2 + $0x4f8] sm:$0xff]  ;;  %v702_v53 = vld [vmem:[#allocation2 + $0x5e0] sm:$0xff]  ;;  %v947_v21 = vld [vmem:[#allocation2 + $0x6a8] sm:$0xff] }
  0x50   :  { %v8934_v57 = vpack.c.bf16 %v673_v56, %v672_v55  ;;  %v685_v52 = vld [vmem:[#allocation2 + $0x558] sm:$0xff] }
  0x51   :  { %8869 = vmatpush3.bf16.msra.mxu0 %v8868_v62 }
  0x52   :  { %8901 = vmatpush3.bf16.msra.mxu1 %v8900_v63  ;;  %8871 = vmatprep.subr.bf16.mxu0 %v8870_v0 }
  0x53   :  { %8903 = vmatprep.subr.bf16.mxu1 %v8902_v3 }
  0x55   :  { %8873 = vmatpush3.bf16.msra.mxu0 %v8872_v6 }
  0x56   :  { %8905 = vmatpush3.bf16.msra.mxu1 %v8904_v7  ;;  %8108 = vmatprep.subr.mxu0 %v9836_v8 }
  0x57   :  { %8907 = vmatprep.subr.bf16.mxu1 %v8906_v12  ;;  %v691_v12 = vld [vmem:[#allocation2 + $0x588] sm:$0xff] }
  0x58   :  { %410 = vmatmul.mubr.f32.vlgmr.msra.gmra.mrb[2].mxu0 %v9940_v16  ;;  %v8938_v15 = vpack.c.bf16 %v691_v12, %v690_v11  ;;  %v944_v12 = vld [vmem:[#allocation2 + $0x690] sm:$0xff] }
  0x59   :  { %480 = vmatmul.mubr.f32.vlgmr.msra.gmra.mrb[2].mxu1 %v9945_v17  ;;  %8110 = vmatprep.mubr.msk.f32.mxu0 %vm9837_vm0, %v9836_v8 }
  0x5a   :  { %770 = vmatprep.mubr.f32.mxu1 %v9949_v22  ;;  %8909 = vmatpush3.bf16.msra.mxu1 %v8908_v14  ;;  %v6789_v14 = vld [vmem:[%s11176_s4 + $0x8] sm:$0xff] }
  0x5b   :  { %8911 = vmatprep.subr.bf16.mxu1 %v8910_v19  ;;  %v675_v19 = vld [vmem:[#allocation2 + $0x508] sm:$0xff] }
  0x5c   :  { %v8940_v25 = vpack.c.bf16 %v675_v19, %v674_v18  ;;  %v929_v18 = vld [vmem:[#allocation2 + $0x618] sm:$0xff] }
  0x5e   :  { %8913 = vmatpush3.bf16.msra.mxu1 %v8912_v24  ;;  %v279_v24 = vld [vmem:[%s11176_s4] sm:$0xff] }
  0x5f   :  { %8915 = vmatprep.subr.bf16.mxu1 %v8914_v27  ;;  %v676_v27 = vld [vmem:[#allocation2 + $0x510] sm:$0xff] }
  0x60   :  { %v8944_v31 = vpack.c.bf16 %v677_v28, %v676_v27  ;;  %v948_v28 = vld [vmem:[#allocation2 + $0x6b0] sm:$0xff] }
  0x62   :  { %8917 = vmatpush3.bf16.msra.mxu1 %v8916_v30  ;;  %v695_v30 = vld [vmem:[#allocation2 + $0x5a8] sm:$0xff] }
  0x63   :  { %8919 = vmatprep.subr.bf16.mxu1 %v8918_v33  ;;  %v8946_v32 = vpack.c.bf16 %v695_v30, %v694_v29  ;;  %v678_v33 = vld [vmem:[#allocation2 + $0x520] sm:$0xff]  ;;  %v949_v29 = vld [vmem:[#allocation2 + $0x6b8] sm:$0xff] }
  0x64   :  { %v8948_v37 = vpack.c.bf16 %v679_v34, %v678_v33  ;;  %v8982_v30 = vpack.c.bf16 %v949_v29, %v948_v28  ;;  %v950_v34 = vld [vmem:[#allocation2 + $0x6c0] sm:$0xff] }
  0x66   :  { %8921 = vmatpush3.bf16.msra.mxu1 %v8920_v36  ;;  %v697_v36 = vld [vmem:[#allocation2 + $0x5b8] sm:$0xff] }
  0x67   :  { %8923 = vmatprep.subr.bf16.mxu1 %v8922_v39  ;;  %v8950_v38 = vpack.c.bf16 %v697_v36, %v696_v35  ;;  %v680_v39 = vld [vmem:[#allocation2 + $0x530] sm:$0xff]  ;;  %v951_v35 = vld [vmem:[#allocation2 + $0x6c8] sm:$0xff] }
  0x68   :  { %v8952_v43 = vpack.c.bf16 %v681_v40, %v680_v39  ;;  %v8986_v36 = vpack.c.bf16 %v951_v35, %v950_v34  ;;  %v952_v40 = vld [vmem:[#allocation2 + $0x6d0] sm:$0xff] }
  0x6a   :  { %8925 = vmatpush3.bf16.msra.mxu1 %v8924_v42  ;;  %v699_v42 = vld [vmem:[#allocation2 + $0x5c8] sm:$0xff] }
  0x6b   :  { %8927 = vmatprep.subr.bf16.mxu1 %v8926_v45  ;;  %v8954_v44 = vpack.c.bf16 %v699_v42, %v698_v41  ;;  %v682_v45 = vld [vmem:[#allocation2 + $0x540] sm:$0xff]  ;;  %v953_v41 = vld [vmem:[#allocation2 + $0x6d8] sm:$0xff] }
  0x6c   :  { %v8956_v49 = vpack.c.bf16 %v683_v46, %v682_v45  ;;  %v8990_v42 = vpack.c.bf16 %v953_v41, %v952_v40  ;;  %v954_v46 = vld [vmem:[#allocation2 + $0x6e0] sm:$0xff] }
  0x6e   :  { %8929 = vmatpush3.bf16.msra.mxu1 %v8928_v48  ;;  %v701_v48 = vld [vmem:[#allocation2 + $0x5d8] sm:$0xff] }
  0x6f   :  { %8931 = vmatprep.subr.bf16.mxu1 %v8930_v51  ;;  %v8958_v50 = vpack.c.bf16 %v701_v48, %v700_v47  ;;  %v684_v51 = vld [vmem:[#allocation2 + $0x550] sm:$0xff]  ;;  %v955_v47 = vld [vmem:[#allocation2 + $0x6e8] sm:$0xff] }
  0x70   :  { %v8960_v55 = vpack.c.bf16 %v685_v52, %v684_v51  ;;  %v8994_v48 = vpack.c.bf16 %v955_v47, %v954_v46  ;;  %v956_v52 = vld [vmem:[#allocation2 + $0x6f0] sm:$0xff] }
  0x72   :  { %8933 = vmatpush3.bf16.msra.mxu1 %v8932_v54  ;;  %v703_v54 = vld [vmem:[#allocation2 + $0x5e8] sm:$0xff] }
  0x73   :  { %8935 = vmatprep.subr.bf16.mxu1 %v8934_v57  ;;  %v8962_v56 = vpack.c.bf16 %v703_v54, %v702_v53  ;;  %v686_v57 = vld [vmem:[#allocation2 + $0x560] sm:$0xff]  ;;  %v957_v53 = vld [vmem:[#allocation2 + $0x6f8] sm:$0xff] }
  0x74   :  { %v8998_v54 = vpack.c.bf16 %v957_v53, %v956_v52 }
  0x76   :  { %8937 = vmatpush3.bf16.msra.mxu1 %v8936_v60  ;;  %v705_v60 = vld [vmem:[#allocation2 + $0x5f8] sm:$0xff] }
  0x79   :  { %771 = vmatmul.mubr.f32.vlgmr.msra.gmra.mrb[4].mxu1 %v9940_v16 }
  0x7a   :  { %1054 = vmatprep.mubr.f32.mxu1 %v9949_v22 }
 0x10b   :  { %v7160_v61 = vpop.f32.mrb[0].mxu0 }
 0x10c   :  { %v7195_v62 = vpop.f32.mrb[0].mxu1  ;;  %v7161_v63 = vpop.f32.mrb[1].mxu0 }
 0x10d   :  { %v7162_v0 = vadd.f32 %v7161_v63, %v7160_v61  ;;  %v7196_v1 = vpop.f32.mrb[1].mxu1  ;;  %v8964_v61 = vpack.c.bf16 %v687_v58, %v686_v57  ;;  %v688_v63 = vld [vmem:[#allocation2 + $0x570] sm:$0xff] }
 0x10e   :  { %v7197_v2 = vadd.f32 %v7196_v1, %v7195_v62  ;;  %v8966_v62 = vpack.c.bf16 %v705_v60, %v704_v59  ;;  %v974_v59 = vld [vmem:[#allocation2 + $0x780] sm:$0xff]  ;;  %v975_v60 = vld [vmem:[#allocation2 + $0x788] sm:$0xff] }
 0x110   :  { %v276_v3 = vadd.f32 %v7197_v2, %v7162_v0  ;;  %v689_v0 = vld [vmem:[#allocation2 + $0x578] sm:$0xff] }
 0x111   :  { %v8968_v1 = vpack.c.bf16 %v689_v0, %v688_v63  ;;  %v959_v63 = vld [vmem:[#allocation2 + $0x708] sm:$0xff] }
 0x12b   :  { %v7230_v4 = vpop.f32.mrb[2].mxu0 }
 0x12c   :  { %v7265_v5 = vpop.f32.mrb[2].mxu1  ;;  %v7231_v6 = vpop.f32.mrb[3].mxu0 }
 0x12d   :  { %v7232_v7 = vadd.f32 %v7231_v6, %v7230_v4  ;;  %v7266_v9 = vpop.f32.mrb[3].mxu1  ;;  %v943_v6 = vld [vmem:[#allocation2 + $0x688] sm:$0xff] }
 0x12e   :  { %v7267_v10 = vadd.f32 %v7266_v9, %v7265_v5  ;;  %v942_v5 = vld [vmem:[#allocation2 + $0x680] sm:$0xff] }
 0x12f   :  { %v926_v9 = vld [vmem:[#allocation2 + $0x600] sm:$0xff] }
 0x130   :  { %v482_v13 = vadd.f32 %v7267_v10, %v7232_v7  ;;  %v8970_v7 = vpack.c.bf16 %v943_v6, %v942_v5  ;;  %v927_v10 = vld [vmem:[#allocation2 + $0x608] sm:$0xff]  ;;  %v6794_v6 = vld [vmem:[%s11176_s4 + $0x10] sm:$0xff] }
 0x131   :  { %v8972_v11 = vpack.c.bf16 %v927_v10, %v926_v9  ;;  %v960_v9 = vld [vmem:[#allocation2 + $0x710] sm:$0xff]  ;;  %v961_v10 = vld [vmem:[#allocation2 + $0x718] sm:$0xff] }
 0x132   :  { %8109 = vmatpush3.msk.msra.mxu0 %vm491_vm1, %v482_v13  ;;  %8971 = vmatprep.subr.bf16.mxu1 %v8970_v7  ;;  %v945_v13 = vld [vmem:[#allocation2 + $0x698] sm:$0xff] }
 0x133   :  { %8111 = vmatmul.mubr.msk.f32.vlgmr.msra.gmra.mrb[4].mxu0 %vm487_vm2, %v6789_v14  ;;  %8113 = vmatprep.subr.mxu0 %v9836_v8  ;;  %v8974_v14 = vpack.c.bf16 %v945_v13, %v944_v12  ;;  %v979_v12 = vld [vmem:[#allocation2 + $0x7a8] sm:$0xff]  ;;  %v9008_v13 = vpack.c.bf16 %v961_v10, %v960_v9  ;;  %v1233_v9 = vld [vmem:[#allocation2 + $0x8b8] sm:$0xff] }
 0x134   :  { %8114 = vmatpush3.msk.msra.mxu0 %vm491_vm1, %v276_v3  ;;  %8115 = vmatprep.mubr.msk.f32.mxu0 %vm9837_vm0, %v9836_v8 }
 0x135   :  { %8939 = vmatprep.subr.bf16.mxu0 %v8938_v15  ;;  %8973 = vmatpush3.bf16.msra.mxu1 %v8972_v11  ;;  %v928_v15 = vld [vmem:[#allocation2 + $0x610] sm:$0xff]  ;;  %v978_v11 = vld [vmem:[#allocation2 + $0x7a0] sm:$0xff] }
 0x136   :  { %v8976_v19 = vpack.c.bf16 %v929_v18, %v928_v15  ;;  %8975 = vmatprep.subr.bf16.mxu1 %v8974_v14  ;;  %v962_v14 = vld [vmem:[#allocation2 + $0x720] sm:$0xff]  ;;  %v963_v15 = vld [vmem:[#allocation2 + $0x728] sm:$0xff]  ;;  %v980_v18 = vld [vmem:[#allocation2 + $0x7b0] sm:$0xff] }
 0x139   :  { %8977 = vmatpush3.bf16.msra.mxu1 %v8976_v19  ;;  %v981_v19 = vld [vmem:[#allocation2 + $0x7b8] sm:$0xff] }
 0x13b   :  { %8116 = vmatmul.mubr.msk.f32.vlgmr.msra.gmra.mrb[4].mxu0 %vm487_vm2, %v279_v24  ;;  %v8978_v24 = vpack.c.bf16 %v947_v21, %v946_v20  ;;  %v9012_v20 = vpack.c.bf16 %v963_v15, %v962_v14  ;;  %v9014_v21 = vpack.c.bf16 %v981_v19, %v980_v18  ;;  %v1235_v14 = vld [vmem:[#allocation2 + $0x8c8] sm:$0xff]  ;;  %v1218_v18 = vld [vmem:[#allocation2 + $0x840] sm:$0xff] }
 0x13c   :  { %8941 = vmatpush3.bf16.msra.mxu0 %v8940_v25  ;;  %840 = vmatprep.mubr.f32.mxu0 %v9953_v23  ;;  %v930_v25 = vld [vmem:[#allocation2 + $0x620] sm:$0xff]  ;;  %v1219_v19 = vld [vmem:[#allocation2 + $0x848] sm:$0xff] }
 0x13d   :  { %8943 = vmatprep.subr.bf16.mxu0 %v8942_v26  ;;  %v931_v26 = vld [vmem:[#allocation2 + $0x628] sm:$0xff]  ;;  %8979 = vmatprep.subr.bf16.mxu1 %v8978_v24  ;;  %v964_v24 = vld [vmem:[#allocation2 + $0x730] sm:$0xff] }
 0x13e   :  { %v8980_v27 = vpack.c.bf16 %v931_v26, %v930_v25  ;;  %v965_v25 = vld [vmem:[#allocation2 + $0x738] sm:$0xff]  ;;  %v982_v26 = vld [vmem:[#allocation2 + $0x7c0] sm:$0xff] }
 0x13f   :  { %v9016_v28 = vpack.c.bf16 %v965_v25, %v964_v24  ;;  %v1237_v24 = vld [vmem:[#allocation2 + $0x8d8] sm:$0xff] }
 0x140   :  { %8945 = vmatpush3.bf16.msra.mxu0 %v8944_v31  ;;  %8981 = vmatpush3.bf16.msra.mxu1 %v8980_v27  ;;  %v932_v31 = vld [vmem:[#allocation2 + $0x630] sm:$0xff]  ;;  %v983_v27 = vld [vmem:[#allocation2 + $0x7c8] sm:$0xff] }
 0x141   :  { %8947 = vmatprep.subr.bf16.mxu0 %v8946_v32  ;;  %v933_v32 = vld [vmem:[#allocation2 + $0x638] sm:$0xff]  ;;  %8983 = vmatprep.subr.bf16.mxu1 %v8982_v30  ;;  %v9018_v29 = vpack.c.bf16 %v983_v27, %v982_v26  ;;  %v966_v30 = vld [vmem:[#allocation2 + $0x740] sm:$0xff]  ;;  %v1220_v26 = vld [vmem:[#allocation2 + $0x850] sm:$0xff] }
 0x142   :  { %v8984_v33 = vpack.c.bf16 %v933_v32, %v932_v31  ;;  %v967_v31 = vld [vmem:[#allocation2 + $0x748] sm:$0xff]  ;;  %v984_v32 = vld [vmem:[#allocation2 + $0x7d0] sm:$0xff]  ;;  %v1221_v27 = vld [vmem:[#allocation2 + $0x858] sm:$0xff] }
 0x143   :  { %v9020_v34 = vpack.c.bf16 %v967_v31, %v966_v30  ;;  %v1239_v30 = vld [vmem:[#allocation2 + $0x8e8] sm:$0xff] }
 0x144   :  { %8949 = vmatpush3.bf16.msra.mxu0 %v8948_v37  ;;  %8985 = vmatpush3.bf16.msra.mxu1 %v8984_v33  ;;  %v934_v37 = vld [vmem:[#allocation2 + $0x640] sm:$0xff]  ;;  %v985_v33 = vld [vmem:[#allocation2 + $0x7d8] sm:$0xff] }
 0x145   :  { %8951 = vmatprep.subr.bf16.mxu0 %v8950_v38  ;;  %v935_v38 = vld [vmem:[#allocation2 + $0x648] sm:$0xff]  ;;  %8987 = vmatprep.subr.bf16.mxu1 %v8986_v36  ;;  %v9022_v35 = vpack.c.bf16 %v985_v33, %v984_v32  ;;  %v968_v36 = vld [vmem:[#allocation2 + $0x750] sm:$0xff]  ;;  %v1222_v32 = vld [vmem:[#allocation2 + $0x860] sm:$0xff] }
 0x146   :  { %v8988_v39 = vpack.c.bf16 %v935_v38, %v934_v37  ;;  %v969_v37 = vld [vmem:[#allocation2 + $0x758] sm:$0xff]  ;;  %v986_v38 = vld [vmem:[#allocation2 + $0x7e0] sm:$0xff]  ;;  %v1223_v33 = vld [vmem:[#allocation2 + $0x868] sm:$0xff] }
 0x147   :  { %v9024_v40 = vpack.c.bf16 %v969_v37, %v968_v36  ;;  %v1241_v36 = vld [vmem:[#allocation2 + $0x8f8] sm:$0xff] }
 0x148   :  { %8953 = vmatpush3.bf16.msra.mxu0 %v8952_v43  ;;  %8989 = vmatpush3.bf16.msra.mxu1 %v8988_v39  ;;  %v936_v43 = vld [vmem:[#allocation2 + $0x650] sm:$0xff]  ;;  %v987_v39 = vld [vmem:[#allocation2 + $0x7e8] sm:$0xff] }
 0x149   :  { %8955 = vmatprep.subr.bf16.mxu0 %v8954_v44  ;;  %v937_v44 = vld [vmem:[#allocation2 + $0x658] sm:$0xff]  ;;  %8991 = vmatprep.subr.bf16.mxu1 %v8990_v42  ;;  %v9026_v41 = vpack.c.bf16 %v987_v39, %v986_v38  ;;  %v970_v42 = vld [vmem:[#allocation2 + $0x760] sm:$0xff]  ;;  %v1224_v38 = vld [vmem:[#allocation2 + $0x870] sm:$0xff] }
 0x14a   :  { %v8992_v45 = vpack.c.bf16 %v937_v44, %v936_v43  ;;  %v971_v43 = vld [vmem:[#allocation2 + $0x768] sm:$0xff]  ;;  %v988_v44 = vld [vmem:[#allocation2 + $0x7f0] sm:$0xff]  ;;  %v1225_v39 = vld [vmem:[#allocation2 + $0x878] sm:$0xff] }
 0x14b   :  { %v9028_v46 = vpack.c.bf16 %v971_v43, %v970_v42  ;;  %v1258_v43 = vld [vmem:[#allocation2 + $0x980] sm:$0xff] }
 0x14c   :  { %8957 = vmatpush3.bf16.msra.mxu0 %v8956_v49  ;;  %v7304_v2 = vpop.f32.mrb[4].mxu1  ;;  %8993 = vmatpush3.bf16.msra.mxu1 %v8992_v45  ;;  %v938_v49 = vld [vmem:[#allocation2 + $0x660] sm:$0xff]  ;;  %v989_v45 = vld [vmem:[#allocation2 + $0x7f8] sm:$0xff] }
 0x14d   :  { %8959 = vmatprep.subr.bf16.mxu0 %v8958_v50  ;;  %v7305_v3 = vpop.f32.mrb[5].mxu1  ;;  %v939_v50 = vld [vmem:[#allocation2 + $0x668] sm:$0xff]  ;;  %8995 = vmatprep.subr.bf16.mxu1 %v8994_v48  ;;  %v9030_v47 = vpack.c.bf16 %v989_v45, %v988_v44  ;;  %v972_v48 = vld [vmem:[#allocation2 + $0x770] sm:$0xff] }
 0x14e   :  { %v9987_v4 = vadd.f32 %v7305_v3, %v7304_v2  ;;  %v8996_v51 = vpack.c.bf16 %v939_v50, %v938_v49  ;;  %v977_v2 = vld [vmem:[#allocation2 + $0x798] sm:$0xff]  ;;  %v9002_v3 = vpack.c.bf16 %v975_v60, %v974_v59  ;;  %v1228_v60 = vld [vmem:[#allocation2 + $0x890] sm:$0xff]  ;;  %v1259_v44 = vld [vmem:[#allocation2 + $0x988] sm:$0xff] }
 0x14f   :  { %v973_v49 = vld [vmem:[#allocation2 + $0x778] sm:$0xff] }
 0x150   :  { %8961 = vmatpush3.bf16.msra.mxu0 %v8960_v55  ;;  %8997 = vmatpush3.bf16.msra.mxu1 %v8996_v51  ;;  %v940_v55 = vld [vmem:[#allocation2 + $0x670] sm:$0xff]  ;;  %v9032_v50 = vpack.c.bf16 %v973_v49, %v972_v48 }
 0x151   :  { %8963 = vmatprep.subr.bf16.mxu0 %v8962_v56  ;;  %v941_v56 = vld [vmem:[#allocation2 + $0x678] sm:$0xff]  ;;  %8999 = vmatprep.subr.bf16.mxu1 %v8998_v54  ;;  %v1226_v54 = vld [vmem:[#allocation2 + $0x880] sm:$0xff]  ;;  %v1260_v49 = vld [vmem:[#allocation2 + $0x990] sm:$0xff] }
 0x152   :  { %v9000_v57 = vpack.c.bf16 %v941_v56, %v940_v55  ;;  %v1227_v55 = vld [vmem:[#allocation2 + $0x888] sm:$0xff] }
 0x153   :  { %v9034_v56 = vpack.c.bf16 %v1227_v55, %v1226_v54  ;;  %v6797_v54 = vld [vmem:[%s11176_s4 + $0x18] sm:$0xff] }
 0x154   :  { %8965 = vmatpush3.bf16.msra.mxu0 %v8964_v61  ;;  %9001 = vmatpush3.bf16.msra.mxu1 %v9000_v57  ;;  %v1210_v57 = vld [vmem:[#allocation2 + $0x800] sm:$0xff] }
 0x155   :  { %8967 = vmatprep.subr.bf16.mxu0 %v8966_v62  ;;  %v958_v62 = vld [vmem:[#allocation2 + $0x700] sm:$0xff]  ;;  %9035 = vmatprep.subr.bf16.mxu1 %v9034_v56 }
 0x156   :  { %v9004_v7 = vpack.c.bf16 %v959_v63, %v958_v62  ;;  %v1212_v63 = vld [vmem:[#allocation2 + $0x810] sm:$0xff] }
 0x157   :  { %1055 = vmatmul.mubr.f32.vlgmr.msra.gmra.mrb[6].mxu1 %v9940_v16 }
 0x158   :  { %8969 = vmatpush3.bf16.msra.mxu0 %v8968_v1  ;;  %1338 = vmatprep.mubr.f32.mxu1 %v9949_v22  ;;  %v976_v1 = vld [vmem:[#allocation2 + $0x790] sm:$0xff] }
 0x159   :  { %8118 = vmatprep.subr.mxu0 %v9836_v8  ;;  %v9006_v16 = vpack.c.bf16 %v977_v2, %v976_v1  ;;  %v1230_v1 = vld [vmem:[#allocation2 + $0x8a0] sm:$0xff]  ;;  %v1231_v2 = vld [vmem:[#allocation2 + $0x8a8] sm:$0xff] }
 0x15b   :  { %841 = vmatmul.mubr.f32.vlgmr.msra.gmra.mrb[6].mxu0 %v9945_v17 }
 0x15c   :  { %8120 = vmatprep.mubr.msk.f32.mxu0 %vm9837_vm0, %v9836_v8 }
 0x22a   :  { %v7376_v51 = vpop.f32.mrb[6].mxu1 }
 0x22b   :  { %v7377_v52 = vpop.f32.mrb[7].mxu1 }
 0x22c   :  { %v10002_v53 = vadd.f32 %v7377_v52, %v7376_v51  ;;  %v9066_v51 = vpack.c.bf16 %v1259_v44, %v1258_v43  ;;  %v1495_v43 = vld [vmem:[#allocation2 + $0xa08] sm:$0xff] }
 0x22e   :  { %v7339_v58 = vpop.f32.mrb[6].mxu0 }
 0x22f   :  { %v7340_v61 = vpop.f32.mrb[7].mxu0 }
 0x230   :  { %v7341_v0 = vadd.f32 %v7340_v61, %v7339_v58  ;;  %v1211_v58 = vld [vmem:[#allocation2 + $0x808] sm:$0xff]  ;;  %v1229_v61 = vld [vmem:[#allocation2 + $0x898] sm:$0xff] }
 0x231   :  { %v9036_v59 = vpack.c.bf16 %v1211_v58, %v1210_v57  ;;  %v9038_v62 = vpack.c.bf16 %v1229_v61, %v1228_v60  ;;  %v1244_v57 = vld [vmem:[#allocation2 + $0x910] sm:$0xff]  ;;  %v1245_v58 = vld [vmem:[#allocation2 + $0x918] sm:$0xff]  ;;  %v1263_v60 = vld [vmem:[#allocation2 + $0x9a8] sm:$0xff] }
 0x232   :  { %v843_v5 = vadd.f32 %v7341_v0, %v9987_v4  ;;  %v9010_v4 = vpack.c.bf16 %v979_v12, %v978_v11  ;;  %v1216_v11 = vld [vmem:[#allocation2 + $0x830] sm:$0xff]  ;;  %v1217_v12 = vld [vmem:[#allocation2 + $0x838] sm:$0xff]  ;;  %v9072_v61 = vpack.c.bf16 %v1245_v58, %v1244_v57 }
 0x233   :  { %9037 = vmatpush3.bf16.msra.mxu1 %v9036_v59  ;;  %v1262_v59 = vld [vmem:[#allocation2 + $0x9a0] sm:$0xff]  ;;  %v1516_v58 = vld [vmem:[#allocation2 + $0xab0] sm:$0xff] }
 0x234   :  { %8119 = vmatpush3.msk.msra.mxu0 %vm491_vm1, %v843_v5  ;;  %9039 = vmatprep.subr.bf16.mxu1 %v9038_v62  ;;  %v1214_v5 = vld [vmem:[#allocation2 + $0x820] sm:$0xff] }
 0x235   :  { %9003 = vmatprep.subr.bf16.mxu0 %v9002_v3  ;;  %8121 = vmatmul.mubr.msk.f32.vlgmr.msra.gmra.mrb[4].mxu0 %vm487_vm2, %v6794_v6  ;;  %v9042_v3 = vpack.c.bf16 %v1231_v2, %v1230_v1  ;;  %v1215_v6 = vld [vmem:[#allocation2 + $0x828] sm:$0xff]  ;;  %v1246_v62 = vld [vmem:[#allocation2 + $0x920] sm:$0xff] }
 0x236   :  { %9005 = vmatpush3.bf16.msra.mxu0 %v9004_v7  ;;  %1124 = vmatprep.mubr.f32.mxu0 %v9953_v23  ;;  %v9044_v7 = vpack.c.bf16 %v1215_v6, %v1214_v5  ;;  %v1249_v5 = vld [vmem:[#allocation2 + $0x938] sm:$0xff]  ;;  %v1266_v6 = vld [vmem:[#allocation2 + $0x9c0] sm:$0xff] }
 0x237   :  { %9007 = vmatprep.subr.bf16.mxu0 %v9006_v16  ;;  %v1232_v16 = vld [vmem:[#allocation2 + $0x8b0] sm:$0xff] }
 0x238   :  { %v9046_v10 = vpack.c.bf16 %v1233_v9, %v1232_v16 }
 0x23a   :  { %9009 = vmatpush3.bf16.msra.mxu0 %v9008_v13  ;;  %v9048_v13 = vpack.c.bf16 %v1217_v12, %v1216_v11  ;;  %v1251_v11 = vld [vmem:[#allocation2 + $0x948] sm:$0xff]  ;;  %v1268_v12 = vld [vmem:[#allocation2 + $0x9d0] sm:$0xff] }
 0x23b   :  { %9011 = vmatprep.subr.bf16.mxu0 %v9010_v4  ;;  %v1234_v4 = vld [vmem:[#allocation2 + $0x8c0] sm:$0xff] }
 0x23c   :  { %v9050_v15 = vpack.c.bf16 %v1235_v14, %v1234_v4 }
 0x23e   :  { %9013 = vmatpush3.bf16.msra.mxu0 %v9012_v20  ;;  %v9052_v20 = vpack.c.bf16 %v1219_v19, %v1218_v18  ;;  %v1253_v18 = vld [vmem:[#allocation2 + $0x958] sm:$0xff]  ;;  %v1270_v19 = vld [vmem:[#allocation2 + $0x9e0] sm:$0xff] }
 0x23f   :  { %9015 = vmatprep.subr.bf16.mxu0 %v9014_v21  ;;  %v1236_v21 = vld [vmem:[#allocation2 + $0x8d0] sm:$0xff] }
 0x240   :  { %v9054_v25 = vpack.c.bf16 %v1237_v24, %v1236_v21 }
 0x242   :  { %9017 = vmatpush3.bf16.msra.mxu0 %v9016_v28  ;;  %v9056_v28 = vpack.c.bf16 %v1221_v27, %v1220_v26  ;;  %v1255_v26 = vld [vmem:[#allocation2 + $0x968] sm:$0xff]  ;;  %v1272_v27 = vld [vmem:[#allocation2 + $0x9f0] sm:$0xff] }
 0x243   :  { %9019 = vmatprep.subr.bf16.mxu0 %v9018_v29  ;;  %v1238_v29 = vld [vmem:[#allocation2 + $0x8e0] sm:$0xff] }
 0x244   :  { %v9058_v31 = vpack.c.bf16 %v1239_v30, %v1238_v29 }
 0x246   :  { %9021 = vmatpush3.bf16.msra.mxu0 %v9020_v34  ;;  %v9060_v34 = vpack.c.bf16 %v1223_v33, %v1222_v32  ;;  %v1257_v32 = vld [vmem:[#allocation2 + $0x978] sm:$0xff] }
 0x247   :  { %9023 = vmatprep.subr.bf16.mxu0 %v9022_v35  ;;  %v1240_v35 = vld [vmem:[#allocation2 + $0x8f0] sm:$0xff] }
 0x248   :  { %v9062_v37 = vpack.c.bf16 %v1241_v36, %v1240_v35 }
 0x24a   :  { %9025 = vmatpush3.bf16.msra.mxu0 %v9024_v40  ;;  %v9064_v40 = vpack.c.bf16 %v1225_v39, %v1224_v38  ;;  %v1510_v38 = vld [vmem:[#allocation2 + $0xa80] sm:$0xff]  ;;  %v1511_v39 = vld [vmem:[#allocation2 + $0xa88] sm:$0xff] }
 0x24b   :  { %9027 = vmatprep.subr.bf16.mxu0 %v9026_v41  ;;  %v10007_v41 = vld [vmem:[%s11191_s21] sm:$0xff] }
 0x24e   :  { %9029 = vmatpush3.bf16.msra.mxu0 %v9028_v46  ;;  %v1242_v46 = vld [vmem:[#allocation2 + $0x900] sm:$0xff] }
 0x24f   :  { %9031 = vmatprep.subr.bf16.mxu0 %v9030_v47  ;;  %v1243_v47 = vld [vmem:[#allocation2 + $0x908] sm:$0xff] }
 0x250   :  { %v9068_v55 = vpack.c.bf16 %v1243_v47, %v1242_v46  ;;  %v1513_v46 = vld [vmem:[#allocation2 + $0xa98] sm:$0xff] }
 0x252   :  { %9033 = vmatpush3.bf16.msra.mxu0 %v9032_v50  ;;  %v1261_v50 = vld [vmem:[#allocation2 + $0x998] sm:$0xff] }
 0x253   :  { %8123 = vmatprep.subr.mxu0 %v9836_v8  ;;  %v9070_v56 = vpack.c.bf16 %v1261_v50, %v1260_v49  ;;  %v1497_v49 = vld [vmem:[#allocation2 + $0xa18] sm:$0xff] }
 0x255   :  { %1125 = vmatmul.mubr.f32.vlgmr.msra.gmra.mrb[8].mxu0 %v9945_v17  ;;  %v1213_v17 = vld [vmem:[#allocation2 + $0x818] sm:$0xff] }
 0x256   :  { %8125 = vmatprep.mubr.msk.f32.mxu0 %vm9837_vm0, %v9836_v8  ;;  %v9040_v0 = vpack.c.bf16 %v1213_v17, %v1212_v63  ;;  %v1247_v63 = vld [vmem:[#allocation2 + $0x928] sm:$0xff]  ;;  %v1264_v17 = vld [vmem:[#allocation2 + $0x9b0] sm:$0xff] }
 0x257   :  { %v9076_v1 = vpack.c.bf16 %v1247_v63, %v1246_v62  ;;  %v1518_v63 = vld [vmem:[#allocation2 + $0xac0] sm:$0xff] }
 0x258   :  { %9041 = vmatpush3.bf16.msra.mxu1 %v9040_v0  ;;  %v1265_v0 = vld [vmem:[#allocation2 + $0x9b8] sm:$0xff] }
 0x259   :  { %9043 = vmatprep.subr.bf16.mxu1 %v9042_v3  ;;  %v9078_v2 = vpack.c.bf16 %v1265_v0, %v1264_v17  ;;  %v1248_v3 = vld [vmem:[#allocation2 + $0x930] sm:$0xff]  ;;  %v1519_v17 = vld [vmem:[#allocation2 + $0xac8] sm:$0xff] }
 0x25a   :  { %v9080_v16 = vpack.c.bf16 %v1249_v5, %v1248_v3  ;;  %v9114_v0 = vpack.c.bf16 %v1519_v17, %v1518_v63  ;;  %v1520_v5 = vld [vmem:[#allocation2 + $0xad0] sm:$0xff]  ;;  %v1553_v63 = vld [vmem:[#allocation2 + $0xbd8] sm:$0xff] }
 0x25c   :  { %9045 = vmatpush3.bf16.msra.mxu1 %v9044_v7  ;;  %v1267_v7 = vld [vmem:[#allocation2 + $0x9c8] sm:$0xff] }
 0x25d   :  { %9047 = vmatprep.subr.bf16.mxu1 %v9046_v10  ;;  %v9082_v9 = vpack.c.bf16 %v1267_v7, %v1266_v6  ;;  %v1250_v10 = vld [vmem:[#allocation2 + $0x940] sm:$0xff]  ;;  %v1521_v6 = vld [vmem:[#allocation2 + $0xad8] sm:$0xff] }
 0x25e   :  { %v9084_v4 = vpack.c.bf16 %v1251_v11, %v1250_v10  ;;  %v9118_v7 = vpack.c.bf16 %v1521_v6, %v1520_v5  ;;  %v1522_v11 = vld [vmem:[#allocation2 + $0xae0] sm:$0xff]  ;;  %v1555_v5 = vld [vmem:[#allocation2 + $0xbe8] sm:$0xff] }
 0x260   :  { %9049 = vmatpush3.bf16.msra.mxu1 %v9048_v13  ;;  %v1269_v13 = vld [vmem:[#allocation2 + $0x9d8] sm:$0xff] }
 0x261   :  { %9051 = vmatprep.subr.bf16.mxu1 %v9050_v15  ;;  %v9086_v14 = vpack.c.bf16 %v1269_v13, %v1268_v12  ;;  %v1252_v15 = vld [vmem:[#allocation2 + $0x950] sm:$0xff]  ;;  %v1523_v12 = vld [vmem:[#allocation2 + $0xae8] sm:$0xff] }
 0x262   :  { %v9088_v21 = vpack.c.bf16 %v1253_v18, %v1252_v15  ;;  %v9122_v13 = vpack.c.bf16 %v1523_v12, %v1522_v11  ;;  %v1524_v18 = vld [vmem:[#allocation2 + $0xaf0] sm:$0xff]  ;;  %v1557_v11 = vld [vmem:[#allocation2 + $0xbf8] sm:$0xff] }
 0x264   :  { %9053 = vmatpush3.bf16.msra.mxu1 %v9052_v20  ;;  %v1271_v20 = vld [vmem:[#allocation2 + $0x9e8] sm:$0xff] }
 0x265   :  { %9055 = vmatprep.subr.bf16.mxu1 %v9054_v25  ;;  %v9090_v24 = vpack.c.bf16 %v1271_v20, %v1270_v19  ;;  %v1254_v25 = vld [vmem:[#allocation2 + $0x960] sm:$0xff]  ;;  %v1525_v19 = vld [vmem:[#allocation2 + $0xaf8] sm:$0xff] }
 0x266   :  { %v9092_v29 = vpack.c.bf16 %v1255_v26, %v1254_v25  ;;  %v9126_v20 = vpack.c.bf16 %v1525_v19, %v1524_v18 }
 0x268   :  { %9057 = vmatpush3.bf16.msra.mxu1 %v9056_v28  ;;  %v1273_v28 = vld [vmem:[#allocation2 + $0x9f8] sm:$0xff] }
 0x269   :  { %9059 = vmatprep.subr.bf16.mxu1 %v9058_v31  ;;  %v9094_v30 = vpack.c.bf16 %v1273_v28, %v1272_v27  ;;  %v1256_v31 = vld [vmem:[#allocation2 + $0x970] sm:$0xff]  ;;  %v1542_v27 = vld [vmem:[#allocation2 + $0xb80] sm:$0xff]  ;;  %v1543_v28 = vld [vmem:[#allocation2 + $0xb88] sm:$0xff] }
 0x26a   :  { %v9096_v33 = vpack.c.bf16 %v1257_v32, %v1256_v31  ;;  %v1527_v31 = vld [vmem:[#allocation2 + $0xb08] sm:$0xff] }
 0x26c   :  { %9061 = vmatpush3.bf16.msra.mxu1 %v9060_v34  ;;  %v10022_v34 = vld [vmem:[%s11191_s21 + $0x8] sm:$0xff] }
 0x26d   :  { %9063 = vmatprep.subr.bf16.mxu1 %v9062_v37 }
 0x270   :  { %9065 = vmatpush3.bf16.msra.mxu1 %v9064_v40  ;;  %v9098_v40 = vpack.c.bf16 %v1511_v39, %v1510_v38  ;;  %v6800_v39 = vld [vmem:[%s11176_s4 + $0x20] sm:$0xff] }
 0x272   :  { %9099 = vmatprep.subr.bf16.mxu1 %v9098_v40 }
 0x273   :  { %1339 = vmatmul.mubr.f32.vlgmr.msra.gmra.mrb[8].mxu1 %v10007_v41 }
 0x274   :  { %1622 = vmatprep.mubr.f32.mxu1 %v9949_v22 }
 0x328   :  { %v7411_v42 = vpop.f32.mrb[8].mxu0 }
 0x329   :  { %v7412_v45 = vpop.f32.mrb[9].mxu0 }
 0x32a   :  { %v7413_v48 = vadd.f32 %v7412_v45, %v7411_v42  ;;  %v1494_v42 = vld [vmem:[#allocation2 + $0xa00] sm:$0xff]  ;;  %v1512_v45 = vld [vmem:[#allocation2 + $0xa90] sm:$0xff] }
 0x32b   :  { %v9100_v44 = vpack.c.bf16 %v1495_v43, %v1494_v42  ;;  %v9102_v47 = vpack.c.bf16 %v1513_v46, %v1512_v45  ;;  %v1528_v43 = vld [vmem:[#allocation2 + $0xb10] sm:$0xff]  ;;  %v1546_v45 = vld [vmem:[#allocation2 + $0xba0] sm:$0xff]  ;;  %v1547_v46 = vld [vmem:[#allocation2 + $0xba8] sm:$0xff] }
 0x32c   :  { %v1127_v52 = vadd.f32 %v7413_v48, %v10002_v53  ;;  %v9074_v53 = vpack.c.bf16 %v1263_v60, %v1262_v59  ;;  %v1496_v48 = vld [vmem:[#allocation2 + $0xa10] sm:$0xff]  ;;  %v1517_v59 = vld [vmem:[#allocation2 + $0xab8] sm:$0xff] }
 0x32d   :  { %9101 = vmatpush3.bf16.msra.mxu1 %v9100_v44  ;;  %v9104_v50 = vpack.c.bf16 %v1497_v49, %v1496_v48  ;;  %v9110_v60 = vpack.c.bf16 %v1517_v59, %v1516_v58  ;;  %v1529_v44 = vld [vmem:[#allocation2 + $0xb18] sm:$0xff]  ;;  %v1530_v48 = vld [vmem:[#allocation2 + $0xb20] sm:$0xff]  ;;  %v1531_v49 = vld [vmem:[#allocation2 + $0xb28] sm:$0xff] }
 0x32e   :  { %8124 = vmatpush3.msk.msra.mxu0 %vm491_vm1, %v1127_v52  ;;  %9103 = vmatprep.subr.bf16.mxu1 %v9102_v47  ;;  %v1515_v52 = vld [vmem:[#allocation2 + $0xaa8] sm:$0xff]  ;;  %v9136_v47 = vpack.c.bf16 %v1529_v44, %v1528_v43  ;;  %v1800_v44 = vld [vmem:[#allocation2 + $0xcb0] sm:$0xff] }
 0x32f   :  { %9067 = vmatprep.subr.bf16.mxu0 %v9066_v51  ;;  %8126 = vmatmul.mubr.msk.f32.vlgmr.msra.gmra.mrb[4].mxu0 %vm487_vm2, %v6797_v54  ;;  %v1514_v51 = vld [vmem:[#allocation2 + $0xaa0] sm:$0xff]  ;;  %v1551_v58 = vld [vmem:[#allocation2 + $0xbc8] sm:$0xff] }
 0x330   :  { %9069 = vmatpush3.bf16.msra.mxu0 %v9068_v55  ;;  %1408 = vmatprep.mubr.f32.mxu0 %v9953_v23  ;;  %v9106_v54 = vpack.c.bf16 %v1515_v52, %v1514_v51  ;;  %v1498_v55 = vld [vmem:[#allocation2 + $0xa20] sm:$0xff]  ;;  %v1549_v51 = vld [vmem:[#allocation2 + $0xbb8] sm:$0xff]  ;;  %v9140_v52 = vpack.c.bf16 %v1531_v49, %v1530_v48 }
 0x331   :  { %9071 = vmatprep.subr.bf16.mxu0 %v9070_v56  ;;  %9105 = vmatpush3.bf16.msra.mxu1 %v9104_v50  ;;  %v1499_v56 = vld [vmem:[#allocation2 + $0xa28] sm:$0xff]  ;;  %v1548_v50 = vld [vmem:[#allocation2 + $0xbb0] sm:$0xff]  ;;  %v1802_v49 = vld [vmem:[#allocation2 + $0xcc0] sm:$0xff] }
 0x332   :  { %v9108_v57 = vpack.c.bf16 %v1499_v56, %v1498_v55  ;;  %9107 = vmatprep.subr.bf16.mxu1 %v9106_v54  ;;  %v9142_v54 = vpack.c.bf16 %v1549_v51, %v1548_v50  ;;  %v1532_v55 = vld [vmem:[#allocation2 + $0xb30] sm:$0xff]  ;;  %v1533_v56 = vld [vmem:[#allocation2 + $0xb38] sm:$0xff]  ;;  %v1803_v50 = vld [vmem:[#allocation2 + $0xcc8] sm:$0xff] }
 0x333   :  { %v9144_v59 = vpack.c.bf16 %v1533_v56, %v1532_v55  ;;  %v9178_v51 = vpack.c.bf16 %v1803_v50, %v1802_v49  ;;  %v1804_v56 = vld [vmem:[#allocation2 + $0xcd0] sm:$0xff]  ;;  %v1837_v49 = vld [vmem:[#allocation2 + $0xdd8] sm:$0xff] }
 0x334   :  { %9073 = vmatpush3.bf16.msra.mxu0 %v9072_v61  ;;  %v1500_v61 = vld [vmem:[#allocation2 + $0xa30] sm:$0xff] }
 0x335   :  { %9075 = vmatprep.subr.bf16.mxu0 %v9074_v53  ;;  %9109 = vmatpush3.bf16.msra.mxu1 %v9108_v57  ;;  %v1501_v53 = vld [vmem:[#allocation2 + $0xa38] sm:$0xff]  ;;  %v1550_v57 = vld [vmem:[#allocation2 + $0xbc0] sm:$0xff] }
 0x336   :  { %v9112_v62 = vpack.c.bf16 %v1501_v53, %v1500_v61  ;;  %9111 = vmatprep.subr.bf16.mxu1 %v9110_v60  ;;  %v9146_v60 = vpack.c.bf16 %v1551_v58, %v1550_v57  ;;  %v1534_v61 = vld [vmem:[#allocation2 + $0xb40] sm:$0xff]  ;;  %v1535_v53 = vld [vmem:[#allocation2 + $0xb48] sm:$0xff]  ;;  %v1805_v57 = vld [vmem:[#allocation2 + $0xcd8] sm:$0xff] }
 0x337   :  { %v9148_v17 = vpack.c.bf16 %v1535_v53, %v1534_v61  ;;  %v9182_v58 = vpack.c.bf16 %v1805_v57, %v1804_v56  ;;  %v1806_v53 = vld [vmem:[#allocation2 + $0xce0] sm:$0xff]  ;;  %v1839_v56 = vld [vmem:[#allocation2 + $0xde8] sm:$0xff] }
 0x338   :  { %9077 = vmatpush3.bf16.msra.mxu0 %v9076_v1  ;;  %v1502_v1 = vld [vmem:[#allocation2 + $0xa40] sm:$0xff] }
 0x339   :  { %9079 = vmatprep.subr.bf16.mxu0 %v9078_v2  ;;  %9113 = vmatpush3.bf16.msra.mxu1 %v9112_v62  ;;  %v1503_v2 = vld [vmem:[#allocation2 + $0xa48] sm:$0xff]  ;;  %v1552_v62 = vld [vmem:[#allocation2 + $0xbd0] sm:$0xff] }
 0x33a   :  { %v9116_v3 = vpack.c.bf16 %v1503_v2, %v1502_v1  ;;  %9115 = vmatprep.subr.bf16.mxu1 %v9114_v0  ;;  %v9150_v0 = vpack.c.bf16 %v1553_v63, %v1552_v62  ;;  %v1536_v1 = vld [vmem:[#allocation2 + $0xb50] sm:$0xff]  ;;  %v1537_v2 = vld [vmem:[#allocation2 + $0xb58] sm:$0xff]  ;;  %v1807_v62 = vld [vmem:[#allocation2 + $0xce8] sm:$0xff] }
 0x33b   :  { %v9152_v6 = vpack.c.bf16 %v1537_v2, %v1536_v1  ;;  %v9186_v63 = vpack.c.bf16 %v1807_v62, %v1806_v53  ;;  %v1808_v2 = vld [vmem:[#allocation2 + $0xcf0] sm:$0xff]  ;;  %v1841_v53 = vld [vmem:[#allocation2 + $0xdf8] sm:$0xff] }
 0x33c   :  { %9081 = vmatpush3.bf16.msra.mxu0 %v9080_v16  ;;  %v1504_v16 = vld [vmem:[#allocation2 + $0xa50] sm:$0xff] }
 0x33d   :  { %9083 = vmatprep.subr.bf16.mxu0 %v9082_v9  ;;  %9117 = vmatpush3.bf16.msra.mxu1 %v9116_v3  ;;  %v1505_v9 = vld [vmem:[#allocation2 + $0xa58] sm:$0xff]  ;;  %v1554_v3 = vld [vmem:[#allocation2 + $0xbe0] sm:$0xff] }
 0x33e   :  { %v9120_v10 = vpack.c.bf16 %v1505_v9, %v1504_v16  ;;  %9119 = vmatprep.subr.bf16.mxu1 %v9118_v7  ;;  %v9154_v7 = vpack.c.bf16 %v1555_v5, %v1554_v3  ;;  %v1538_v16 = vld [vmem:[#allocation2 + $0xb60] sm:$0xff]  ;;  %v1539_v9 = vld [vmem:[#allocation2 + $0xb68] sm:$0xff]  ;;  %v1809_v3 = vld [vmem:[#allocation2 + $0xcf8] sm:$0xff] }
 0x33f   :  { %v9156_v12 = vpack.c.bf16 %v1539_v9, %v1538_v16  ;;  %v9190_v5 = vpack.c.bf16 %v1809_v3, %v1808_v2 }
 0x340   :  { %9085 = vmatpush3.bf16.msra.mxu0 %v9084_v4  ;;  %v1506_v4 = vld [vmem:[#allocation2 + $0xa60] sm:$0xff] }
 0x341   :  { %9087 = vmatprep.subr.bf16.mxu0 %v9086_v14  ;;  %9121 = vmatpush3.bf16.msra.mxu1 %v9120_v10  ;;  %v1507_v14 = vld [vmem:[#allocation2 + $0xa68] sm:$0xff]  ;;  %v1556_v10 = vld [vmem:[#allocation2 + $0xbf0] sm:$0xff] }
 0x342   :  { %v9124_v15 = vpack.c.bf16 %v1507_v14, %v1506_v4  ;;  %9123 = vmatprep.subr.bf16.mxu1 %v9122_v13  ;;  %v9158_v13 = vpack.c.bf16 %v1557_v11, %v1556_v10  ;;  %v1540_v4 = vld [vmem:[#allocation2 + $0xb70] sm:$0xff]  ;;  %v1541_v14 = vld [vmem:[#allocation2 + $0xb78] sm:$0xff]  ;;  %v1826_v10 = vld [vmem:[#allocation2 + $0xd80] sm:$0xff] }
 0x343   :  { %v1827_v11 = vld [vmem:[#allocation2 + $0xd88] sm:$0xff] }
 0x344   :  { %9089 = vmatpush3.bf16.msra.mxu0 %v9088_v21  ;;  %v1508_v21 = vld [vmem:[#allocation2 + $0xa70] sm:$0xff] }
 0x345   :  { %9091 = vmatprep.subr.bf16.mxu0 %v9090_v24  ;;  %9125 = vmatpush3.bf16.msra.mxu1 %v9124_v15  ;;  %v1509_v24 = vld [vmem:[#allocation2 + $0xa78] sm:$0xff]  ;;  %v9160_v15 = vpack.c.bf16 %v1541_v14, %v1540_v4  ;;  %v1811_v4 = vld [vmem:[#allocation2 + $0xd08] sm:$0xff] }
 0x346   :  { %v7448_v35 = vpop.f32.mrb[8].mxu1  ;;  %v9128_v25 = vpack.c.bf16 %v1509_v24, %v1508_v21  ;;  %9127 = vmatprep.subr.bf16.mxu1 %v9126_v20  ;;  %v1794_v21 = vld [vmem:[#allocation2 + $0xc80] sm:$0xff]  ;;  %v1795_v24 = vld [vmem:[#allocation2 + $0xc88] sm:$0xff] }
 0x347   :  { %v7449_v36 = vpop.f32.mrb[9].mxu1 }
 0x348   :  { %9093 = vmatpush3.bf16.msra.mxu0 %v9092_v29  ;;  %v10027_v37 = vadd.f32 %v7449_v36, %v7448_v35  ;;  %v1545_v35 = vld [vmem:[#allocation2 + $0xb98] sm:$0xff]  ;;  %v9130_v36 = vpack.c.bf16 %v1543_v28, %v1542_v27  ;;  %v1779_v27 = vld [vmem:[#allocation2 + $0xc08] sm:$0xff] }
 0x349   :  { %9095 = vmatprep.subr.bf16.mxu0 %v9094_v30  ;;  %9129 = vmatpush3.bf16.msra.mxu1 %v9128_v25  ;;  %v1526_v30 = vld [vmem:[#allocation2 + $0xb00] sm:$0xff]  ;;  %v9162_v25 = vpack.c.bf16 %v1795_v24, %v1794_v21  ;;  %v6803_v24 = vld [vmem:[%s11176_s4 + $0x28] sm:$0xff] }
 0x34a   :  { %v9132_v40 = vpack.c.bf16 %v1527_v31, %v1526_v30  ;;  %v1797_v30 = vld [vmem:[#allocation2 + $0xc98] sm:$0xff] }
 0x34b   :  { %9163 = vmatprep.subr.bf16.mxu1 %v9162_v25 }
 0x34c   :  { %9097 = vmatpush3.bf16.msra.mxu0 %v9096_v33  ;;  %1623 = vmatmul.mubr.f32.vlgmr.msra.gmra.mrb[10].mxu1 %v10007_v41  ;;  %v1544_v33 = vld [vmem:[#allocation2 + $0xb90] sm:$0xff] }
 0x34d   :  { %8128 = vmatprep.subr.mxu0 %v9836_v8  ;;  %1906 = vmatprep.mubr.f32.mxu1 %v9949_v22  ;;  %v9134_v42 = vpack.c.bf16 %v1545_v35, %v1544_v33  ;;  %v1781_v33 = vld [vmem:[#allocation2 + $0xc18] sm:$0xff] }
 0x34f   :  { %1409 = vmatmul.mubr.f32.vlgmr.msra.gmra.mrb[10].mxu0 %v10022_v34 }
 0x350   :  { %8130 = vmatprep.mubr.msk.f32.mxu0 %vm9837_vm0, %v9836_v8 }
 0x41f   :  { %v7520_v18 = vpop.f32.mrb[10].mxu1 }
 0x420   :  { %v7521_v19 = vpop.f32.mrb[11].mxu1 }
 0x421   :  { %v10042_v20 = vadd.f32 %v7521_v19, %v7520_v18  ;;  %v1829_v18 = vld [vmem:[#allocation2 + $0xd98] sm:$0xff]  ;;  %v9194_v19 = vpack.c.bf16 %v1827_v11, %v1826_v10  ;;  %v2063_v10 = vld [vmem:[#allocation2 + $0xe08] sm:$0xff] }
 0x422   :  { %v7483_v26 = vpop.f32.mrb[10].mxu0 }
 0x423   :  { %v7484_v29 = vpop.f32.mrb[11].mxu0 }
 0x424   :  { %v7485_v32 = vadd.f32 %v7484_v29, %v7483_v26  ;;  %v1778_v26 = vld [vmem:[#allocation2 + $0xc00] sm:$0xff]  ;;  %v1796_v29 = vld [vmem:[#allocation2 + $0xc90] sm:$0xff] }
 0x425   :  { %v9164_v28 = vpack.c.bf16 %v1779_v27, %v1778_v26  ;;  %v9166_v31 = vpack.c.bf16 %v1797_v30, %v1796_v29  ;;  %v1812_v27 = vld [vmem:[#allocation2 + $0xd10] sm:$0xff]  ;;  %v1830_v29 = vld [vmem:[#allocation2 + $0xda0] sm:$0xff]  ;;  %v1831_v30 = vld [vmem:[#allocation2 + $0xda8] sm:$0xff] }
 0x426   :  { %v1411_v38 = vadd.f32 %v7485_v32, %v10027_v37  ;;  %v9138_v37 = vpack.c.bf16 %v1547_v46, %v1546_v45  ;;  %v1780_v32 = vld [vmem:[#allocation2 + $0xc10] sm:$0xff]  ;;  %v1801_v45 = vld [vmem:[#allocation2 + $0xcb8] sm:$0xff] }
 0x427   :  { %9165 = vmatpush3.bf16.msra.mxu1 %v9164_v28  ;;  %v9168_v35 = vpack.c.bf16 %v1781_v33, %v1780_v32  ;;  %v9174_v46 = vpack.c.bf16 %v1801_v45, %v1800_v44  ;;  %v1813_v28 = vld [vmem:[#allocation2 + $0xd18] sm:$0xff]  ;;  %v1814_v32 = vld [vmem:[#allocation2 + $0xd20] sm:$0xff]  ;;  %v1815_v33 = vld [vmem:[#allocation2 + $0xd28] sm:$0xff] }
 0x428   :  { %8129 = vmatpush3.msk.msra.mxu0 %vm491_vm1, %v1411_v38  ;;  %9167 = vmatprep.subr.bf16.mxu1 %v9166_v31  ;;  %v1799_v38 = vld [vmem:[#allocation2 + $0xca8] sm:$0xff]  ;;  %v9200_v31 = vpack.c.bf16 %v1813_v28, %v1812_v27  ;;  %v2084_v28 = vld [vmem:[#allocation2 + $0xeb0] sm:$0xff] }
 0x429   :  { %9131 = vmatprep.subr.bf16.mxu0 %v9130_v36  ;;  %8131 = vmatmul.mubr.msk.f32.vlgmr.msra.gmra.mrb[4].mxu0 %vm487_vm2, %v6800_v39  ;;  %v1798_v36 = vld [vmem:[#allocation2 + $0xca0] sm:$0xff]  ;;  %v1835_v44 = vld [vmem:[#allocation2 + $0xdc8] sm:$0xff] }
 0x42a   :  { %9133 = vmatpush3.bf16.msra.mxu0 %v9132_v40  ;;  %1692 = vmatprep.mubr.f32.mxu0 %v9953_v23  ;;  %v9170_v39 = vpack.c.bf16 %v1799_v38, %v1798_v36  ;;  %v1782_v40 = vld [vmem:[#allocation2 + $0xc20] sm:$0xff]  ;;  %v1833_v36 = vld [vmem:[#allocation2 + $0xdb8] sm:$0xff]  ;;  %v9204_v38 = vpack.c.bf16 %v1815_v33, %v1814_v32 }
 0x42b   :  { %9135 = vmatprep.subr.bf16.mxu0 %v9134_v42  ;;  %9169 = vmatpush3.bf16.msra.mxu1 %v9168_v35  ;;  %v1783_v42 = vld [vmem:[#allocation2 + $0xc28] sm:$0xff]  ;;  %v1832_v35 = vld [vmem:[#allocation2 + $0xdb0] sm:$0xff]  ;;  %v2086_v33 = vld [vmem:[#allocation2 + $0xec0] sm:$0xff] }
 0x42c   :  { %v9172_v43 = vpack.c.bf16 %v1783_v42, %v1782_v40  ;;  %9171 = vmatprep.subr.bf16.mxu1 %v9170_v39  ;;  %v9206_v39 = vpack.c.bf16 %v1833_v36, %v1832_v35  ;;  %v1816_v40 = vld [vmem:[#allocation2 + $0xd30] sm:$0xff]  ;;  %v1817_v42 = vld [vmem:[#allocation2 + $0xd38] sm:$0xff]  ;;  %v2087_v35 = vld [vmem:[#allocation2 + $0xec8] sm:$0xff] }
 0x42d   :  { %v9208_v45 = vpack.c.bf16 %v1817_v42, %v1816_v40  ;;  %v9242_v36 = vpack.c.bf16 %v2087_v35, %v2086_v33  ;;  %v2088_v42 = vld [vmem:[#allocation2 + $0xed0] sm:$0xff] }
 0x42e   :  { %9137 = vmatpush3.bf16.msra.mxu0 %v9136_v47  ;;  %v1784_v47 = vld [vmem:[#allocation2 + $0xc30] sm:$0xff] }
 0x42f   :  { %9139 = vmatprep.subr.bf16.mxu0 %v9138_v37  ;;  %9173 = vmatpush3.bf16.msra.mxu1 %v9172_v43  ;;  %v1785_v37 = vld [vmem:[#allocation2 + $0xc38] sm:$0xff]  ;;  %v1834_v43 = vld [vmem:[#allocation2 + $0xdc0] sm:$0xff]  ;;  %v2104_v35 = vld [vmem:[#allocation2 + $0xf50] sm:$0xff] }
 0x430   :  { %v9176_v48 = vpack.c.bf16 %v1785_v37, %v1784_v47  ;;  %9175 = vmatprep.subr.bf16.mxu1 %v9174_v46  ;;  %v9210_v46 = vpack.c.bf16 %v1835_v44, %v1834_v43  ;;  %v1818_v47 = vld [vmem:[#allocation2 + $0xd40] sm:$0xff]  ;;  %v1819_v37 = vld [vmem:[#allocation2 + $0xd48] sm:$0xff]  ;;  %v2089_v43 = vld [vmem:[#allocation2 + $0xed8] sm:$0xff] }
 0x431   :  { %v9212_v50 = vpack.c.bf16 %v1819_v37, %v1818_v47  ;;  %v9246_v44 = vpack.c.bf16 %v2089_v43, %v2088_v42  ;;  %v2090_v37 = vld [vmem:[#allocation2 + $0xee0] sm:$0xff] }
 0x432   :  { %9141 = vmatpush3.bf16.msra.mxu0 %v9140_v52  ;;  %v1786_v52 = vld [vmem:[#allocation2 + $0xc40] sm:$0xff] }
 0x433   :  { %9143 = vmatprep.subr.bf16.mxu0 %v9142_v54  ;;  %9177 = vmatpush3.bf16.msra.mxu1 %v9176_v48  ;;  %v1787_v54 = vld [vmem:[#allocation2 + $0xc48] sm:$0xff]  ;;  %v1836_v48 = vld [vmem:[#allocation2 + $0xdd0] sm:$0xff]  ;;  %v2106_v43 = vld [vmem:[#allocation2 + $0xf60] sm:$0xff] }
 0x434   :  { %v9180_v55 = vpack.c.bf16 %v1787_v54, %v1786_v52  ;;  %9179 = vmatprep.subr.bf16.mxu1 %v9178_v51  ;;  %v9214_v51 = vpack.c.bf16 %v1837_v49, %v1836_v48  ;;  %v1820_v52 = vld [vmem:[#allocation2 + $0xd50] sm:$0xff]  ;;  %v1821_v54 = vld [vmem:[#allocation2 + $0xd58] sm:$0xff]  ;;  %v2091_v48 = vld [vmem:[#allocation2 + $0xee8] sm:$0xff] }
 0x435   :  { %v9216_v57 = vpack.c.bf16 %v1821_v54, %v1820_v52  ;;  %v9250_v49 = vpack.c.bf16 %v2091_v48, %v2090_v37  ;;  %v2092_v54 = vld [vmem:[#allocation2 + $0xef0] sm:$0xff] }
 0x436   :  { %9145 = vmatpush3.bf16.msra.mxu0 %v9144_v59  ;;  %v1788_v59 = vld [vmem:[#allocation2 + $0xc50] sm:$0xff] }
 0x437   :  { %9147 = vmatprep.subr.bf16.mxu0 %v9146_v60  ;;  %9181 = vmatpush3.bf16.msra.mxu1 %v9180_v55  ;;  %v1789_v60 = vld [vmem:[#allocation2 + $0xc58] sm:$0xff]  ;;  %v1838_v55 = vld [vmem:[#allocation2 + $0xde0] sm:$0xff]  ;;  %v2108_v48 = vld [vmem:[#allocation2 + $0xf70] sm:$0xff] }
 0x438   :  { %v9184_v61 = vpack.c.bf16 %v1789_v60, %v1788_v59  ;;  %9183 = vmatprep.subr.bf16.mxu1 %v9182_v58  ;;  %v9218_v58 = vpack.c.bf16 %v1839_v56, %v1838_v55  ;;  %v1822_v59 = vld [vmem:[#allocation2 + $0xd60] sm:$0xff]  ;;  %v1823_v60 = vld [vmem:[#allocation2 + $0xd68] sm:$0xff]  ;;  %v2093_v55 = vld [vmem:[#allocation2 + $0xef8] sm:$0xff] }
 0x439   :  { %v9220_v62 = vpack.c.bf16 %v1823_v60, %v1822_v59  ;;  %v9254_v56 = vpack.c.bf16 %v2093_v55, %v2092_v54  ;;  %v2362_v55 = vld [vmem:[#allocation2 + $0x1080] sm:$0xff] }
 0x43a   :  { %9149 = vmatpush3.bf16.msra.mxu0 %v9148_v17  ;;  %v1790_v17 = vld [vmem:[#allocation2 + $0xc60] sm:$0xff] }
 0x43b   :  { %9151 = vmatprep.subr.bf16.mxu0 %v9150_v0  ;;  %9185 = vmatpush3.bf16.msra.mxu1 %v9184_v61  ;;  %v1791_v0 = vld [vmem:[#allocation2 + $0xc68] sm:$0xff]  ;;  %v1840_v61 = vld [vmem:[#allocation2 + $0xdf0] sm:$0xff] }
 0x43c   :  { %v9188_v1 = vpack.c.bf16 %v1791_v0, %v1790_v17  ;;  %9187 = vmatprep.subr.bf16.mxu1 %v9186_v63  ;;  %v9222_v63 = vpack.c.bf16 %v1841_v53, %v1840_v61  ;;  %v1824_v17 = vld [vmem:[#allocation2 + $0xd70] sm:$0xff]  ;;  %v1825_v0 = vld [vmem:[#allocation2 + $0xd78] sm:$0xff]  ;;  %v2110_v61 = vld [vmem:[#allocation2 + $0xf80] sm:$0xff] }
 0x43d   :  { %v2111_v53 = vld [vmem:[#allocation2 + $0xf88] sm:$0xff] }
 0x43e   :  { %9153 = vmatpush3.bf16.msra.mxu0 %v9152_v6  ;;  %v1792_v6 = vld [vmem:[#allocation2 + $0xc70] sm:$0xff] }
 0x43f   :  { %9155 = vmatprep.subr.bf16.mxu0 %v9154_v7  ;;  %9189 = vmatpush3.bf16.msra.mxu1 %v9188_v1  ;;  %v1793_v7 = vld [vmem:[#allocation2 + $0xc78] sm:$0xff]  ;;  %v9224_v1 = vpack.c.bf16 %v1825_v0, %v1824_v17  ;;  %v2095_v17 = vld [vmem:[#allocation2 + $0xf08] sm:$0xff] }
 0x440   :  { %v9192_v16 = vpack.c.bf16 %v1793_v7, %v1792_v6  ;;  %9191 = vmatprep.subr.bf16.mxu1 %v9190_v5  ;;  %v2078_v6 = vld [vmem:[#allocation2 + $0xe80] sm:$0xff]  ;;  %v2079_v7 = vld [vmem:[#allocation2 + $0xe88] sm:$0xff] }
 0x442   :  { %9157 = vmatpush3.bf16.msra.mxu0 %v9156_v12 }
 0x443   :  { %9159 = vmatprep.subr.bf16.mxu0 %v9158_v13  ;;  %9193 = vmatpush3.bf16.msra.mxu1 %v9192_v16  ;;  %v1810_v13 = vld [vmem:[#allocation2 + $0xd00] sm:$0xff]  ;;  %v9226_v16 = vpack.c.bf16 %v2079_v7, %v2078_v6  ;;  %v6806_v7 = vld [vmem:[%s11176_s4 + $0x30] sm:$0xff] }
 0x444   :  { %v9196_v25 = vpack.c.bf16 %v1811_v4, %v1810_v13  ;;  %v2081_v13 = vld [vmem:[#allocation2 + $0xe98] sm:$0xff] }
 0x445   :  { %9227 = vmatprep.subr.bf16.mxu1 %v9226_v16 }
 0x446   :  { %9161 = vmatpush3.bf16.msra.mxu0 %v9160_v15  ;;  %1907 = vmatmul.mubr.f32.vlgmr.msra.gmra.mrb[12].mxu1 %v10007_v41  ;;  %v1828_v15 = vld [vmem:[#allocation2 + $0xd90] sm:$0xff] }
 0x447   :  { %8133 = vmatprep.subr.mxu0 %v9836_v8  ;;  %2190 = vmatprep.mubr.f32.mxu1 %v9949_v22  ;;  %v9198_v26 = vpack.c.bf16 %v1829_v18, %v1828_v15  ;;  %v2065_v15 = vld [vmem:[#allocation2 + $0xe18] sm:$0xff] }
 0x449   :  { %1693 = vmatmul.mubr.f32.vlgmr.msra.gmra.mrb[12].mxu0 %v10022_v34 }
 0x44a   :  { %8135 = vmatprep.mubr.msk.f32.mxu0 %vm9837_vm0, %v9836_v8 }
 0x519   :  { %v7592_v2 = vpop.f32.mrb[12].mxu1 }
 0x51a   :  { %v7593_v3 = vpop.f32.mrb[13].mxu1 }
 0x51b   :  { %v10057_v5 = vadd.f32 %v7593_v3, %v7592_v2  ;;  %v2113_v2 = vld [vmem:[#allocation2 + $0xf98] sm:$0xff]  ;;  %v9258_v3 = vpack.c.bf16 %v2111_v53, %v2110_v61  ;;  %v2364_v61 = vld [vmem:[#allocation2 + $0x1090] sm:$0xff] }
 0x51c   :  { %v7555_v9 = vpop.f32.mrb[12].mxu0  ;;  %v2365_v53 = vld [vmem:[#allocation2 + $0x1098] sm:$0xff] }
 0x51d   :  { %v7556_v12 = vpop.f32.mrb[13].mxu0 }
 0x51e   :  { %v7557_v14 = vadd.f32 %v7556_v12, %v7555_v9  ;;  %v2062_v9 = vld [vmem:[#allocation2 + $0xe00] sm:$0xff]  ;;  %v2080_v12 = vld [vmem:[#allocation2 + $0xe90] sm:$0xff] }
 0x51f   :  { %v9228_v11 = vpack.c.bf16 %v2063_v10, %v2062_v9  ;;  %v9230_v4 = vpack.c.bf16 %v2081_v13, %v2080_v12  ;;  %v2096_v9 = vld [vmem:[#allocation2 + $0xf10] sm:$0xff]  ;;  %v2114_v10 = vld [vmem:[#allocation2 + $0xfa0] sm:$0xff] }
 0x520   :  { %v1695_v21 = vadd.f32 %v7557_v14, %v10042_v20  ;;  %v9202_v20 = vpack.c.bf16 %v1831_v30, %v1830_v29  ;;  %v2064_v14 = vld [vmem:[#allocation2 + $0xe10] sm:$0xff]  ;;  %v2085_v29 = vld [vmem:[#allocation2 + $0xeb8] sm:$0xff]  ;;  %v2098_v13 = vld [vmem:[#allocation2 + $0xf20] sm:$0xff] }
 0x521   :  { %9229 = vmatpush3.bf16.msra.mxu1 %v9228_v11  ;;  %v9232_v18 = vpack.c.bf16 %v2065_v15, %v2064_v14  ;;  %v9238_v30 = vpack.c.bf16 %v2085_v29, %v2084_v28  ;;  %v2115_v11 = vld [vmem:[#allocation2 + $0xfa8] sm:$0xff]  ;;  %v2116_v14 = vld [vmem:[#allocation2 + $0xfb0] sm:$0xff]  ;;  %v2117_v15 = vld [vmem:[#allocation2 + $0xfb8] sm:$0xff] }
 0x522   :  { %8134 = vmatpush3.msk.msra.mxu0 %vm491_vm1, %v1695_v21  ;;  %9231 = vmatprep.subr.bf16.mxu1 %v9230_v4  ;;  %v2083_v21 = vld [vmem:[#allocation2 + $0xea8] sm:$0xff]  ;;  %v2102_v29 = vld [vmem:[#allocation2 + $0xf40] sm:$0xff] }
 0x523   :  { %9195 = vmatprep.subr.bf16.mxu0 %v9194_v19  ;;  %8136 = vmatmul.mubr.msk.f32.vlgmr.msra.gmra.mrb[4].mxu0 %vm487_vm2, %v6803_v24  ;;  %v2082_v19 = vld [vmem:[#allocation2 + $0xea0] sm:$0xff]  ;;  %v2099_v4 = vld [vmem:[#allocation2 + $0xf28] sm:$0xff] }
 0x524   :  { %9197 = vmatpush3.bf16.msra.mxu0 %v9196_v25  ;;  %1976 = vmatprep.mubr.f32.mxu0 %v9953_v23  ;;  %v9234_v24 = vpack.c.bf16 %v2083_v21, %v2082_v19  ;;  %v2066_v25 = vld [vmem:[#allocation2 + $0xe20] sm:$0xff]  ;;  %v9270_v19 = vpack.c.bf16 %v2117_v15, %v2116_v14  ;;  %v2100_v21 = vld [vmem:[#allocation2 + $0xf30] sm:$0xff]  ;;  %v2355_v14 = vld [vmem:[#allocation2 + $0x1048] sm:$0xff] }
 0x525   :  { %9199 = vmatprep.subr.bf16.mxu0 %v9198_v26  ;;  %9233 = vmatpush3.bf16.msra.mxu1 %v9232_v18  ;;  %v2067_v26 = vld [vmem:[#allocation2 + $0xe28] sm:$0xff]  ;;  %v9268_v18 = vpack.c.bf16 %v2099_v4, %v2098_v13  ;;  %v2354_v4 = vld [vmem:[#allocation2 + $0x1040] sm:$0xff] }
 0x526   :  { %v9236_v27 = vpack.c.bf16 %v2067_v26, %v2066_v25  ;;  %9235 = vmatprep.subr.bf16.mxu1 %v9234_v24  ;;  %v2101_v24 = vld [vmem:[#allocation2 + $0xf38] sm:$0xff]  ;;  %v2118_v25 = vld [vmem:[#allocation2 + $0xfc0] sm:$0xff]  ;;  %v2119_v26 = vld [vmem:[#allocation2 + $0xfc8] sm:$0xff]  ;;  %v9308_v15 = vpack.c.bf16 %v2355_v14, %v2354_v4 }
 0x527   :  { %v9274_v28 = vpack.c.bf16 %v2119_v26, %v2118_v25  ;;  %v2357_v25 = vld [vmem:[#allocation2 + $0x1058] sm:$0xff]  ;;  %v2407_v4 = vld [vmem:[#allocation2 + $0x11e8] sm:$0xff] }
 0x528   :  { %9201 = vmatpush3.bf16.msra.mxu0 %v9200_v31  ;;  %v2068_v31 = vld [vmem:[#allocation2 + $0xe30] sm:$0xff] }
 0x529   :  { %9203 = vmatprep.subr.bf16.mxu0 %v9202_v20  ;;  %9237 = vmatpush3.bf16.msra.mxu1 %v9236_v27  ;;  %v2069_v20 = vld [vmem:[#allocation2 + $0xe38] sm:$0xff]  ;;  %v9272_v27 = vpack.c.bf16 %v2101_v24, %v2100_v21  ;;  %v2356_v24 = vld [vmem:[#allocation2 + $0x1050] sm:$0xff] }
 0x52a   :  { %v9240_v32 = vpack.c.bf16 %v2069_v20, %v2068_v31  ;;  %9239 = vmatprep.subr.bf16.mxu1 %v9238_v30  ;;  %v2103_v30 = vld [vmem:[#allocation2 + $0xf48] sm:$0xff]  ;;  %v2120_v31 = vld [vmem:[#allocation2 + $0xfd0] sm:$0xff]  ;;  %v2121_v20 = vld [vmem:[#allocation2 + $0xfd8] sm:$0xff]  ;;  %v9312_v26 = vpack.c.bf16 %v2357_v25, %v2356_v24 }
 0x52b   :  { %v9278_v33 = vpack.c.bf16 %v2121_v20, %v2120_v31  ;;  %v2359_v31 = vld [vmem:[#allocation2 + $0x1068] sm:$0xff]  ;;  %v2409_v24 = vld [vmem:[#allocation2 + $0x11f8] sm:$0xff] }
 0x52c   :  { %9205 = vmatpush3.bf16.msra.mxu0 %v9204_v38  ;;  %v2070_v38 = vld [vmem:[#allocation2 + $0xe40] sm:$0xff] }
 0x52d   :  { %9207 = vmatprep.subr.bf16.mxu0 %v9206_v39  ;;  %9241 = vmatpush3.bf16.msra.mxu1 %v9240_v32  ;;  %v2071_v39 = vld [vmem:[#allocation2 + $0xe48] sm:$0xff]  ;;  %v9276_v32 = vpack.c.bf16 %v2103_v30, %v2102_v29  ;;  %v2358_v30 = vld [vmem:[#allocation2 + $0x1060] sm:$0xff] }
 0x52e   :  { %v9244_v40 = vpack.c.bf16 %v2071_v39, %v2070_v38  ;;  %9243 = vmatprep.subr.bf16.mxu1 %v9242_v36  ;;  %v2105_v36 = vld [vmem:[#allocation2 + $0xf58] sm:$0xff]  ;;  %v2122_v38 = vld [vmem:[#allocation2 + $0xfe0] sm:$0xff]  ;;  %v2123_v39 = vld [vmem:[#allocation2 + $0xfe8] sm:$0xff]  ;;  %v9316_v20 = vpack.c.bf16 %v2359_v31, %v2358_v30 }
 0x52f   :  { %v9282_v42 = vpack.c.bf16 %v2123_v39, %v2122_v38  ;;  %v2361_v38 = vld [vmem:[#allocation2 + $0x1078] sm:$0xff]  ;;  %v9808_v30 = vld [vmem:[%s11191_s21 + $0x8] sm:$0xff] }
 0x530   :  { %9209 = vmatpush3.bf16.msra.mxu0 %v9208_v45  ;;  %v2072_v45 = vld [vmem:[#allocation2 + $0xe50] sm:$0xff] }
 0x531   :  { %9211 = vmatprep.subr.bf16.mxu0 %v9210_v46  ;;  %9245 = vmatpush3.bf16.msra.mxu1 %v9244_v40  ;;  %v2073_v46 = vld [vmem:[#allocation2 + $0xe58] sm:$0xff]  ;;  %v9280_v40 = vpack.c.bf16 %v2105_v36, %v2104_v35  ;;  %v2360_v36 = vld [vmem:[#allocation2 + $0x1070] sm:$0xff] }
 0x532   :  { %v9248_v47 = vpack.c.bf16 %v2073_v46, %v2072_v45  ;;  %9247 = vmatprep.subr.bf16.mxu1 %v9246_v44  ;;  %v2107_v44 = vld [vmem:[#allocation2 + $0xf68] sm:$0xff]  ;;  %v2124_v45 = vld [vmem:[#allocation2 + $0xff0] sm:$0xff]  ;;  %v2125_v46 = vld [vmem:[#allocation2 + $0xff8] sm:$0xff]  ;;  %v9320_v39 = vpack.c.bf16 %v2361_v38, %v2360_v36 }
 0x533   :  { %v9286_v37 = vpack.c.bf16 %v2125_v46, %v2124_v45  ;;  %v2378_v46 = vld [vmem:[#allocation2 + $0x1100] sm:$0xff] }
 0x534   :  { %9213 = vmatpush3.bf16.msra.mxu0 %v9212_v50  ;;  %v2074_v50 = vld [vmem:[#allocation2 + $0xe60] sm:$0xff] }
 0x535   :  { %9215 = vmatprep.subr.bf16.mxu0 %v9214_v51  ;;  %9249 = vmatpush3.bf16.msra.mxu1 %v9248_v47  ;;  %v2075_v51 = vld [vmem:[#allocation2 + $0xe68] sm:$0xff]  ;;  %v9284_v47 = vpack.c.bf16 %v2107_v44, %v2106_v43  ;;  %v2394_v43 = vld [vmem:[#allocation2 + $0x1180] sm:$0xff] }
 0x536   :  { %v9252_v52 = vpack.c.bf16 %v2075_v51, %v2074_v50  ;;  %9251 = vmatprep.subr.bf16.mxu1 %v9250_v49  ;;  %v2109_v49 = vld [vmem:[#allocation2 + $0xf78] sm:$0xff]  ;;  %v2395_v44 = vld [vmem:[#allocation2 + $0x1188] sm:$0xff] }
 0x537   :  { %v9288_v50 = vpack.c.bf16 %v2109_v49, %v2108_v48  ;;  %v2396_v48 = vld [vmem:[#allocation2 + $0x1190] sm:$0xff]  ;;  %v2397_v49 = vld [vmem:[#allocation2 + $0x1198] sm:$0xff] }
 0x538   :  { %9217 = vmatpush3.bf16.msra.mxu0 %v9216_v57  ;;  %v2076_v57 = vld [vmem:[#allocation2 + $0xe70] sm:$0xff] }
 0x539   :  { %9219 = vmatprep.subr.bf16.mxu0 %v9218_v58  ;;  %9253 = vmatpush3.bf16.msra.mxu1 %v9252_v52  ;;  %v2077_v58 = vld [vmem:[#allocation2 + $0xe78] sm:$0xff] }
 0x53a   :  { %v9256_v59 = vpack.c.bf16 %v2077_v58, %v2076_v57  ;;  %9255 = vmatprep.subr.bf16.mxu1 %v9254_v56  ;;  %v2363_v56 = vld [vmem:[#allocation2 + $0x1088] sm:$0xff]  ;;  %v2346_v58 = vld [vmem:[#allocation2 + $0x1000] sm:$0xff] }
 0x53b   :  { %v9290_v57 = vpack.c.bf16 %v2363_v56, %v2362_v55  ;;  %v9326_v56 = vpack.c.bf16 %v2397_v49, %v2396_v48  ;;  %v2661_v49 = vld [vmem:[%s11174_s2 + $0x18] sm:$0xff] }
 0x53c   :  { %9221 = vmatpush3.bf16.msra.mxu0 %v9220_v62 }
 0x53d   :  { %9223 = vmatprep.subr.bf16.mxu0 %v9222_v63  ;;  %9257 = vmatpush3.bf16.msra.mxu1 %v9256_v59  ;;  %v2094_v63 = vld [vmem:[#allocation2 + $0xf00] sm:$0xff]  ;;  %v2347_v59 = vld [vmem:[#allocation2 + $0x1008] sm:$0xff] }
 0x53e   :  { %v9260_v16 = vpack.c.bf16 %v2095_v17, %v2094_v63  ;;  %9291 = vmatprep.subr.bf16.mxu1 %v9290_v57  ;;  %v2348_v63 = vld [vmem:[#allocation2 + $0x1010] sm:$0xff] }
 0x53f   :  { %v2380_v57 = vld [vmem:[#allocation2 + $0x1110] sm:$0xff] }
 0x540   :  { %9225 = vmatpush3.bf16.msra.mxu0 %v9224_v1  ;;  %2191 = vmatmul.mubr.f32.vlgmr.msra.gmra.mrb[14].mxu1 %v10007_v41  ;;  %v2112_v1 = vld [vmem:[#allocation2 + $0xf90] sm:$0xff] }
 0x541   :  { %8138 = vmatprep.subr.mxu0 %v9836_v8  ;;  %2474 = vmatprep.mubr.f32.mxu1 %v9949_v22  ;;  %v9262_v41 = vpack.c.bf16 %v2113_v2, %v2112_v1  ;;  %v2097_v22 = vld [vmem:[#allocation2 + $0xf18] sm:$0xff]  ;;  %v2367_v1 = vld [vmem:[#allocation2 + $0x10a8] sm:$0xff] }
 0x542   :  { %v9264_v12 = vpack.c.bf16 %v2097_v22, %v2096_v9  ;;  %v2352_v22 = vld [vmem:[#allocation2 + $0x1030] sm:$0xff] }
 0x543   :  { %1977 = vmatmul.mubr.f32.vlgmr.msra.gmra.mrb[14].mxu0 %v10022_v34 }
 0x544   :  { %8140 = vmatprep.mubr.msk.f32.mxu0 %vm9837_vm0, %v9836_v8 }
 0x613   :  { %v7664_v51 = vpop.f32.mrb[14].mxu1 }
 0x614   :  { %v7665_v52 = vpop.f32.mrb[15].mxu1 }
 0x615   :  { %v10072_v54 = vadd.f32 %v7665_v52, %v7664_v51  ;;  %v6809_v52 = vld [vmem:[%s11176_s4 + $0x38] sm:$0xff] }
 0x616   :  { %v7627_v60 = vpop.f32.mrb[14].mxu0 }
 0x617   :  { %v7628_v62 = vpop.f32.mrb[15].mxu0 }
 0x618   :  { %v7629_v0 = vadd.f32 %v7628_v62, %v7627_v60  ;;  %v9292_v60 = vpack.c.bf16 %v2347_v59, %v2346_v58  ;;  %v9294_v62 = vpack.c.bf16 %v2365_v53, %v2364_v61  ;;  %v2381_v58 = vld [vmem:[#allocation2 + $0x1118] sm:$0xff]  ;;  %v2398_v59 = vld [vmem:[#allocation2 + $0x11a0] sm:$0xff] }
 0x619   :  { %v9328_v61 = vpack.c.bf16 %v2381_v58, %v2380_v57  ;;  %v2382_v53 = vld [vmem:[#allocation2 + $0x1120] sm:$0xff]  ;;  %v2665_v57 = vld [vmem:[%s11174_s2 + $0x38] sm:$0xff] }
 0x61a   :  { %v1979_v6 = vadd.f32 %v7629_v0, %v10057_v5  ;;  %v9266_v5 = vpack.c.bf16 %v2115_v11, %v2114_v10  ;;  %9293 = vmatpush3.bf16.msra.mxu1 %v9292_v60  ;;  %v2366_v0 = vld [vmem:[#allocation2 + $0x10a0] sm:$0xff]  ;;  %v2353_v10 = vld [vmem:[#allocation2 + $0x1038] sm:$0xff]  ;;  %v2399_v60 = vld [vmem:[#allocation2 + $0x11a8] sm:$0xff] }
 0x61b   :  { %9295 = vmatprep.subr.bf16.mxu1 %v9294_v62  ;;  %v9298_v2 = vpack.c.bf16 %v2367_v1, %v2366_v0  ;;  %v9304_v11 = vpack.c.bf16 %v2353_v10, %v2352_v22  ;;  %v2383_v62 = vld [vmem:[#allocation2 + $0x1128] sm:$0xff]  ;;  %v2384_v1 = vld [vmem:[#allocation2 + $0x1130] sm:$0xff]  ;;  %v2405_v22 = vld [vmem:[#allocation2 + $0x11d8] sm:$0xff] }
 0x61c   :  { %8139 = vmatpush3.msk.msra.mxu0 %vm491_vm1, %v1979_v6  ;;  %v2351_v6 = vld [vmem:[#allocation2 + $0x1028] sm:$0xff] }
 0x61d   :  { %9259 = vmatprep.subr.bf16.mxu0 %v9258_v3  ;;  %8141 = vmatmul.mubr.msk.f32.vlgmr.msra.gmra.mrb[4].mxu0 %vm487_vm2, %v6806_v7  ;;  %v2350_v3 = vld [vmem:[#allocation2 + $0x1020] sm:$0xff] }
 0x61e   :  { %9261 = vmatpush3.bf16.msra.mxu0 %v9260_v16  ;;  %2260 = vmatprep.mubr.f32.mxu0 %v9953_v23  ;;  %v9300_v7 = vpack.c.bf16 %v2351_v6, %v2350_v3  ;;  %v2368_v16 = vld [vmem:[#allocation2 + $0x10b0] sm:$0xff]  ;;  %v2402_v3 = vld [vmem:[#allocation2 + $0x11c0] sm:$0xff]  ;;  %v2403_v6 = vld [vmem:[#allocation2 + $0x11c8] sm:$0xff] }
 0x61f   :  { %9263 = vmatprep.subr.bf16.mxu0 %v9262_v41  ;;  %v2369_v41 = vld [vmem:[#allocation2 + $0x10b8] sm:$0xff] }
 0x620   :  { %v9302_v9 = vpack.c.bf16 %v2369_v41, %v2368_v16  ;;  %v9338_v16 = vpack.c.bf16 %v2403_v6, %v2402_v3  ;;  %v2386_v41 = vld [vmem:[#allocation2 + $0x1140] sm:$0xff] }
 0x621   :  { %v2640_v6 = vld [vmem:[%s11179_s7] sm:$0xff] }
 0x622   :  { %9265 = vmatpush3.bf16.msra.mxu0 %v9264_v12  ;;  %v2370_v12 = vld [vmem:[#allocation2 + $0x10c0] sm:$0xff] }
 0x623   :  { %9267 = vmatprep.subr.bf16.mxu0 %v9266_v5  ;;  %v2371_v5 = vld [vmem:[#allocation2 + $0x10c8] sm:$0xff] }
 0x624   :  { %v9306_v13 = vpack.c.bf16 %v2371_v5, %v2370_v12  ;;  %v2388_v12 = vld [vmem:[#allocation2 + $0x1150] sm:$0xff]  ;;  %v2389_v5 = vld [vmem:[#allocation2 + $0x1158] sm:$0xff] }
 0x625   :  { %v9344_v14 = vpack.c.bf16 %v2389_v5, %v2388_v12  ;;  %v2673_v12 = vld [vmem:[%s11174_s2 + $0x78] sm:$0xff] }
 0x626   :  { %9269 = vmatpush3.bf16.msra.mxu0 %v9268_v18  ;;  %v2372_v18 = vld [vmem:[#allocation2 + $0x10d0] sm:$0xff] }
 0x627   :  { %9271 = vmatprep.subr.bf16.mxu0 %v9270_v19  ;;  %v2373_v19 = vld [vmem:[#allocation2 + $0x10d8] sm:$0xff] }
 0x628   :  { %v9310_v21 = vpack.c.bf16 %v2373_v19, %v2372_v18  ;;  %v2390_v18 = vld [vmem:[#allocation2 + $0x1160] sm:$0xff]  ;;  %v2391_v19 = vld [vmem:[#allocation2 + $0x1168] sm:$0xff] }
 0x629   :  { %v9348_v25 = vpack.c.bf16 %v2391_v19, %v2390_v18  ;;  %v6816_v18 = vld [vmem:[%s11174_s2 + $0x88] sm:$0xff] }
 0x62a   :  { %9273 = vmatpush3.bf16.msra.mxu0 %v9272_v27  ;;  %v2374_v27 = vld [vmem:[#allocation2 + $0x10e0] sm:$0xff] }
 0x62b   :  { %9275 = vmatprep.subr.bf16.mxu0 %v9274_v28  ;;  %v2375_v28 = vld [vmem:[#allocation2 + $0x10e8] sm:$0xff] }
 0x62c   :  { %v9314_v29 = vpack.c.bf16 %v2375_v28, %v2374_v27  ;;  %v2392_v27 = vld [vmem:[#allocation2 + $0x1170] sm:$0xff]  ;;  %v2393_v28 = vld [vmem:[#allocation2 + $0x1178] sm:$0xff] }
 0x62e   :  { %9277 = vmatpush3.bf16.msra.mxu0 %v9276_v32  ;;  %v2376_v32 = vld [vmem:[#allocation2 + $0x10f0] sm:$0xff] }
 0x62f   :  { %9279 = vmatprep.subr.bf16.mxu0 %v9278_v33  ;;  %v2377_v33 = vld [vmem:[#allocation2 + $0x10f8] sm:$0xff] }
 0x630   :  { %v9318_v35 = vpack.c.bf16 %v2377_v33, %v2376_v32 }
 0x632   :  { %9281 = vmatpush3.bf16.msra.mxu0 %v9280_v40  ;;  %v9807_v40 = vld [vmem:[%s11191_s21] sm:$0xff] }
 0x633   :  { %9283 = vmatprep.subr.bf16.mxu0 %v9282_v42 }
 0x636   :  { %9285 = vmatpush3.bf16.msra.mxu0 %v9284_v47  ;;  %v2379_v47 = vld [vmem:[#allocation2 + $0x1108] sm:$0xff] }
 0x637   :  { %9287 = vmatprep.subr.bf16.mxu0 %v9286_v37  ;;  %v9324_v55 = vpack.c.bf16 %v2379_v47, %v2378_v46  ;;  %v2659_v46 = vld [vmem:[%s11174_s2 + $0x8] sm:$0xff]  ;;  %v2660_v47 = vld [vmem:[%s11174_s2 + $0x10] sm:$0xff] }
 0x63a   :  { %9289 = vmatpush3.bf16.msra.mxu0 %v9288_v50  ;;  %v9322_v50 = vpack.c.bf16 %v2395_v44, %v2394_v43  ;;  %v9838_v44 = vmov 0  }
 0x63b   :  { %8143 = vmatprep.subr.mxu0 %v9836_v8  ;;  %9787 = vset.pattern.permute.xlu1 %v9838_v44 }
 0x63c   :  { %9788 = vset.pattern.permute.xlu0 %v9838_v44  ;;  %v6828_v44 = vld [vmem:[%s11174_s2 + $0xe8] sm:$0xff] }
 0x63d   :  { %2261 = vmatmul.mubr.f32.vlgmr.msra.gmra.mrb[16].mxu0 %v10022_v34  ;;  %v2349_v34 = vld [vmem:[#allocation2 + $0x1018] sm:$0xff] }
 0x63e   :  { %8145 = vmatprep.mubr.msk.f32.mxu0 %vm9837_vm0, %v9836_v8  ;;  %v9296_v17 = vpack.c.bf16 %v2349_v34, %v2348_v63  ;;  %v2400_v63 = vld [vmem:[#allocation2 + $0x11b0] sm:$0xff]  ;;  %v2401_v34 = vld [vmem:[#allocation2 + $0x11b8] sm:$0xff] }
 0x63f   :  { %v9334_v0 = vpack.c.bf16 %v2401_v34, %v2400_v63 }
 0x640   :  { %9297 = vmatpush3.bf16.msra.mxu1 %v9296_v17  ;;  %v9332_v17 = vpack.c.bf16 %v2383_v62, %v2382_v53  ;;  %v2669_v53 = vld [vmem:[%s11174_s2 + $0x58] sm:$0xff] }
 0x641   :  { %9299 = vmatprep.subr.bf16.mxu1 %v9298_v2  ;;  %v2385_v2 = vld [vmem:[#allocation2 + $0x1138] sm:$0xff] }
 0x644   :  { %9301 = vmatpush3.bf16.msra.mxu1 %v9300_v7  ;;  %v9336_v7 = vpack.c.bf16 %v2385_v2, %v2384_v1 }
 0x645   :  { %9303 = vmatprep.subr.bf16.mxu1 %v9302_v9  ;;  %v2404_v9 = vld [vmem:[#allocation2 + $0x11d0] sm:$0xff] }
 0x648   :  { %9305 = vmatpush3.bf16.msra.mxu1 %v9304_v11  ;;  %v9342_v11 = vpack.c.bf16 %v2405_v22, %v2404_v9  ;;  %v2642_v22 = vld [vmem:[%s11180_s8] sm:$0xff] }
 0x649   :  { %9307 = vmatprep.subr.bf16.mxu1 %v9306_v13  ;;  %v2406_v13 = vld [vmem:[#allocation2 + $0x11e0] sm:$0xff] }
 0x64c   :  { %9309 = vmatpush3.bf16.msra.mxu1 %v9308_v15  ;;  %v9346_v15 = vpack.c.bf16 %v2407_v4, %v2406_v13 }
 0x64d   :  { %9311 = vmatprep.subr.bf16.mxu1 %v9310_v21  ;;  %v2408_v21 = vld [vmem:[#allocation2 + $0x11f0] sm:$0xff] }
 0x650   :  { %9313 = vmatpush3.bf16.msra.mxu1 %v9312_v26  ;;  %v9350_v26 = vpack.c.bf16 %v2409_v24, %v2408_v21 }
 0x651   :  { %9315 = vmatprep.subr.bf16.mxu1 %v9314_v29  ;;  %v9352_v29 = vpack.c.bf16 %v2393_v28, %v2392_v27  ;;  %v6818_v27 = vld [vmem:[%s11174_s2 + $0x98] sm:$0xff] }
 0x654   :  { %9317 = vmatpush3.bf16.msra.mxu1 %v9316_v20 }
 0x655   :  { %9319 = vmatprep.subr.bf16.mxu1 %v9318_v35 }
 0x658   :  { %9321 = vmatpush3.bf16.msra.mxu1 %v9320_v39  ;;  %v6812_v39 = vld [vmem:[%s11176_s4 + $0x40] sm:$0xff] }
 0x65b   :  { %2475 = vmatmul.mubr.f32.vlgmr.msra.gmra.mrb[16].mxu1 %v9807_v40 }
 0x65c   :  { %8185 = vmatprep.mubr.msk.f32.mxu1 %vm9837_vm0, %v9836_v8 }
 0x710   :  { %v7699_v42 = vpop.f32.mrb[16].mxu0 }
 0x711   :  { %v7700_v45 = vpop.f32.mrb[17].mxu0 }
 0x712   :  { %v7701_v37 = vadd.f32 %v7700_v45, %v7699_v42  ;;  %v2658_v45 = vld [vmem:[%s11174_s2] sm:$0xff] }
 0x713   :  { %v9355_v48 = vpack.c.bf16 %v2659_v46, %v2658_v45  ;;  %v6829_v46 = vld [vmem:[%s11174_s2 + $0xf0] sm:$0xff] }
 0x714   :  { %v2263_v51 = vadd.f32 %v7701_v37, %v10072_v54  ;;  %v9330_v54 = vpack.c.bf16 %v2399_v60, %v2398_v59  ;;  %v9839_v37 = vmov 0.0|0.0   ;;  %v2666_v59 = vld [vmem:[%s11174_s2 + $0x40] sm:$0xff]  ;;  %v2667_v60 = vld [vmem:[%s11174_s2 + $0x48] sm:$0xff] }
 0x715   :  { %9354 = vmatprep.subr.bf16.mxu1 %v9839_v37 }
 0x716   :  { %8144 = vmatpush3.msk.msra.mxu0 %vm491_vm1, %v2263_v51  ;;  %9356 = vmatpush3.bf16.msra.mxu1 %v9355_v48  ;;  %v2662_v51 = vld [vmem:[%s11174_s2 + $0x20] sm:$0xff] }
 0x717   :  { %9323 = vmatprep.subr.bf16.mxu0 %v9322_v50  ;;  %8146 = vmatmul.mubr.msk.f32.vlgmr.msra.gmra.mrb[4].mxu0 %vm487_vm2, %v6809_v52  ;;  %v9358_v50 = vpack.c.bf16 %v2661_v49, %v2660_v47  ;;  %v2663_v52 = vld [vmem:[%s11174_s2 + $0x28] sm:$0xff]  ;;  %v6830_v47 = vld [vmem:[%s11174_s2 + $0xf8] sm:$0xff]  ;;  %v6857_v49 = vld [vmem:[%s11174_s2 + $0x180] sm:$0xff] }
 0x718   :  { %9325 = vmatpush3.bf16.msra.mxu0 %v9324_v55  ;;  %2544 = vmatprep.mubr.f32.mxu0 %v9953_v23  ;;  %v2387_v23 = vld [vmem:[#allocation2 + $0x1148] sm:$0xff]  ;;  %v9361_v55 = vpack.c.bf16 %v2663_v52, %v2662_v51  ;;  %v9400_v48 = vpack.c.bf16 %v6830_v47, %v6829_v46  ;;  %v6859_v52 = vld [vmem:[%s11174_s2 + $0x190] sm:$0xff]  ;;  %v6944_v46 = vld [vmem:[%s11174_s2 + $0x3b8] sm:$0xff] }
 0x719   :  { %9327 = vmatprep.subr.bf16.mxu0 %v9326_v56  ;;  %v9340_v10 = vpack.c.bf16 %v2387_v23, %v2386_v41  ;;  %9357 = vmatprep.subr.bf16.mxu1 %v9839_v37  ;;  %v2664_v56 = vld [vmem:[%s11174_s2 + $0x30] sm:$0xff]  ;;  %v2671_v41 = vld [vmem:[%s11174_s2 + $0x68] sm:$0xff] }
 0x71a   :  { %9359 = vmatpush3.bf16.msra.mxu1 %v9358_v50  ;;  %v9364_v58 = vpack.c.bf16 %v2665_v57, %v2664_v56  ;;  %v6858_v50 = vld [vmem:[%s11174_s2 + $0x188] sm:$0xff]  ;;  %v6861_v57 = vld [vmem:[%s11174_s2 + $0x1a0] sm:$0xff] }
 0x71b   :  { %9360 = vmatprep.subr.bf16.mxu1 %v9839_v37  ;;  %v9427_v51 = vpack.c.bf16 %v6858_v50, %v6857_v49  ;;  %v6946_v49 = vld [vmem:[%s11174_s2 + $0x3c8] sm:$0xff] }
 0x71c   :  { %9329 = vmatpush3.bf16.msra.mxu0 %v9328_v61  ;;  %v9367_v61 = vpack.c.bf16 %v2667_v60, %v2666_v59  ;;  %v6863_v60 = vld [vmem:[%s11174_s2 + $0x1b0] sm:$0xff] }
 0x71d   :  { %9331 = vmatprep.subr.bf16.mxu0 %v9330_v54  ;;  %v2668_v54 = vld [vmem:[%s11174_s2 + $0x50] sm:$0xff] }
 0x71e   :  { %9362 = vmatpush3.bf16.msra.mxu1 %v9361_v55  ;;  %v9370_v62 = vpack.c.bf16 %v2669_v53, %v2668_v54  ;;  %v6860_v55 = vld [vmem:[%s11174_s2 + $0x198] sm:$0xff]  ;;  %v6865_v53 = vld [vmem:[%s11174_s2 + $0x1c0] sm:$0xff] }
 0x71f   :  { %9363 = vmatprep.subr.bf16.mxu1 %v9839_v37  ;;  %v9430_v56 = vpack.c.bf16 %v6860_v55, %v6859_v52  ;;  %v6948_v52 = vld [vmem:[%s11174_s2 + $0x3d8] sm:$0xff] }
 0x720   :  { %9333 = vmatpush3.bf16.msra.mxu0 %v9332_v17 }
 0x721   :  { %9335 = vmatprep.subr.bf16.mxu0 %v9334_v0 }
 0x722   :  { %9365 = vmatpush3.bf16.msra.mxu1 %v9364_v58  ;;  %v6862_v58 = vld [vmem:[%s11174_s2 + $0x1a8] sm:$0xff] }
 0x723   :  { %9366 = vmatprep.subr.bf16.mxu1 %v9839_v37  ;;  %v9433_v59 = vpack.c.bf16 %v6862_v58, %v6861_v57  ;;  %v6950_v57 = vld [vmem:[%s11174_s2 + $0x3e8] sm:$0xff]  ;;  %v6831_v58 = vld [vmem:[%s11177_s5 + $0x10] sm:$0xff] }
 0x724   :  { %9337 = vmatpush3.bf16.msra.mxu0 %v9336_v7 }
 0x725   :  { %9339 = vmatprep.subr.bf16.mxu0 %v9338_v16  ;;  %v2670_v16 = vld [vmem:[%s11174_s2 + $0x60] sm:$0xff] }
 0x726   :  { %9368 = vmatpush3.bf16.msra.mxu1 %v9367_v61  ;;  %v9373_v9 = vpack.c.bf16 %v2671_v41, %v2670_v16  ;;  %v6864_v61 = vld [vmem:[%s11174_s2 + $0x1b8] sm:$0xff]  ;;  %v6897_v41 = vld [vmem:[%s11174_s2 + $0x280] sm:$0xff] }
 0x727   :  { %9369 = vmatprep.subr.bf16.mxu1 %v9839_v37  ;;  %v9436_v54 = vpack.c.bf16 %v6864_v61, %v6863_v60  ;;  %v6951_v60 = vld [vmem:[%s11174_s2 + $0x3f0] sm:$0xff]  ;;  %v6952_v61 = vld [vmem:[%s11174_s2 + $0x3f8] sm:$0xff] }
 0x728   :  { %9341 = vmatpush3.bf16.msra.mxu0 %v9340_v10 }
 0x729   :  { %9343 = vmatprep.subr.bf16.mxu0 %v9342_v11  ;;  %v2672_v11 = vld [vmem:[%s11174_s2 + $0x70] sm:$0xff] }
 0x72a   :  { %9371 = vmatpush3.bf16.msra.mxu1 %v9370_v62  ;;  %v9376_v13 = vpack.c.bf16 %v2673_v12, %v2672_v11  ;;  %v6866_v62 = vld [vmem:[%s11174_s2 + $0x1c8] sm:$0xff]  ;;  %v6901_v12 = vld [vmem:[%s11174_s2 + $0x2a0] sm:$0xff] }
 0x72b   :  { %9372 = vmatprep.subr.bf16.mxu1 %v9839_v37 }
 0x72c   :  { %9345 = vmatpush3.bf16.msra.mxu0 %v9344_v14 }
 0x72d   :  { %9347 = vmatprep.subr.bf16.mxu0 %v9346_v15  ;;  %v6815_v15 = vld [vmem:[%s11174_s2 + $0x80] sm:$0xff] }
 0x72e   :  { %v7736_v31 = vpop.f32.mrb[16].mxu1  ;;  %9374 = vmatpush3.bf16.msra.mxu1 %v9373_v9  ;;  %v9379_v24 = vpack.c.bf16 %v6816_v18, %v6815_v15  ;;  %v6905_v18 = vld [vmem:[%s11174_s2 + $0x2c0] sm:$0xff] }
 0x72f   :  { %v7737_v20 = vpop.f32.mrb[17].mxu1  ;;  %9375 = vmatprep.subr.bf16.mxu1 %v9839_v37 }
 0x730   :  { %9349 = vmatpush3.bf16.msra.mxu0 %v9348_v25  ;;  %v7738_v32 = vadd.f32 %v7737_v20, %v7736_v31  ;;  %v6821_v20 = vld [vmem:[%s11174_s2 + $0xb0] sm:$0xff] }
 0x731   :  { %9351 = vmatprep.subr.bf16.mxu0 %v9350_v26  ;;  %v6817_v26 = vld [vmem:[%s11174_s2 + $0x90] sm:$0xff] }
 0x732   :  { %9377 = vmatpush3.bf16.msra.mxu1 %v9376_v13  ;;  %v9382_v28 = vpack.c.bf16 %v6818_v27, %v6817_v26  ;;  %v6908_v26 = vld [vmem:[%s11174_s2 + $0x2d8] sm:$0xff] }
 0x733   :  { %9378 = vmatprep.subr.bf16.mxu1 %v9839_v37 }
 0x734   :  { %9353 = vmatpush3.bf16.msra.mxu0 %v9352_v29  ;;  %v6819_v29 = vld [vmem:[%s11174_s2 + $0xa0] sm:$0xff] }
 0x735   :  { %8148 = vmatprep.subr.mxu0 %v9836_v8 }
 0x737   :  { %2545 = vmatmul.mubr.f32.vlgmr.msra.gmra.mrb[18].mxu0 %v9808_v30  ;;  %v6820_v30 = vld [vmem:[%s11174_s2 + $0xa8] sm:$0xff] }
 0x738   :  { %8150 = vmatprep.mubr.msk.f32.mxu0 %vm9837_vm0, %v9836_v8  ;;  %v9385_v31 = vpack.c.bf16 %v6820_v30, %v6819_v29  ;;  %v6910_v29 = vld [vmem:[%s11174_s2 + $0x2e8] sm:$0xff] }
 0x80a   :  { %v7771_v33 = vpop.f32.mrb[18].mxu0 }
 0x80b   :  { %v7772_v35 = vpop.f32.mrb[19].mxu0 }
 0x80c   :  { %v7773_v36 = vadd.f32 %v7772_v35, %v7771_v33  ;;  %v6823_v35 = vld [vmem:[%s11174_s2 + $0xc0] sm:$0xff] }
 0x80e   :  { %v2547_v38 = vadd.f32 %v7773_v36, %v7738_v32  ;;  %v6822_v32 = vld [vmem:[%s11174_s2 + $0xb8] sm:$0xff]  ;;  %v6824_v36 = vld [vmem:[%s11174_s2 + $0xc8] sm:$0xff] }
 0x80f   :  { %v9388_v33 = vpack.c.bf16 %v6822_v32, %v6821_v20  ;;  %v6912_v20 = vld [vmem:[%s11174_s2 + $0x2f8] sm:$0xff] }
 0x810   :  { %8149 = vmatpush3.msk.msra.mxu0 %vm491_vm1, %v2547_v38  ;;  %v9391_v38 = vpack.c.bf16 %v6824_v36, %v6823_v35  ;;  %v6938_v35 = vld [vmem:[%s11174_s2 + $0x388] sm:$0xff] }
 0x811   :  { %8151 = vmatmul.mubr.msk.f32.vlgmr.msra.gmra.mrb[4].mxu0 %vm487_vm2, %v6812_v39  ;;  %v6825_v39 = vld [vmem:[%s11174_s2 + $0xd0] sm:$0xff] }
 0x812   :  { %8225 = vmatprep.mubr.msk.f32.mxu0 %vm2836_vm3, %v6831_v58 }
 0x8e4   :  { %v10097_v40 = vpop.f32.mrb[4].mxu0 }
 0x8e5   :  { %2629 = vadd.xlane.f32.xlu0 %v10097_v40  ;;  %v8152_v42 = vpop.f32.mrb[5].mxu0  ;;  %v2632_v43 = vmul.f32 %v10097_v40, %v10097_v40 }
 0x8e9   :  { %2633 = vadd.xlane.f32.xlu0 %v2632_v43  ;;  %v6827_v43 = vld [vmem:[%s11174_s2 + $0xe0] sm:$0xff] }
 0x8ea   :  { %v9397_v45 = vpack.c.bf16 %v6828_v44, %v6827_v43  ;;  %v6942_v43 = vld [vmem:[%s11174_s2 + $0x3a8] sm:$0xff] }
 0x972   :  { %v2630_v63 = vpop.xlane.xlu0 %2629 }
 0x973   :  { %v2631_v34 = vmul.f32 0.0078125, %v2630_v63  ;;  %v9439_v63 = vpack.c.bf16 %v6866_v62, %v6865_v53  ;;  %v6957_v53 = vld [vmem:[%s11174_s2 + $0x400] sm:$0xff]  ;;  %v6958_v62 = vld [vmem:[%s11174_s2 + $0x408] sm:$0xff] }
 0x975   :  { %v2636_v0 = vmul.f32 %v2631_v34, %v2631_v34 }
 0x976   :  { %v2634_v17 = vpop.xlane.xlu0 %2633 }
 0x977   :  { %v2635_v1 = vmul.f32 0.0078125, %v2634_v17  ;;  %v6868_v17 = vld [vmem:[%s11174_s2 + $0x1d8] sm:$0xff] }
 0x979   :  { %v2637_v2 = vsub.f32 %v2635_v1, %v2636_v0  ;;  %v6869_v1 = vld [vmem:[%s11174_s2 + $0x1e0] sm:$0xff] }
 0x97b   :  { %v2638_v3 = vadd.f32 1e-05, %v2637_v2  ;;  %v6870_v2 = vld [vmem:[%s11174_s2 + $0x1e8] sm:$0xff] }
 0x97d   :  { %9791 = vrsqrt.f32 %v2638_v3  ;;  %v9445_v3 = vpack.c.bf16 %v6870_v2, %v6869_v1  ;;  %v6961_v1 = vld [vmem:[%s11174_s2 + $0x420] sm:$0xff]  ;;  %v6962_v2 = vld [vmem:[%s11174_s2 + $0x428] sm:$0xff] }
 0x987   :  { %v9792_v7 = vpop.eup %9791 }
 0x988   :  { %v2641_v23 = vmul.f32 %v9792_v7, %v2640_v6  ;;  %v6871_v6 = vld [vmem:[%s11174_s2 + $0x1f0] sm:$0xff]  ;;  %v6872_v7 = vld [vmem:[%s11174_s2 + $0x1f8] sm:$0xff] }
 0x989   :  { %v9448_v16 = vpack.c.bf16 %v6872_v7, %v6871_v6  ;;  %v6963_v6 = vld [vmem:[%s11174_s2 + $0x430] sm:$0xff]  ;;  %v6964_v7 = vld [vmem:[%s11174_s2 + $0x438] sm:$0xff] }
 0x98a   :  { %2647 = vperm.xlu1 %9787, %v2641_v23   ;;  %v2643_v10 = vmul.f32 %v2641_v23, %v2631_v34  ;;  %v6867_v34 = vld [vmem:[%s11174_s2 + $0x1d0] sm:$0xff]  ;;  %v6898_v23 = vld [vmem:[%s11174_s2 + $0x288] sm:$0xff] }
 0x98b   :  { %v9442_v0 = vpack.c.bf16 %v6868_v17, %v6867_v34  ;;  %v9475_v9 = vpack.c.bf16 %v6898_v23, %v6897_v41  ;;  %v6959_v34 = vld [vmem:[%s11174_s2 + $0x410] sm:$0xff]  ;;  %v6960_v17 = vld [vmem:[%s11174_s2 + $0x418] sm:$0xff]  ;;  %v6965_v41 = vld [vmem:[%s11174_s2 + $0x440] sm:$0xff] }
 0x98c   :  { %v2644_v5 = vsub.f32 %v2642_v22, %v2643_v10  ;;  %v6899_v22 = vld [vmem:[%s11174_s2 + $0x290] sm:$0xff]  ;;  %v6900_v10 = vld [vmem:[%s11174_s2 + $0x298] sm:$0xff]  ;;  %v6966_v23 = vld [vmem:[%s11174_s2 + $0x448] sm:$0xff] }
 0x98d   :  { %v9478_v11 = vpack.c.bf16 %v6900_v10, %v6899_v22  ;;  %v6967_v22 = vld [vmem:[%s11174_s2 + $0x450] sm:$0xff]  ;;  %v6968_v10 = vld [vmem:[%s11174_s2 + $0x458] sm:$0xff] }
 0x98e   :  { %2653 = vperm.xlu1 %9787, %v2644_v5   ;;  %v6902_v5 = vld [vmem:[%s11174_s2 + $0x2a8] sm:$0xff] }
 0x98f   :  { %v9481_v13 = vpack.c.bf16 %v6902_v5, %v6901_v12  ;;  %v6969_v12 = vld [vmem:[%s11174_s2 + $0x460] sm:$0xff]  ;;  %v6970_v5 = vld [vmem:[%s11174_s2 + $0x468] sm:$0xff] }
 0xa09   :  { %v2648_v4 = vpop.permute.xlu1 %2647 }
 0xa0a   :  { %v2650_v14 = vmul.f32 %v2648_v4, %v10097_v40  ;;  %v6826_v40 = vld [vmem:[%s11174_s2 + $0xd8] sm:$0xff]  ;;  %v6903_v4 = vld [vmem:[%s11174_s2 + $0x2b0] sm:$0xff] }
 0xa0b   :  { %v9394_v42 = vpack.c.bf16 %v6826_v40, %v6825_v39  ;;  %v6940_v39 = vld [vmem:[%s11174_s2 + $0x398] sm:$0xff] }
 0xa0d   :  { %v2654_v19 = vpop.permute.xlu1 %2653 }
 0xa0e   :  { %v2656_v21 = vadd.f32 %v2654_v19, %v2650_v14  ;;  %v6904_v14 = vld [vmem:[%s11174_s2 + $0x2b8] sm:$0xff]  ;;  %v6906_v19 = vld [vmem:[%s11174_s2 + $0x2c8] sm:$0xff] }
 0xa0f   :  { %v9484_v15 = vpack.c.bf16 %v6904_v14, %v6903_v4  ;;  %v6971_v4 = vld [vmem:[%s11174_s2 + $0x470] sm:$0xff]  ;;  %v6972_v14 = vld [vmem:[%s11174_s2 + $0x478] sm:$0xff] }
 0xa10   :  { %v10172_v25 = vmax.f32 %v2656_v21, 0.0  ;;  %v9487_v21 = vpack.c.bf16 %v6906_v19, %v6905_v18 }
 0xa12   :  { %8186 = vmatmul.mubr.f32.vlgmr.msra.gmra.mrb[18].mxu1 %v10172_v25 }
 0xa13   :  { %9380 = vmatpush3.bf16.msra.mxu1 %v9379_v24  ;;  %8220 = vmatprep.mubr.msk.f32.mxu1 %vm9837_vm0, %v9836_v8  ;;  %v6907_v24 = vld [vmem:[%s11174_s2 + $0x2d0] sm:$0xff] }
 0xa14   :  { %9381 = vmatprep.subr.bf16.mxu1 %v9839_v37  ;;  %v9490_v27 = vpack.c.bf16 %v6908_v26, %v6907_v24  ;;  %v6832_v24 = vld [vmem:[%s11177_s5 + $0x18] sm:$0xff] }
 0xa17   :  { %9383 = vmatpush3.bf16.msra.mxu1 %v9382_v28  ;;  %v6909_v28 = vld [vmem:[%s11174_s2 + $0x2e0] sm:$0xff] }
 0xa18   :  { %9384 = vmatprep.subr.bf16.mxu1 %v9839_v37  ;;  %v9493_v30 = vpack.c.bf16 %v6910_v29, %v6909_v28  ;;  %v6837_v28 = vld [vmem:[%s11174_s2 + $0x100] sm:$0xff]  ;;  %v6838_v29 = vld [vmem:[%s11174_s2 + $0x108] sm:$0xff] }
 0xa1b   :  { %9386 = vmatpush3.bf16.msra.mxu1 %v9385_v31  ;;  %v6911_v31 = vld [vmem:[%s11174_s2 + $0x2f0] sm:$0xff] }
 0xa1c   :  { %9387 = vmatprep.subr.bf16.mxu1 %v9839_v37  ;;  %v9496_v32 = vpack.c.bf16 %v6912_v20, %v6911_v31  ;;  %v9403_v31 = vpack.c.bf16 %v6838_v29, %v6837_v28  ;;  %v6839_v20 = vld [vmem:[%s11174_s2 + $0x110] sm:$0xff]  ;;  %v6892_v28 = vld [vmem:[%s11174_s2 + $0x278] sm:$0xff] }
 0xa1f   :  { %9389 = vmatpush3.bf16.msra.mxu1 %v9388_v33  ;;  %v6937_v33 = vld [vmem:[%s11174_s2 + $0x380] sm:$0xff] }
 0xa20   :  { %9390 = vmatprep.subr.bf16.mxu1 %v9839_v37  ;;  %v9523_v36 = vpack.c.bf16 %v6938_v35, %v6937_v33  ;;  %v6841_v35 = vld [vmem:[%s11174_s2 + $0x120] sm:$0xff] }
 0xa23   :  { %9392 = vmatpush3.bf16.msra.mxu1 %v9391_v38  ;;  %v6939_v38 = vld [vmem:[%s11174_s2 + $0x390] sm:$0xff] }
 0xa24   :  { %9393 = vmatprep.subr.bf16.mxu1 %v9839_v37  ;;  %v9526_v40 = vpack.c.bf16 %v6940_v39, %v6939_v38  ;;  %v6843_v39 = vld [vmem:[%s11174_s2 + $0x130] sm:$0xff] }
 0xa27   :  { %9395 = vmatpush3.bf16.msra.mxu1 %v9394_v42  ;;  %v6941_v42 = vld [vmem:[%s11174_s2 + $0x3a0] sm:$0xff] }
 0xa28   :  { %9396 = vmatprep.subr.bf16.mxu1 %v9839_v37  ;;  %v9529_v44 = vpack.c.bf16 %v6942_v43, %v6941_v42  ;;  %v6845_v43 = vld [vmem:[%s11174_s2 + $0x140] sm:$0xff] }
 0xa2b   :  { %9398 = vmatpush3.bf16.msra.mxu1 %v9397_v45  ;;  %v6943_v45 = vld [vmem:[%s11174_s2 + $0x3b0] sm:$0xff] }
 0xa2c   :  { %9399 = vmatprep.subr.bf16.mxu1 %v9839_v37  ;;  %v9532_v47 = vpack.c.bf16 %v6944_v46, %v6943_v45  ;;  %v6847_v46 = vld [vmem:[%s11174_s2 + $0x150] sm:$0xff] }
 0xa2f   :  { %9401 = vmatpush3.bf16.msra.mxu1 %v9400_v48  ;;  %v6945_v48 = vld [vmem:[%s11174_s2 + $0x3c0] sm:$0xff] }
 0xa30   :  { %9426 = vmatprep.subr.bf16.mxu1 %v9839_v37  ;;  %v9535_v50 = vpack.c.bf16 %v6946_v49, %v6945_v48  ;;  %v6849_v49 = vld [vmem:[%s11174_s2 + $0x160] sm:$0xff] }
 0xa32   :  { %8221 = vmatmul.mubr.f32.vlgmr.msra.gmra.mrb[20].mxu1 %v10172_v25 }
 0xa33   :  { %9428 = vmatpush3.bf16.msra.mxu1 %v9427_v51  ;;  %8305 = vmatprep.mubr.msk.f32.mxu1 %vm9837_vm0, %v9836_v8  ;;  %v6947_v51 = vld [vmem:[%s11174_s2 + $0x3d0] sm:$0xff] }
 0xa34   :  { %9429 = vmatprep.subr.bf16.mxu1 %v9839_v37  ;;  %v9538_v55 = vpack.c.bf16 %v6948_v52, %v6947_v51 }
 0xa37   :  { %9431 = vmatpush3.bf16.msra.mxu1 %v9430_v56  ;;  %v6949_v56 = vld [vmem:[%s11174_s2 + $0x3e0] sm:$0xff] }
 0xa38   :  { %9432 = vmatprep.subr.bf16.mxu1 %v9839_v37 }
 0xa3b   :  { %9434 = vmatpush3.bf16.msra.mxu1 %v9433_v59  ;;  %v9541_v59 = vpack.c.bf16 %v6950_v57, %v6949_v56  ;;  %v6851_v56 = vld [vmem:[%s11174_s2 + $0x170] sm:$0xff]  ;;  %v6852_v57 = vld [vmem:[%s11174_s2 + $0x178] sm:$0xff] }
 0xa3c   :  { %9435 = vmatprep.subr.bf16.mxu1 %v9839_v37  ;;  %v9424_v58 = vpack.c.bf16 %v6852_v57, %v6851_v56  ;;  %v6929_v57 = vld [vmem:[%s11174_s2 + $0x360] sm:$0xff] }
 0xa3f   :  { %9437 = vmatpush3.bf16.msra.mxu1 %v9436_v54  ;;  %v9544_v54 = vpack.c.bf16 %v6952_v61, %v6951_v60 }
 0xa40   :  { %9438 = vmatprep.subr.bf16.mxu1 %v9839_v37 }
 0xa43   :  { %9440 = vmatpush3.bf16.msra.mxu1 %v9439_v63  ;;  %v9547_v63 = vpack.c.bf16 %v6958_v62, %v6957_v53  ;;  %v6853_v53 = vld [vmem:[%s11177_s5 + $0x20] sm:$0xff] }
 0xa44   :  { %9441 = vmatprep.subr.bf16.mxu1 %v9839_v37 }
 0xa47   :  { %9443 = vmatpush3.bf16.msra.mxu1 %v9442_v0  ;;  %v9550_v0 = vpack.c.bf16 %v6960_v17, %v6959_v34  ;;  %v6854_v17 = vld [vmem:[%s11177_s5 + $0x28] sm:$0xff] }
 0xa48   :  { %9444 = vmatprep.subr.bf16.mxu1 %v9839_v37 }
 0xa4b   :  { %9446 = vmatpush3.bf16.msra.mxu1 %v9445_v3  ;;  %v9553_v3 = vpack.c.bf16 %v6962_v2, %v6961_v1  ;;  %v6873_v1 = vld [vmem:[%s11177_s5 + $0x30] sm:$0xff]  ;;  %v6877_v2 = vld [vmem:[%s11174_s2 + $0x200] sm:$0xff] }
 0xa4c   :  { %9447 = vmatprep.subr.bf16.mxu1 %v9839_v37 }
 0xa4f   :  { %9449 = vmatpush3.bf16.msra.mxu1 %v9448_v16  ;;  %v9556_v16 = vpack.c.bf16 %v6964_v7, %v6963_v6  ;;  %v6874_v6 = vld [vmem:[%s11177_s5 + $0x38] sm:$0xff] }
 0xa50   :  { %9474 = vmatprep.subr.bf16.mxu1 %v9839_v37 }
 0xa52   :  { %8306 = vmatmul.mubr.f32.vlgmr.msra.gmra.mrb[22].mxu1 %v10172_v25 }
 0xa53   :  { %9476 = vmatpush3.bf16.msra.mxu1 %v9475_v9  ;;  %8385 = vmatprep.mubr.msk.f32.mxu1 %vm9837_vm0, %v9836_v8  ;;  %v9559_v9 = vpack.c.bf16 %v6966_v23, %v6965_v41  ;;  %v6880_v41 = vld [vmem:[%s11174_s2 + $0x218] sm:$0xff] }
 0xa54   :  { %9477 = vmatprep.subr.bf16.mxu1 %v9839_v37 }
 0xa57   :  { %9479 = vmatpush3.bf16.msra.mxu1 %v9478_v11  ;;  %v9562_v11 = vpack.c.bf16 %v6968_v10, %v6967_v22  ;;  %v6882_v22 = vld [vmem:[%s11174_s2 + $0x228] sm:$0xff] }
 0xa58   :  { %9480 = vmatprep.subr.bf16.mxu1 %v9839_v37 }
 0xa5b   :  { %9482 = vmatpush3.bf16.msra.mxu1 %v9481_v13  ;;  %v9565_v13 = vpack.c.bf16 %v6970_v5, %v6969_v12  ;;  %v6884_v12 = vld [vmem:[%s11174_s2 + $0x238] sm:$0xff] }
 0xa5c   :  { %9483 = vmatprep.subr.bf16.mxu1 %v9839_v37 }
 0xa5f   :  { %9485 = vmatpush3.bf16.msra.mxu1 %v9484_v15  ;;  %v9568_v15 = vpack.c.bf16 %v6972_v14, %v6971_v4  ;;  %v6886_v4 = vld [vmem:[%s11174_s2 + $0x248] sm:$0xff] }
 0xa60   :  { %9486 = vmatprep.subr.bf16.mxu1 %v9839_v37 }
 0xa63   :  { %9488 = vmatpush3.bf16.msra.mxu1 %v9487_v21 }
 0xa64   :  { %9489 = vmatprep.subr.bf16.mxu1 %v9839_v37 }
 0xa67   :  { %9491 = vmatpush3.bf16.msra.mxu1 %v9490_v27  ;;  %v2744_v27 = vld [vmem:[%s11177_s5] sm:$0xff] }
 0xa68   :  { %9492 = vmatprep.subr.bf16.mxu1 %v9839_v37 }
 0xa6b   :  { %9494 = vmatpush3.bf16.msra.mxu1 %v9493_v30  ;;  %v2745_v30 = vld [vmem:[%s11177_s5 + $0x8] sm:$0xff] }
 0xa6c   :  { %9495 = vmatprep.subr.bf16.mxu1 %v9839_v37 }
 0xa6f   :  { %9497 = vmatpush3.bf16.msra.mxu1 %v9496_v32  ;;  %v6840_v32 = vld [vmem:[%s11174_s2 + $0x118] sm:$0xff] }
 0xa70   :  { %9522 = vmatprep.subr.bf16.mxu1 %v9839_v37  ;;  %v9406_v33 = vpack.c.bf16 %v6840_v32, %v6839_v20  ;;  %v6894_v20 = vld [vmem:[%s11177_s5 + $0x48] sm:$0xff] }
 0xa72   :  { %8386 = vmatmul.mubr.f32.vlgmr.msra.gmra.mrb[24].mxu1 %v10172_v25 }
 0xa73   :  { %9524 = vmatpush3.bf16.msra.mxu1 %v9523_v36  ;;  %8465 = vmatprep.mubr.msk.f32.mxu1 %vm9837_vm0, %v9836_v8  ;;  %v6842_v36 = vld [vmem:[%s11174_s2 + $0x128] sm:$0xff] }
 0xa74   :  { %9525 = vmatprep.subr.bf16.mxu1 %v9839_v37  ;;  %v9409_v38 = vpack.c.bf16 %v6842_v36, %v6841_v35  ;;  %v6917_v35 = vld [vmem:[%s11174_s2 + $0x300] sm:$0xff]  ;;  %v6918_v36 = vld [vmem:[%s11174_s2 + $0x308] sm:$0xff] }
 0xa77   :  { %9527 = vmatpush3.bf16.msra.mxu1 %v9526_v40  ;;  %v6844_v40 = vld [vmem:[%s11174_s2 + $0x138] sm:$0xff] }
 0xa78   :  { %9528 = vmatprep.subr.bf16.mxu1 %v9839_v37  ;;  %v9412_v42 = vpack.c.bf16 %v6844_v40, %v6843_v39  ;;  %v9499_v39 = vpack.c.bf16 %v6918_v36, %v6917_v35  ;;  %v6919_v40 = vld [vmem:[%s11174_s2 + $0x310] sm:$0xff]  ;;  %v6997_v35 = vld [vmem:[%s11175_s3 + $0x40] sm:$0xff] }
 0xa79   :  { %v4241_v36 = vld [vmem:[%s11182_s10] sm:$0xff] }
 0xa7b   :  { %9530 = vmatpush3.bf16.msra.mxu1 %v9529_v44  ;;  %v6846_v44 = vld [vmem:[%s11174_s2 + $0x148] sm:$0xff] }
 0xa7c   :  { %9531 = vmatprep.subr.bf16.mxu1 %v9839_v37  ;;  %v9415_v45 = vpack.c.bf16 %v6846_v44, %v6845_v43  ;;  %v6921_v44 = vld [vmem:[%s11174_s2 + $0x320] sm:$0xff] }
 0xa7f   :  { %9533 = vmatpush3.bf16.msra.mxu1 %v9532_v47  ;;  %v6848_v47 = vld [vmem:[%s11174_s2 + $0x158] sm:$0xff] }
 0xa80   :  { %9534 = vmatprep.subr.bf16.mxu1 %v9839_v37  ;;  %v9418_v48 = vpack.c.bf16 %v6848_v47, %v6847_v46  ;;  %v6923_v47 = vld [vmem:[%s11174_s2 + $0x330] sm:$0xff] }
 0xa83   :  { %9536 = vmatpush3.bf16.msra.mxu1 %v9535_v50  ;;  %v6850_v50 = vld [vmem:[%s11174_s2 + $0x168] sm:$0xff] }
 0xa84   :  { %9537 = vmatprep.subr.bf16.mxu1 %v9839_v37  ;;  %v9421_v52 = vpack.c.bf16 %v6850_v50, %v6849_v49  ;;  %v6925_v49 = vld [vmem:[%s11174_s2 + $0x340] sm:$0xff]  ;;  %v6926_v50 = vld [vmem:[%s11174_s2 + $0x348] sm:$0xff] }
 0xa87   :  { %9539 = vmatpush3.bf16.msra.mxu1 %v9538_v55 }
 0xa88   :  { %9540 = vmatprep.subr.bf16.mxu1 %v9839_v37 }
 0xa8b   :  { %9542 = vmatpush3.bf16.msra.mxu1 %v9541_v59 }
 0xa8c   :  { %9543 = vmatprep.subr.bf16.mxu1 %v9839_v37 }
 0xa8f   :  { %9545 = vmatpush3.bf16.msra.mxu1 %v9544_v54 }
 0xa90   :  { %9546 = vmatprep.subr.bf16.mxu1 %v9839_v37 }
 0xa92   :  { %8466 = vmatmul.mubr.f32.vlgmr.msra.gmra.mrb[26].mxu1 %v10172_v25 }
 0xa93   :  { %9548 = vmatpush3.bf16.msra.mxu1 %v9547_v63  ;;  %8505 = vmatprep.mubr.msk.f32.mxu1 %vm9837_vm0, %v9836_v8 }
 0xa94   :  { %9549 = vmatprep.subr.bf16.mxu1 %v9839_v37 }
 0xa97   :  { %9551 = vmatpush3.bf16.msra.mxu1 %v9550_v0 }
 0xa98   :  { %9552 = vmatprep.subr.bf16.mxu1 %v9839_v37 }
 0xa9b   :  { %9554 = vmatpush3.bf16.msra.mxu1 %v9553_v3  ;;  %v6878_v3 = vld [vmem:[%s11174_s2 + $0x208] sm:$0xff] }
 0xa9c   :  { %9555 = vmatprep.subr.bf16.mxu1 %v9839_v37  ;;  %v9451_v7 = vpack.c.bf16 %v6878_v3, %v6877_v2 }
 0xa9f   :  { %9557 = vmatpush3.bf16.msra.mxu1 %v9556_v16  ;;  %v6879_v16 = vld [vmem:[%s11174_s2 + $0x210] sm:$0xff] }
 0xaa0   :  { %9558 = vmatprep.subr.bf16.mxu1 %v9839_v37  ;;  %v9454_v23 = vpack.c.bf16 %v6880_v41, %v6879_v16 }
 0xaa3   :  { %9560 = vmatpush3.bf16.msra.mxu1 %v9559_v9  ;;  %v6881_v9 = vld [vmem:[%s11174_s2 + $0x220] sm:$0xff] }
 0xaa4   :  { %9561 = vmatprep.subr.bf16.mxu1 %v9839_v37  ;;  %v9457_v10 = vpack.c.bf16 %v6882_v22, %v6881_v9 }
 0xaa7   :  { %9563 = vmatpush3.bf16.msra.mxu1 %v9562_v11  ;;  %v6883_v11 = vld [vmem:[%s11174_s2 + $0x230] sm:$0xff] }
 0xaa8   :  { %9564 = vmatprep.subr.bf16.mxu1 %v9839_v37  ;;  %v9460_v5 = vpack.c.bf16 %v6884_v12, %v6883_v11 }
 0xaab   :  { %9566 = vmatpush3.bf16.msra.mxu1 %v9565_v13  ;;  %v6885_v13 = vld [vmem:[%s11174_s2 + $0x240] sm:$0xff] }
 0xaac   :  { %9567 = vmatprep.subr.bf16.mxu1 %v9839_v37  ;;  %v9463_v14 = vpack.c.bf16 %v6886_v4, %v6885_v13 }
 0xaaf   :  { %9569 = vmatpush3.bf16.msra.mxu1 %v9568_v15  ;;  %v6887_v15 = vld [vmem:[%s11174_s2 + $0x250] sm:$0xff] }
 0xab2   :  { %8506 = vmatmul.mubr.f32.vlgmr.msra.gmra.mrb[28].mxu1 %v10172_v25 }
 0xae5   :  { %v2740_v18 = vpop.f32.mrb[18].mxu1 }
 0xae6   :  { %v8187_v19 = vpop.f32.mrb[19].mxu1 }
 0xb05   :  { %v2829_v21 = vpop.f32.mrb[20].mxu1 }
 0xb06   :  { %v8222_v26 = vpop.f32.mrb[21].mxu1  ;;  %8223 = vmatprep.subr.mxu0 %v2829_v21 }
 0xb07   :  { %8224 = vmatpush3.msra.mxu0 %v2829_v21  ;;  %v6889_v21 = vld [vmem:[%s11174_s2 + $0x260] sm:$0xff] }
 0xb08   :  { %8226 = vmatmul.mubr.msk.f32.vlgmr.msra.gmra.mrb[20].mxu0 %vm2836_vm3, %v6832_v24  ;;  %8228 = vmatprep.subr.mxu0 %v2740_v18  ;;  %v6890_v24 = vld [vmem:[%s11174_s2 + $0x268] sm:$0xff] }
 0xb09   :  { %8229 = vmatpush3.msra.mxu0 %v2740_v18  ;;  %8230 = vmatprep.mubr.msk.f32.mxu0 %vm2836_vm3, %v2744_v27  ;;  %v6888_v18 = vld [vmem:[%s11174_s2 + $0x258] sm:$0xff]  ;;  %v9469_v26 = vpack.c.bf16 %v6890_v24, %v6889_v21  ;;  %v6891_v27 = vld [vmem:[%s11174_s2 + $0x270] sm:$0xff] }
 0xb0a   :  { %9402 = vmatprep.subr.bf16.mxu0 %v9839_v37  ;;  %v9466_v19 = vpack.c.bf16 %v6888_v18, %v6887_v15  ;;  %v9472_v29 = vpack.c.bf16 %v6892_v28, %v6891_v27 }
 0xb10   :  { %8231 = vmatmul.mubr.msk.f32.vlgmr.msra.gmra.mrb[20].mxu0 %vm2836_vm3, %v2745_v30  ;;  %v6893_v30 = vld [vmem:[%s11177_s5 + $0x40] sm:$0xff] }
 0xb11   :  { %9404 = vmatpush3.bf16.msra.mxu0 %v9403_v31  ;;  %8265 = vmatprep.mubr.msk.f32.mxu0 %vm9837_vm0, %v9836_v8 }
 0xb12   :  { %9405 = vmatprep.subr.bf16.mxu0 %v9839_v37 }
 0xb15   :  { %9407 = vmatpush3.bf16.msra.mxu0 %v9406_v33  ;;  %v6913_v33 = vld [vmem:[%s11177_s5 + $0x50] sm:$0xff] }
 0xb16   :  { %9408 = vmatprep.subr.bf16.mxu0 %v9839_v37 }
 0xb19   :  { %9410 = vmatpush3.bf16.msra.mxu0 %v9409_v38  ;;  %v6914_v38 = vld [vmem:[%s11177_s5 + $0x58] sm:$0xff] }
 0xb1a   :  { %9411 = vmatprep.subr.bf16.mxu0 %v9839_v37 }
 0xb1d   :  { %9413 = vmatpush3.bf16.msra.mxu0 %v9412_v42  ;;  %v6920_v42 = vld [vmem:[%s11174_s2 + $0x318] sm:$0xff] }
 0xb1e   :  { %9414 = vmatprep.subr.bf16.mxu0 %v9839_v37  ;;  %v9502_v43 = vpack.c.bf16 %v6920_v42, %v6919_v40  ;;  %v6998_v40 = vld [vmem:[%s11175_s3 + $0x48] sm:$0xff] }
 0xb21   :  { %9416 = vmatpush3.bf16.msra.mxu0 %v9415_v45  ;;  %v6922_v45 = vld [vmem:[%s11174_s2 + $0x328] sm:$0xff] }
 0xb22   :  { %9417 = vmatprep.subr.bf16.mxu0 %v9839_v37  ;;  %v9505_v46 = vpack.c.bf16 %v6922_v45, %v6921_v44 }
 0xb25   :  { %9419 = vmatpush3.bf16.msra.mxu0 %v9418_v48  ;;  %v3255_v51 = vpop.f32.mrb[22].mxu1 }
 0xb26   :  { %v8307_v55 = vpop.f32.mrb[23].mxu1  ;;  %9420 = vmatprep.subr.bf16.mxu0 %v9839_v37 }
 0xb27   :  { %v6928_v55 = vld [vmem:[%s11174_s2 + $0x358] sm:$0xff] }
 0xb29   :  { %9422 = vmatpush3.bf16.msra.mxu0 %v9421_v52  ;;  %v6927_v52 = vld [vmem:[%s11174_s2 + $0x350] sm:$0xff] }
 0xb2a   :  { %9423 = vmatprep.subr.bf16.mxu0 %v9839_v37  ;;  %v9514_v56 = vpack.c.bf16 %v6928_v55, %v6927_v52  ;;  %v6980_v52 = vld [vmem:[%s11175_s3 + $0x28] sm:$0xff]  ;;  %v7011_v55 = vld [vmem:[%s11175_s3 + $0x60] sm:$0xff] }
 0xb2d   :  { %9425 = vmatpush3.bf16.msra.mxu0 %v9424_v58  ;;  %v6930_v58 = vld [vmem:[%s11174_s2 + $0x368] sm:$0xff] }
 0xb30   :  { %8266 = vmatmul.mubr.f32.vlgmr.msra.gmra.mrb[22].mxu0 %v10172_v25 }
 0xb31   :  { %8270 = vmatprep.mubr.msk.f32.mxu0 %vm2836_vm3, %v6853_v53 }
 0xb45   :  { %v10538_v59 = vpop.f32.mrb[24].mxu1 }
 0xb46   :  { %v8387_v60 = vpop.f32.mrb[25].mxu1 }
 0xb47   :  { %v6931_v60 = vld [vmem:[%s11174_s2 + $0x370] sm:$0xff] }
 0xb65   :  { %v10540_v61 = vpop.f32.mrb[26].mxu1 }
 0xb66   :  { %v8467_v54 = vpop.f32.mrb[27].mxu1 }
 0xb67   :  { %v6932_v54 = vld [vmem:[%s11174_s2 + $0x378] sm:$0xff] }
 0xb68   :  { %v9520_v53 = vpack.c.bf16 %v6932_v54, %v6931_v60 }
 0xb85   :  { %v10545_v62 = vpop.f32.mrb[28].mxu1 }
 0xb86   :  { %v8507_v63 = vpop.f32.mrb[29].mxu1 }
 0xb87   :  { %v6933_v63 = vld [vmem:[%s11177_s5 + $0x60] sm:$0xff] }
 0xc03   :  { %v3082_v34 = vpop.f32.mrb[22].mxu0 }
 0xc04   :  { %v8267_v0 = vpop.f32.mrb[23].mxu0  ;;  %8268 = vmatprep.subr.mxu0 %v3082_v34 }
 0xc05   :  { %8269 = vmatpush3.msra.mxu0 %v3082_v34 }
 0xc06   :  { %8271 = vmatmul.mubr.msk.f32.vlgmr.msra.gmra.mrb[20].mxu0 %vm2836_vm3, %v6854_v17  ;;  %8308 = vmatprep.subr.mxu0 %v3255_v51  ;;  %v6934_v17 = vld [vmem:[%s11177_s5 + $0x68] sm:$0xff] }
 0xc07   :  { %8309 = vmatpush3.msra.mxu0 %v3255_v51  ;;  %8310 = vmatprep.mubr.msk.f32.mxu0 %vm2836_vm3, %v6873_v1  ;;  %v9511_v51 = vpack.c.bf16 %v6926_v50, %v6925_v49  ;;  %v6973_v1 = vld [vmem:[%s11177_s5 + $0x80] sm:$0xff]  ;;  %v7000_v49 = vld [vmem:[%s11175_s3 + $0x58] sm:$0xff] }
 0xc08   :  { %9450 = vmatprep.subr.bf16.mxu0 %v9839_v37 }
 0xc0e   :  { %8311 = vmatmul.mubr.msk.f32.vlgmr.msra.gmra.mrb[20].mxu0 %vm2836_vm3, %v6874_v6 }
 0xc0f   :  { %9452 = vmatpush3.bf16.msra.mxu0 %v9451_v7  ;;  %8345 = vmatprep.mubr.msk.f32.mxu0 %vm9837_vm0, %v9836_v8 }
 0xc10   :  { %9453 = vmatprep.subr.bf16.mxu0 %v9839_v37 }
 0xc13   :  { %9455 = vmatpush3.bf16.msra.mxu0 %v9454_v23 }
 0xc14   :  { %9456 = vmatprep.subr.bf16.mxu0 %v9839_v37 }
 0xc17   :  { %9458 = vmatpush3.bf16.msra.mxu0 %v9457_v10 }
 0xc18   :  { %9459 = vmatprep.subr.bf16.mxu0 %v9839_v37 }
 0xc1b   :  { %9461 = vmatpush3.bf16.msra.mxu0 %v9460_v5 }
 0xc1c   :  { %9462 = vmatprep.subr.bf16.mxu0 %v9839_v37 }
 0xc1f   :  { %9464 = vmatpush3.bf16.msra.mxu0 %v9463_v14 }
 0xc20   :  { %9465 = vmatprep.subr.bf16.mxu0 %v9839_v37 }
 0xc23   :  { %9467 = vmatpush3.bf16.msra.mxu0 %v9466_v19 }
 0xc24   :  { %9468 = vmatprep.subr.bf16.mxu0 %v9839_v37 }
 0xc27   :  { %9470 = vmatpush3.bf16.msra.mxu0 %v9469_v26  ;;  %v4237_v26 = vld [vmem:[%s11181_s9] sm:$0xff] }
 0xc28   :  { %9471 = vmatprep.subr.bf16.mxu0 %v9839_v37 }
 0xc2b   :  { %9473 = vmatpush3.bf16.msra.mxu0 %v9472_v29  ;;  %v4238_v29 = vld [vmem:[%s11181_s9 + $0x8] sm:$0xff] }
 0xc2e   :  { %8346 = vmatmul.mubr.f32.vlgmr.msra.gmra.mrb[24].mxu0 %v10172_v25 }
 0xc2f   :  { %8350 = vmatprep.mubr.msk.f32.mxu0 %vm2836_vm3, %v6893_v30 }
 0xd01   :  { %v3428_v31 = vpop.f32.mrb[24].mxu0 }
 0xd02   :  { %v8347_v32 = vpop.f32.mrb[25].mxu0  ;;  %8348 = vmatprep.subr.mxu0 %v3428_v31 }
 0xd03   :  { %8349 = vmatpush3.msra.mxu0 %v3428_v31  ;;  %v4273_v32 = vld [vmem:[%s11175_s3] sm:$0xff] }
 0xd04   :  { %8351 = vmatmul.mubr.msk.f32.vlgmr.msra.gmra.mrb[20].mxu0 %vm2836_vm3, %v6894_v20  ;;  %8388 = vmatprep.subr.mxu0 %v10538_v59 }
 0xd05   :  { %8389 = vmatpush3.msra.mxu0 %v10538_v59  ;;  %8390 = vmatprep.mubr.msk.f32.mxu0 %vm2836_vm3, %v6913_v33  ;;  %v9517_v59 = vpack.c.bf16 %v6930_v58, %v6929_v57  ;;  %v4274_v33 = vld [vmem:[%s11175_s3 + $0x8] sm:$0xff] }
 0xd06   :  { %9498 = vmatprep.subr.bf16.mxu0 %v9839_v37  ;;  %v7012_v57 = vld [vmem:[%s11175_s3 + $0x68] sm:$0xff] }
 0xd07   :  { %v9606_v58 = vpack.c.bf16 %v7012_v57, %v7011_v55  ;;  %v6987_v55 = vld [vmem:[%s11178_s6 + $0x30] sm:$0xff] }
 0xd0c   :  { %8391 = vmatmul.mubr.msk.f32.vlgmr.msra.gmra.mrb[20].mxu0 %vm2836_vm3, %v6914_v38  ;;  %v4242_v38 = vld [vmem:[%s11182_s10 + $0x8] sm:$0xff] }
 0xd0d   :  { %9500 = vmatpush3.bf16.msra.mxu0 %v9499_v39  ;;  %8425 = vmatprep.mubr.msk.f32.mxu0 %vm9837_vm0, %v9836_v8  ;;  %v6924_v8 = vld [vmem:[%s11174_s2 + $0x338] sm:$0xff]  ;;  %v9570_v39 = vpack.c.bf16 %v4274_v33, %v4273_v32  ;;  %v7082_v32 = vld [vmem:[%s11175_s3 + $0x108] sm:$0xff] }
 0xd0e   :  { %9501 = vmatprep.subr.bf16.mxu0 %v9839_v37  ;;  %v9508_v48 = vpack.c.bf16 %v6924_v8, %v6923_v47  ;;  %v4276_v47 = vld [vmem:[%s11175_s3 + $0x18] sm:$0xff]  ;;  %v6999_v8 = vld [vmem:[%s11175_s3 + $0x50] sm:$0xff] }
 0xd0f   :  { %v9598_v50 = vpack.c.bf16 %v7000_v49, %v6999_v8 }
 0xd11   :  { %9503 = vmatpush3.bf16.msra.mxu0 %v9502_v43  ;;  %v9594_v43 = vpack.c.bf16 %v6998_v40, %v6997_v35  ;;  %v7083_v35 = vld [vmem:[%s11175_s3 + $0x110] sm:$0xff] }
 0xd12   :  { %9504 = vmatprep.subr.bf16.mxu0 %v9839_v37 }
 0xd13   :  { %9595 = vmatprep.subr.bf16.mxu1 %v9594_v43 }
 0xd14   :  { %9597 = vmatpush3.bf16.msra.mxu1 %v9594_v43 }
 0xd15   :  { %9506 = vmatpush3.bf16.msra.mxu0 %v9505_v46  ;;  %v4275_v46 = vld [vmem:[%s11175_s3 + $0x10] sm:$0xff]  ;;  %9599 = vmatprep.subr.bf16.mxu1 %v9598_v50 }
 0xd16   :  { %9507 = vmatprep.subr.bf16.mxu0 %v9839_v37 }
 0xd18   :  { %9601 = vmatpush3.bf16.msra.mxu1 %v9598_v50 }
 0xd19   :  { %9509 = vmatpush3.bf16.msra.mxu0 %v9508_v48  ;;  %v9574_v48 = vpack.c.bf16 %v4276_v47, %v4275_v46  ;;  %9607 = vmatprep.subr.bf16.mxu1 %v9606_v58 }
 0xd1a   :  { %9510 = vmatprep.subr.bf16.mxu0 %v9839_v37 }
 0xd1d   :  { %9512 = vmatpush3.bf16.msra.mxu0 %v9511_v51  ;;  %v6979_v51 = vld [vmem:[%s11175_s3 + $0x20] sm:$0xff] }
 0xd1e   :  { %9513 = vmatprep.subr.bf16.mxu0 %v9839_v37 }
 0xd21   :  { %9515 = vmatpush3.bf16.msra.mxu0 %v9514_v56  ;;  %v9578_v56 = vpack.c.bf16 %v6980_v52, %v6979_v51  ;;  %v6986_v52 = vld [vmem:[%s11178_s6 + $0x28] sm:$0xff] }
 0xd22   :  { %9516 = vmatprep.subr.bf16.mxu0 %v9839_v37 }
 0xd25   :  { %9518 = vmatpush3.bf16.msra.mxu0 %v9517_v59 }
 0xd26   :  { %9519 = vmatprep.subr.bf16.mxu0 %v9839_v37  ;;  %v6953_v37 = vld [vmem:[%s11177_s5 + $0x70] sm:$0xff] }
 0xd29   :  { %9521 = vmatpush3.bf16.msra.mxu0 %v9520_v53 }
 0xd2c   :  { %8426 = vmatmul.mubr.f32.vlgmr.msra.gmra.mrb[26].mxu0 %v10172_v25  ;;  %v6954_v25 = vld [vmem:[%s11177_s5 + $0x78] sm:$0xff] }
 0xd2d   :  { %8430 = vmatprep.mubr.msk.f32.mxu0 %vm2836_vm3, %v6933_v63 }
 0xdff   :  { %v3774_v34 = vpop.f32.mrb[26].mxu0 }
 0xe00   :  { %v8427_v0 = vpop.f32.mrb[27].mxu0  ;;  %8428 = vmatprep.subr.mxu0 %v3774_v34 }
 0xe01   :  { %8429 = vmatpush3.msra.mxu0 %v3774_v34 }
 0xe02   :  { %8431 = vmatmul.mubr.msk.f32.vlgmr.msra.gmra.mrb[20].mxu0 %vm2836_vm3, %v6934_v17  ;;  %8468 = vmatprep.subr.mxu0 %v10540_v61 }
 0xe03   :  { %8469 = vmatpush3.msra.mxu0 %v10540_v61  ;;  %8470 = vmatprep.mubr.msk.f32.mxu0 %vm2836_vm3, %v6953_v37  ;;  %v6974_v61 = vld [vmem:[%s11177_s5 + $0x88] sm:$0xff]  ;;  %v6981_v37 = vld [vmem:[%s11175_s3 + $0x30] sm:$0xff] }
 0xe04   :  { %8508 = vmatprep.subr.mxu0 %v10545_v62 }
 0xe0a   :  { %8471 = vmatmul.mubr.msk.f32.vlgmr.msra.gmra.mrb[20].mxu0 %vm2836_vm3, %v6954_v25  ;;  %v6982_v25 = vld [vmem:[%s11175_s3 + $0x38] sm:$0xff] }
 0xe0b   :  { %8509 = vmatpush3.msra.mxu0 %v10545_v62  ;;  %8510 = vmatprep.mubr.msk.f32.mxu0 %vm2836_vm3, %v6973_v1  ;;  %v7013_v1 = vld [vmem:[%s11175_s3 + $0x70] sm:$0xff] }
 0xe0c   :  { %9571 = vmatprep.subr.bf16.mxu0 %v9570_v39 }
 0xe12   :  { %8511 = vmatmul.mubr.msk.f32.vlgmr.msra.gmra.mrb[20].mxu0 %vm2836_vm3, %v6974_v61  ;;  %v7014_v61 = vld [vmem:[%s11175_s3 + $0x78] sm:$0xff] }
 0xe13   :  { %9573 = vmatpush3.bf16.msra.mxu0 %v9570_v39  ;;  %v6985_v39 = vld [vmem:[%s11178_s6 + $0x20] sm:$0xff] }
 0xe14   :  { %9575 = vmatprep.subr.bf16.mxu0 %v9574_v48 }
 0xe17   :  { %9577 = vmatpush3.bf16.msra.mxu0 %v9574_v48 }
 0xe18   :  { %9579 = vmatprep.subr.bf16.mxu0 %v9578_v56 }
 0xee5   :  { %v10724_v2 = vpop.f32.mrb[20].mxu0 }
 0xee6   :  { %v10726_v3 = vpop.f32.mrb[21].mxu0  ;;  %v4214_v6 = vsel %vm4210_vm4, %v10724_v2, 0.0  ;;  %v4220_v41 = vmul.f32 %v10724_v2, %v10724_v2 }
 0xee7   :  { %4215 = vadd.xlane.f32.xlu1 %v4214_v6  ;;  %v4211_v62 = vsel %vm4210_vm4, %v10726_v3, 0.0  ;;  %v4219_v7 = vmul.f32 %v10726_v3, %v10726_v3  ;;  %v9582_v6 = vpack.c.bf16 %v6982_v25, %v6981_v37  ;;  %v7003_v37 = vld [vmem:[%s11178_s6 + $0x40] sm:$0xff]  ;;  %v7004_v25 = vld [vmem:[%s11178_s6 + $0x48] sm:$0xff] }
 0xee8   :  { %4212 = vadd.xlane.f32.xlu0 %v4211_v62  ;;  %v4224_v23 = vsel %vm4210_vm4, %v4220_v41, 0.0  ;;  %v9610_v62 = vpack.c.bf16 %v7014_v61, %v7013_v1  ;;  %v7005_v1 = vld [vmem:[%s11178_s6 + $0x50] sm:$0xff] }
 0xee9   :  { %v4221_v16 = vsel %vm4210_vm4, %v4219_v7, 0.0  ;;  %v7025_v7 = vld [vmem:[%s11175_s3 + $0x80] sm:$0xff] }
 0xeec   :  { %4222 = vadd.xlane.f32.xlu0 %v4221_v16  ;;  %v7026_v16 = vld [vmem:[%s11175_s3 + $0x88] sm:$0xff] }
 0xeed   :  { %v9618_v41 = vpack.c.bf16 %v7026_v16, %v7025_v7  ;;  %v7018_v7 = vld [vmem:[%s11178_s6 + $0x68] sm:$0xff]  ;;  %v7019_v16 = vld [vmem:[%s11178_s6 + $0x70] sm:$0xff] }
 0xef0   :  { %4225 = vadd.xlane.f32.xlu0 %v4224_v23  ;;  %v7027_v23 = vld [vmem:[%s11175_s3 + $0x90] sm:$0xff] }
 0xf74   :  { %v4216_v10 = vpop.xlane.xlu1 %4215 }
 0xf75   :  { %v4213_v9 = vpop.xlane.xlu0 %4212  ;;  %v4218_v12 = vmul.f32 0.03125, %v4216_v10  ;;  %v7039_v10 = vld [vmem:[%s11175_s3 + $0xa0] sm:$0xff] }
 0xf76   :  { %v4217_v22 = vmul.f32 0.03125, %v4213_v9  ;;  %v7028_v9 = vld [vmem:[%s11175_s3 + $0x98] sm:$0xff] }
 0xf77   :  { %v4230_v15 = vmul.f32 %v4218_v12, %v4218_v12 }
 0xf78   :  { %v4229_v5 = vmul.f32 %v4217_v22, %v4217_v22 }
 0xf79   :  { %v4223_v11 = vpop.xlane.xlu0 %4222 }
 0xf7a   :  { %v4227_v13 = vmul.f32 0.03125, %v4223_v11  ;;  %v7040_v11 = vld [vmem:[%s11175_s3 + $0xa8] sm:$0xff] }
 0xf7c   :  { %v4231_v4 = vsub.f32 %v4227_v13, %v4229_v5  ;;  %v7041_v5 = vld [vmem:[%s11175_s3 + $0xb0] sm:$0xff]  ;;  %v7042_v13 = vld [vmem:[%s11175_s3 + $0xb8] sm:$0xff] }
 0xf7d   :  { %v4226_v14 = vpop.xlane.xlu0 %4225 }
 0xf7e   :  { %v4233_v18 = vadd.f32 1e-05, %v4231_v4  ;;  %v4228_v19 = vmul.f32 0.03125, %v4226_v14  ;;  %v9634_v4 = vpack.c.bf16 %v7042_v13, %v7041_v5  ;;  %v7053_v14 = vld [vmem:[%s11175_s3 + $0xc0] sm:$0xff] }
 0xf80   :  { %9793 = vrsqrt.f32 %v4233_v18  ;;  %v4232_v21 = vsub.f32 %v4228_v19, %v4230_v15  ;;  %v7054_v15 = vld [vmem:[%s11175_s3 + $0xc8] sm:$0xff]  ;;  %v7055_v19 = vld [vmem:[%s11175_s3 + $0xd0] sm:$0xff] }
 0xf81   :  { %v9642_v18 = vpack.c.bf16 %v7054_v15, %v7053_v14  ;;  %v7045_v15 = vld [vmem:[%s11178_s6 + $0xa0] sm:$0xff] }
 0xf82   :  { %v4234_v24 = vadd.f32 1e-05, %v4232_v21  ;;  %v7056_v21 = vld [vmem:[%s11175_s3 + $0xd8] sm:$0xff] }
 0xf84   :  { %9795 = vrsqrt.f32 %v4234_v24  ;;  %v9646_v24 = vpack.c.bf16 %v7056_v21, %v7055_v19  ;;  %v7047_v19 = vld [vmem:[%s11178_s6 + $0xb0] sm:$0xff]  ;;  %v7048_v21 = vld [vmem:[%s11178_s6 + $0xb8] sm:$0xff] }
 0xf8a   :  { %v9794_v27 = vpop.eup %9793 }
 0xf8b   :  { %v4239_v28 = vmul.f32 %v9794_v27, %v4237_v26  ;;  %v7067_v26 = vld [vmem:[%s11175_s3 + $0xe0] sm:$0xff]  ;;  %v7068_v27 = vld [vmem:[%s11175_s3 + $0xe8] sm:$0xff] }
 0xf8d   :  { %4249 = vperm.xlu0 %9788, %v4239_v28   ;;  %v4243_v20 = vmul.f32 %v4239_v28, %v4217_v22  ;;  %v9622_v22 = vpack.c.bf16 %v7028_v9, %v7027_v23  ;;  %v9654_v28 = vpack.c.bf16 %v7068_v27, %v7067_v26  ;;  %v7020_v9 = vld [vmem:[%s11178_s6 + $0x78] sm:$0xff]  ;;  %v7060_v26 = vld [vmem:[%s11178_s6 + $0xc8] sm:$0xff]  ;;  %v7061_v27 = vld [vmem:[%s11178_s6 + $0xd0] sm:$0xff] }
 0xf8e   :  { %v9796_v30 = vpop.eup %9795 }
 0xf8f   :  { %v4240_v31 = vmul.f32 %v9796_v30, %v4238_v29  ;;  %v4245_v44 = vsub.f32 %v4241_v36, %v4243_v20  ;;  %v7069_v29 = vld [vmem:[%s11175_s3 + $0xf0] sm:$0xff]  ;;  %v7070_v30 = vld [vmem:[%s11175_s3 + $0xf8] sm:$0xff]  ;;  %v7081_v20 = vld [vmem:[%s11175_s3 + $0x100] sm:$0xff] }
 0xf90   :  { %v9666_v33 = vpack.c.bf16 %v7082_v32, %v7081_v20  ;;  %v7084_v36 = vld [vmem:[%s11175_s3 + $0x118] sm:$0xff]  ;;  %v7087_v32 = vld [vmem:[%s11178_s6 + $0x100] sm:$0xff] }
 0xf91   :  { %4254 = vperm.xlu1 %9787, %v4240_v31   ;;  %v4244_v42 = vmul.f32 %v4240_v31, %v4218_v12  ;;  %v9630_v12 = vpack.c.bf16 %v7040_v11, %v7039_v10  ;;  %v9658_v31 = vpack.c.bf16 %v7070_v30, %v7069_v29  ;;  %v7031_v10 = vld [vmem:[%s11178_s6 + $0x80] sm:$0xff]  ;;  %v7032_v11 = vld [vmem:[%s11178_s6 + $0x88] sm:$0xff]  ;;  %v7076_v20 = vld [vmem:[%s11178_s6 + $0xf8] sm:$0xff] }
 0xf92   :  { %v7073_v29 = vld [vmem:[%s11178_s6 + $0xe0] sm:$0xff]  ;;  %v7074_v30 = vld [vmem:[%s11178_s6 + $0xe8] sm:$0xff] }
 0xf93   :  { %v4246_v45 = vsub.f32 %v4242_v38, %v4244_v42  ;;  %v9670_v38 = vpack.c.bf16 %v7084_v36, %v7083_v35  ;;  %v7089_v35 = vld [vmem:[%s11178_s6 + $0x110] sm:$0xff]  ;;  %v7090_v36 = vld [vmem:[%s11178_s6 + $0x118] sm:$0xff] }
 0xf95   :  { %4261 = vperm.xlu1 %9787, %v4245_v44   ;;  %4266 = vperm.xlu0 %9788, %v4246_v45  }
0x100c   :  { %v4250_v59 = vpop.permute.xlu0 %4249 }
0x100d   :  { %v4257_v54 = vmul.f32 %v4250_v59, %v10726_v3 }
0x1010   :  { %v4255_v60 = vpop.permute.xlu1 %4254 }
0x1011   :  { %v4258_v53 = vmul.f32 %v10724_v2, %v4255_v60  ;;  %v4358_v60 = vld [vmem:[%s11178_s6] sm:$0xff] }
0x1014   :  { %v4262_v63 = vpop.permute.xlu1 %4261  ;;  %v4267_v34 = vpop.permute.xlu0 %4266 }
0x1015   :  { %v4269_v17 = vadd.f32 %v4262_v63, %v4257_v54  ;;  %v4270_v0 = vadd.f32 %v4267_v34, %v4258_v53  ;;  %v4359_v54 = vld [vmem:[%s11178_s6 + $0x8] sm:$0xff]  ;;  %v4360_v53 = vld [vmem:[%s11178_s6 + $0x10] sm:$0xff] }
0x1017   :  { %v10800_v2 = vmax.f32 %v4269_v17, 0.0  ;;  %v10802_v3 = vmax.f32 %v4270_v0, 0.0  ;;  %v4361_v17 = vld [vmem:[%s11178_s6 + $0x18] sm:$0xff] }
0x1019   :  { %8521 = vmatprep.mubr.msk.f32.mxu0 %vm4210_vm4, %v10800_v2  ;;  %8563 = vmatprep.mubr.msk.f32.mxu1 %vm4210_vm4, %v10800_v2 }
0x101a   :  { %8522 = vmatmul.mubr.msk.f32.vlgmr.msra.gmra.mrb[28].mxu0 %vm4210_vm4, %v10802_v3  ;;  %8564 = vmatmul.mubr.msk.f32.vlgmr.msra.gmra.mrb[30].mxu1 %vm4210_vm4, %v10802_v3 }
0x101b   :  { %9581 = vmatpush3.bf16.msra.mxu0 %v9578_v56  ;;  %9609 = vmatpush3.bf16.msra.mxu1 %v9606_v58  ;;  %v6988_v58 = vld [vmem:[%s11178_s6 + $0x38] sm:$0xff] }
0x101c   :  { %8532 = vmatprep.mubr.msk.f32.mxu0 %vm4210_vm4, %v10800_v2  ;;  %8584 = vmatprep.mubr.msk.f32.mxu1 %vm4210_vm4, %v10800_v2 }
0x101d   :  { %9583 = vmatprep.subr.bf16.mxu0 %v9582_v6  ;;  %9611 = vmatprep.subr.bf16.mxu1 %v9610_v62 }
0x101f   :  { %9585 = vmatpush3.bf16.msra.mxu0 %v9582_v6  ;;  %9613 = vmatpush3.bf16.msra.mxu1 %v9610_v62  ;;  %v7017_v62 = vld [vmem:[%s11178_s6 + $0x60] sm:$0xff] }
0x1020   :  { %9619 = vmatprep.subr.bf16.mxu1 %v9618_v41 }
0x1022   :  { %8533 = vmatmul.mubr.msk.f32.vlgmr.msra.gmra.mrb[30].mxu0 %vm4210_vm4, %v10802_v3  ;;  %8585 = vmatmul.mubr.msk.f32.vlgmr.msra.gmra.mrb[32].mxu1 %vm4210_vm4, %v10802_v3 }
0x1023   :  { %9621 = vmatpush3.bf16.msra.mxu1 %v9618_v41  ;;  %8605 = vmatprep.mubr.msk.f32.mxu1 %vm4210_vm4, %v10800_v2 }
0x1024   :  { %9623 = vmatprep.subr.bf16.mxu1 %v9622_v22  ;;  %8539 = vmatprep.mubr.msk.f32.mxu0 %vm4447_vm5, %v6985_v39 }
0x1027   :  { %9625 = vmatpush3.bf16.msra.mxu1 %v9622_v22 }
0x1028   :  { %9631 = vmatprep.subr.bf16.mxu1 %v9630_v12 }
0x102a   :  { %8606 = vmatmul.mubr.msk.f32.vlgmr.msra.gmra.mrb[34].mxu1 %vm4210_vm4, %v10802_v3 }
0x102b   :  { %9633 = vmatpush3.bf16.msra.mxu1 %v9630_v12  ;;  %8626 = vmatprep.mubr.msk.f32.mxu1 %vm4210_vm4, %v10800_v2  ;;  %v7033_v12 = vld [vmem:[%s11178_s6 + $0x90] sm:$0xff] }
0x102c   :  { %9635 = vmatprep.subr.bf16.mxu1 %v9634_v4 }
0x102f   :  { %9637 = vmatpush3.bf16.msra.mxu1 %v9634_v4  ;;  %v7034_v4 = vld [vmem:[%s11178_s6 + $0x98] sm:$0xff] }
0x1030   :  { %9643 = vmatprep.subr.bf16.mxu1 %v9642_v18 }
0x1032   :  { %8627 = vmatmul.mubr.msk.f32.vlgmr.msra.gmra.mrb[36].mxu1 %vm4210_vm4, %v10802_v3 }
0x1033   :  { %9645 = vmatpush3.bf16.msra.mxu1 %v9642_v18  ;;  %8647 = vmatprep.mubr.msk.f32.mxu1 %vm4210_vm4, %v10800_v2  ;;  %v7046_v18 = vld [vmem:[%s11178_s6 + $0xa8] sm:$0xff] }
0x1034   :  { %9647 = vmatprep.subr.bf16.mxu1 %v9646_v24 }
0x1037   :  { %9649 = vmatpush3.bf16.msra.mxu1 %v9646_v24  ;;  %v7059_v24 = vld [vmem:[%s11178_s6 + $0xc0] sm:$0xff] }
0x1038   :  { %9655 = vmatprep.subr.bf16.mxu1 %v9654_v28 }
0x103a   :  { %8648 = vmatmul.mubr.msk.f32.vlgmr.msra.gmra.mrb[38].mxu1 %vm4210_vm4, %v10802_v3 }
0x103b   :  { %9657 = vmatpush3.bf16.msra.mxu1 %v9654_v28  ;;  %8668 = vmatprep.mubr.msk.f32.mxu1 %vm4210_vm4, %v10800_v2  ;;  %v7062_v28 = vld [vmem:[%s11178_s6 + $0xd8] sm:$0xff] }
0x103c   :  { %9659 = vmatprep.subr.bf16.mxu1 %v9658_v31 }
0x103f   :  { %9661 = vmatpush3.bf16.msra.mxu1 %v9658_v31  ;;  %v7075_v31 = vld [vmem:[%s11178_s6 + $0xf0] sm:$0xff] }
0x1040   :  { %9667 = vmatprep.subr.bf16.mxu1 %v9666_v33 }
0x1042   :  { %8669 = vmatmul.mubr.msk.f32.vlgmr.msra.gmra.mrb[40].mxu1 %vm4210_vm4, %v10802_v3 }
0x1043   :  { %9669 = vmatpush3.bf16.msra.mxu1 %v9666_v33  ;;  %8689 = vmatprep.mubr.msk.f32.mxu1 %vm4210_vm4, %v10800_v2  ;;  %v7088_v33 = vld [vmem:[%s11178_s6 + $0x108] sm:$0xff] }
0x1044   :  { %9671 = vmatprep.subr.bf16.mxu1 %v9670_v38 }
0x1047   :  { %9673 = vmatpush3.bf16.msra.mxu1 %v9670_v38 }
0x104a   :  { %8690 = vmatmul.mubr.msk.f32.vlgmr.msra.gmra.mrb[42].mxu1 %vm4210_vm4, %v10802_v3  ;;  %v7006_v3 = vld [vmem:[%s11178_s6 + $0x58] sm:$0xff] }
0x10ed   :  { %v8523_v40 = vpop.f32.mrb[28].mxu0  ;;  %v8565_v42 = vpop.f32.mrb[30].mxu1 }
0x10ee   :  { %v4349_v43 = vpop.f32.mrb[29].mxu0  ;;  %v4713_v44 = vpop.f32.mrb[31].mxu1 }
0x10ef   :  { %v9590_v45 = vpack.c.bf16 %v8523_v40, %v4349_v43  ;;  %v9602_v46 = vpack.c.bf16 %v8565_v42, %v4713_v44 }
0x10f5   :  { %v8534_v47 = vpop.f32.mrb[30].mxu0  ;;  %v8586_v8 = vpop.f32.mrb[32].mxu1 }
0x10f6   :  { %v4433_v48 = vpop.f32.mrb[31].mxu0  ;;  %v4899_v49 = vpop.f32.mrb[33].mxu1 }
0x10f7   :  { %v9586_v50 = vpack.c.bf16 %v8534_v47, %v4433_v48  ;;  %v9614_v51 = vpack.c.bf16 %v8586_v8, %v4899_v49 }
0x10f9   :  { %9587 = vmatprep.subr.bf16.mxu0 %v9586_v50 }
0x10fa   :  { %9589 = vmatpush3.bf16.msra.mxu0 %v9586_v50 }
0x10fb   :  { %9591 = vmatprep.subr.bf16.mxu0 %v9590_v45 }
0x10fd   :  { %8540 = vmatmul.mubr.msk.f32.vlgmr.msra.gmra.mrb[32].mxu0 %vm4447_vm5, %v6986_v52  ;;  %v8607_v56 = vpop.f32.mrb[34].mxu1 }
0x10fe   :  { %9593 = vmatpush3.bf16.msra.mxu0 %v9590_v45  ;;  %v5085_v57 = vpop.f32.mrb[35].mxu1  ;;  %8542 = vmatprep.mubr.msk.f32.mxu0 %vm4447_vm5, %v6987_v55 }
0x10ff   :  { %v9626_v59 = vpack.c.bf16 %v8607_v56, %v5085_v57  ;;  %9603 = vmatprep.subr.bf16.mxu0 %v9602_v46 }
0x1101   :  { %8543 = vmatmul.mubr.msk.f32.gmra.mrb[34].mxu0 %vm4447_vm5, %v6988_v58 }
0x1102   :  { %8549 = vmatprep.mubr.msk.f32.mxu0 %vm4447_vm5, %v4358_v60 }
0x1105   :  { %8550 = vmatmul.mubr.msk.f32.vlgmr.msra.gmra.mrb[32].mxu0 %vm4447_vm5, %v4359_v54  ;;  %v8628_v63 = vpop.f32.mrb[36].mxu1 }
0x1106   :  { %9605 = vmatpush3.bf16.msra.mxu0 %v9602_v46  ;;  %v5271_v34 = vpop.f32.mrb[37].mxu1  ;;  %8552 = vmatprep.mubr.msk.f32.mxu0 %vm4447_vm5, %v4360_v53 }
0x1107   :  { %9615 = vmatprep.subr.bf16.mxu0 %v9614_v51  ;;  %v9638_v0 = vpack.c.bf16 %v8628_v63, %v5271_v34 }
0x1109   :  { %8553 = vmatmul.mubr.msk.f32.gmra.mrb[34].mxu0 %vm4447_vm5, %v4361_v17 }
0x110a   :  { %8570 = vmatprep.mubr.msk.f32.mxu0 %vm4447_vm5, %v7003_v37 }
0x110d   :  { %8571 = vmatmul.mubr.msk.f32.vlgmr.msra.gmra.mrb[32].mxu0 %vm4447_vm5, %v7004_v25  ;;  %v8649_v61 = vpop.f32.mrb[38].mxu1 }
0x110e   :  { %9617 = vmatpush3.bf16.msra.mxu0 %v9614_v51  ;;  %v5457_v2 = vpop.f32.mrb[39].mxu1  ;;  %8573 = vmatprep.mubr.msk.f32.mxu0 %vm4447_vm5, %v7005_v1 }
0x110f   :  { %9627 = vmatprep.subr.bf16.mxu0 %v9626_v59  ;;  %v9650_v6 = vpack.c.bf16 %v8649_v61, %v5457_v2 }
0x1111   :  { %8574 = vmatmul.mubr.msk.f32.gmra.mrb[34].mxu0 %vm4447_vm5, %v7006_v3 }
0x1112   :  { %8591 = vmatprep.mubr.msk.f32.mxu0 %vm4447_vm5, %v7017_v62 }
0x1115   :  { %8592 = vmatmul.mubr.msk.f32.vlgmr.msra.gmra.mrb[32].mxu0 %vm4447_vm5, %v7018_v7  ;;  %v8670_v41 = vpop.f32.mrb[40].mxu1 }
0x1116   :  { %9629 = vmatpush3.bf16.msra.mxu0 %v9626_v59  ;;  %v5643_v23 = vpop.f32.mrb[41].mxu1  ;;  %8594 = vmatprep.mubr.msk.f32.mxu0 %vm4447_vm5, %v7019_v16 }
0x1117   :  { %9639 = vmatprep.subr.bf16.mxu0 %v9638_v0  ;;  %v9662_v22 = vpack.c.bf16 %v8670_v41, %v5643_v23 }
0x1119   :  { %8595 = vmatmul.mubr.msk.f32.gmra.mrb[34].mxu0 %vm4447_vm5, %v7020_v9 }
0x111a   :  { %8612 = vmatprep.mubr.msk.f32.mxu0 %vm4447_vm5, %v7031_v10 }
0x111d   :  { %8613 = vmatmul.mubr.msk.f32.vlgmr.msra.gmra.mrb[32].mxu0 %vm4447_vm5, %v7032_v11  ;;  %v8691_v5 = vpop.f32.mrb[42].mxu1 }
0x111e   :  { %9641 = vmatpush3.bf16.msra.mxu0 %v9638_v0  ;;  %v5829_v13 = vpop.f32.mrb[43].mxu1  ;;  %8615 = vmatprep.mubr.msk.f32.mxu0 %vm4447_vm5, %v7033_v12 }
0x111f   :  { %9651 = vmatprep.subr.bf16.mxu0 %v9650_v6  ;;  %v9674_v14 = vpack.c.bf16 %v8691_v5, %v5829_v13  ;;  %v5996_v5 = vld [vmem:[%s11183_s11] sm:$0xff]  ;;  %v5997_v13 = vld [vmem:[%s11183_s11 + $0x8] sm:$0xff] }
0x1121   :  { %8616 = vmatmul.mubr.msk.f32.gmra.mrb[34].mxu0 %vm4447_vm5, %v7034_v4 }
0x1122   :  { %8633 = vmatprep.mubr.msk.f32.mxu0 %vm4447_vm5, %v7045_v15 }
0x1125   :  { %8634 = vmatmul.mubr.msk.f32.vlgmr.msra.gmra.mrb[32].mxu0 %vm4447_vm5, %v7046_v18 }
0x1126   :  { %9653 = vmatpush3.bf16.msra.mxu0 %v9650_v6  ;;  %8636 = vmatprep.mubr.msk.f32.mxu0 %vm4447_vm5, %v7047_v19  ;;  %v6004_v19 = vld [vmem:[%s11184_s12] sm:$0xff] }
0x1127   :  { %9663 = vmatprep.subr.bf16.mxu0 %v9662_v22 }
0x1129   :  { %8637 = vmatmul.mubr.msk.f32.gmra.mrb[34].mxu0 %vm4447_vm5, %v7048_v21 }
0x112a   :  { %8654 = vmatprep.mubr.msk.f32.mxu0 %vm4447_vm5, %v7059_v24  ;;  %v6005_v24 = vld [vmem:[%s11184_s12 + $0x8] sm:$0xff] }
0x112d   :  { %8655 = vmatmul.mubr.msk.f32.vlgmr.msra.gmra.mrb[32].mxu0 %vm4447_vm5, %v7060_v26 }
0x112e   :  { %9665 = vmatpush3.bf16.msra.mxu0 %v9662_v22  ;;  %8657 = vmatprep.mubr.msk.f32.mxu0 %vm4447_vm5, %v7061_v27 }
0x112f   :  { %9675 = vmatprep.subr.bf16.mxu0 %v9674_v14 }
0x1131   :  { %8658 = vmatmul.mubr.msk.f32.gmra.mrb[34].mxu0 %vm4447_vm5, %v7062_v28 }
0x1132   :  { %8675 = vmatprep.mubr.msk.f32.mxu0 %vm4447_vm5, %v7073_v29  ;;  %v5998_v29 = vld [vmem:[%s11183_s11 + $0x10] sm:$0xff] }
0x1135   :  { %8676 = vmatmul.mubr.msk.f32.vlgmr.msra.gmra.mrb[32].mxu0 %vm4447_vm5, %v7074_v30  ;;  %v5999_v30 = vld [vmem:[%s11183_s11 + $0x18] sm:$0xff] }
0x1136   :  { %9677 = vmatpush3.bf16.msra.mxu0 %v9674_v14  ;;  %8678 = vmatprep.mubr.msk.f32.mxu0 %vm4447_vm5, %v7075_v31 }
0x1139   :  { %8679 = vmatmul.mubr.msk.f32.gmra.mrb[34].mxu0 %vm4447_vm5, %v7076_v20 }
0x113a   :  { %8696 = vmatprep.mubr.msk.f32.mxu0 %vm4447_vm5, %v7087_v32 }
0x113d   :  { %8697 = vmatmul.mubr.msk.f32.vlgmr.msra.gmra.mrb[32].mxu0 %vm4447_vm5, %v7088_v33 }
0x113e   :  { %8699 = vmatprep.mubr.msk.f32.mxu0 %vm4447_vm5, %v7089_v35  ;;  %v6006_v35 = vld [vmem:[%s11184_s12 + $0x10] sm:$0xff] }
0x1141   :  { %8700 = vmatmul.mubr.msk.f32.gmra.mrb[34].mxu0 %vm4447_vm5, %v7090_v36  ;;  %v6068_v36 = vld [vmem:[%s11186_s14] sm:$0xff] }
0x1142   :  { %8702 = vmatprep.subr.mxu1 %v6068_v36 }
0x1143   :  { %8703 = vmatpush3.msra.mxu1 %v6068_v36 }
0x1210   :  { %v11044_v38 = vpop.f32.mrb[32].mxu0 }
0x1211   :  { %v11046_v39 = vpop.f32.mrb[33].mxu0  ;;  %v5947_v40 = vsel %vm2836_vm3, %v11044_v38, 0.0  ;;  %v5961_v44 = vmul.f32 %v11044_v38, %v11044_v38 }
0x1212   :  { %5948 = vadd.xlane.f32.xlu0 %v5947_v40  ;;  %v5944_v42 = vsel %vm2836_vm3, %v11046_v39, 0.0  ;;  %v5960_v43 = vmul.f32 %v11046_v39, %v11046_v39  ;;  %v7099_v40 = vld [vmem:[%s11186_s14 + $0x8] sm:$0xff] }
0x1213   :  { %5945 = vadd.xlane.f32.xlu1 %v5944_v42  ;;  %v5967_v8 = vsel %vm2836_vm3, %v5961_v44, 0.0  ;;  %v6007_v42 = vld [vmem:[%s11184_s12 + $0x18] sm:$0xff]  ;;  %8710 = vmatprep.subr.mxu0 %v7099_v40 }
0x1214   :  { %v11056_v45 = vpop.f32.mrb[34].mxu0  ;;  %v5964_v46 = vsel %vm2836_vm3, %v5960_v43, 0.0  ;;  %8711 = vmatpush3.msra.mxu0 %v7099_v40 }
0x1215   :  { %v11059_v47 = vpop.f32.mrb[35].mxu0  ;;  %v5953_v50 = vsel %vm2836_vm3, %v11056_v45, 0.0  ;;  %v5963_v51 = vmul.f32 %v11056_v45, %v11056_v45 }
0x1216   :  { %5965 = vadd.xlane.f32.xlu0 %v5964_v46  ;;  %v5950_v48 = vsel %vm2836_vm3, %v11059_v47, 0.0  ;;  %v5962_v49 = vmul.f32 %v11059_v47, %v11059_v47 }
0x1217   :  { %5968 = vadd.xlane.f32.xlu1 %v5967_v8  ;;  %v5973_v55 = vsel %vm2836_vm3, %v5963_v51, 0.0 }
0x1218   :  { %v5970_v52 = vsel %vm2836_vm3, %v5962_v49, 0.0  ;;  %v6766_v49 = vld [vmem:[%s11187_s15] sm:$0xff] }
0x121a   :  { %5951 = vadd.xlane.f32.xlu0 %v5950_v48  ;;  %v6767_v48 = vld [vmem:[%s11187_s15 + $0x8] sm:$0x3] }
0x121b   :  { %5954 = vadd.xlane.f32.xlu1 %v5953_v50  ;;  %v7110_v50 = vld [vmem:[%s11186_s14 + $0x10] sm:$0xff] }
0x121c   :  { %8740 = vmatprep.subr.mxu0 %v7110_v50 }
0x121e   :  { %5971 = vadd.xlane.f32.xlu0 %v5970_v52 }
0x121f   :  { %5974 = vadd.xlane.f32.xlu1 %v5973_v55 }
0x129f   :  { %v5949_v56 = vpop.xlane.xlu0 %5948 }
0x12a0   :  { %v5946_v57 = vpop.xlane.xlu1 %5945  ;;  %v5957_v58 = vmul.f32 0.125, %v5949_v56 }
0x12a1   :  { %v5956_v59 = vmul.f32 0.125, %v5946_v57 }
0x12a2   :  { %v5981_v34 = vmul.f32 %v5957_v58, %v5957_v58 }
0x12a3   :  { %v5980_v60 = vmul.f32 %v5956_v59, %v5956_v59  ;;  %v5966_v54 = vpop.xlane.xlu0 %5965 }
0x12a4   :  { %v5976_v53 = vmul.f32 0.125, %v5966_v54  ;;  %v5969_v63 = vpop.xlane.xlu1 %5968 }
0x12a5   :  { %v5977_v17 = vmul.f32 0.125, %v5969_v63 }
0x12a6   :  { %v5984_v0 = vsub.f32 %v5976_v53, %v5980_v60 }
0x12a7   :  { %v5985_v37 = vsub.f32 %v5977_v17, %v5981_v34  ;;  %v5952_v25 = vpop.xlane.xlu0 %5951  ;;  %v7119_v17 = vld [vmem:[%s11186_s14 + $0x18] sm:$0xff] }
0x12a8   :  { %v5988_v1 = vadd.f32 1e-05, %v5984_v0  ;;  %v5958_v61 = vmul.f32 0.125, %v5952_v25  ;;  %v5955_v2 = vpop.xlane.xlu1 %5954 }
0x12a9   :  { %v5989_v3 = vadd.f32 1e-05, %v5985_v37  ;;  %v5959_v6 = vmul.f32 0.125, %v5955_v2 }
0x12aa   :  { %9797 = vrsqrt.f32 %v5988_v1  ;;  %v5982_v7 = vmul.f32 %v5958_v61, %v5958_v61 }
0x12ab   :  { %9799 = vrsqrt.f32 %v5989_v3  ;;  %v5972_v62 = vpop.xlane.xlu0 %5971  ;;  %v5983_v23 = vmul.f32 %v5959_v6, %v5959_v6 }
0x12ac   :  { %v5978_v16 = vmul.f32 0.125, %v5972_v62  ;;  %v5975_v41 = vpop.xlane.xlu1 %5974 }
0x12ad   :  { %v5979_v9 = vmul.f32 0.125, %v5975_v41 }
0x12ae   :  { %v5986_v22 = vsub.f32 %v5978_v16, %v5982_v7 }
0x12af   :  { %v5987_v10 = vsub.f32 %v5979_v9, %v5983_v23 }
0x12b0   :  { %v5990_v11 = vadd.f32 1e-05, %v5986_v22 }
0x12b1   :  { %v5991_v12 = vadd.f32 1e-05, %v5987_v10 }
0x12b2   :  { %9801 = vrsqrt.f32 %v5990_v11 }
0x12b3   :  { %9803 = vrsqrt.f32 %v5991_v12 }
0x12b4   :  { %v9798_v4 = vpop.eup %9797 }
0x12b5   :  { %v9800_v14 = vpop.eup %9799  ;;  %v6000_v15 = vmul.f32 %v9798_v4, %v5996_v5 }
0x12b6   :  { %v6001_v18 = vmul.f32 %v9800_v14, %v5997_v13  ;;  %v7105_v13 = vld [vmem:[%s11185_s13 + $0x18] sm:$0x3]  ;;  %v6166_v14 = vld [vmem:[%s11185_s13] sm:$0xff] }
0x12b7   :  { %6018 = vperm.xlu0 %9788, %v6000_v15   ;;  %v6008_v21 = vmul.f32 %v6000_v15, %v5956_v59 }
0x12b8   :  { %6023 = vperm.xlu1 %9787, %v6001_v18   ;;  %v6009_v26 = vmul.f32 %v6001_v18, %v5957_v58 }
0x12b9   :  { %v6012_v27 = vsub.f32 %v6004_v19, %v6008_v21 }
0x12ba   :  { %v6013_v28 = vsub.f32 %v6005_v24, %v6009_v26  ;;  %v6167_v26 = vld [vmem:[%s11185_s13 + $0x8] sm:$0x3] }
0x12bc   :  { %v9802_v31 = vpop.eup %9801  ;;  %6042 = vperm.xlu1 %9787, %v6012_v27   ;;  %6047 = vperm.xlu0 %9788, %v6013_v28   ;;  %v7115_v28 = vld [vmem:[%s11185_s13 + $0x20] sm:$0xff] }
0x12bd   :  { %v9804_v20 = vpop.eup %9803  ;;  %v6002_v32 = vmul.f32 %v9802_v31, %v5998_v29 }
0x12be   :  { %v6003_v33 = vmul.f32 %v9804_v20, %v5999_v30  ;;  %v7116_v20 = vld [vmem:[%s11185_s13 + $0x28] sm:$0x3] }
0x12bf   :  { %v6010_v43 = vmul.f32 %v6002_v32, %v5958_v61 }
0x12c0   :  { %6033 = vperm.xlu0 %9788, %v6003_v33   ;;  %6028 = vperm.xlu1 %9787, %v6002_v32   ;;  %v6011_v44 = vmul.f32 %v6003_v33, %v5959_v6  ;;  %v7124_v32 = vld [vmem:[%s11185_s13 + $0x30] sm:$0xff]  ;;  %v7125_v33 = vld [vmem:[%s11185_s13 + $0x38] sm:$0x3] }
0x12c1   :  { %v6014_v46 = vsub.f32 %v6006_v35, %v6010_v43 }
0x12c2   :  { %v6015_v8 = vsub.f32 %v6007_v42, %v6011_v44 }
0x12c4   :  { %6057 = vperm.xlu0 %9788, %v6015_v8   ;;  %6052 = vperm.xlu1 %9787, %v6014_v46  }
0x12c8   :  { %6775 = vperm.xlu0 %9788, %v6767_v48   ;;  %6770 = vperm.xlu1 %9787, %v6766_v49  }
0x1336   :  { %v6019_v51 = vpop.permute.xlu0 %6018 }
0x1337   :  { %v6024_v52 = vpop.permute.xlu1 %6023  ;;  %v6036_v55 = vmul.f32 %v6019_v51, %v11046_v39 }
0x1338   :  { %v6037_v56 = vmul.f32 %v11044_v38, %v6024_v52 }
0x133b   :  { %v6043_v57 = vpop.permute.xlu1 %6042  ;;  %v6048_v58 = vpop.permute.xlu0 %6047 }
0x133c   :  { %v6060_v59 = vadd.f32 %v6043_v57, %v6036_v55  ;;  %v6061_v60 = vadd.f32 %v6048_v58, %v6037_v56 }
0x133e   :  { %v6064_v54 = vmax.f32 %v6060_v59, 0.0  ;;  %v6065_v53 = vmax.f32 %v6061_v60, 0.0 }
0x133f   :  { %v6029_v63 = vpop.permute.xlu1 %6028  ;;  %v6034_v34 = vpop.permute.xlu0 %6033 }
0x1340   :  { %8704 = vmatprep.mubr.msk.f32.mxu1 %vm2836_vm3, %v6064_v54  ;;  %8712 = vmatprep.mubr.msk.f32.mxu0 %vm2836_vm3, %v6064_v54  ;;  %v6038_v38 = vmul.f32 %v6029_v63, %v11059_v47  ;;  %v6039_v39 = vmul.f32 %v11056_v45, %v6034_v34  ;;  %v7104_v45 = vld [vmem:[%s11185_s13 + $0x10] sm:$0xff] }
0x1341   :  { %8705 = vmatmul.mubr.msk.f32.vlgmr.msra.gmra.mrb[44].mxu1 %vm2836_vm3, %v6065_v53  ;;  %8713 = vmatmul.mubr.msk.f32.vlgmr.msra.gmra.mrb[36].mxu0 %vm2836_vm3, %v6065_v53 }
0x1342   :  { %8741 = vmatpush3.msra.mxu0 %v7110_v50 }
0x1343   :  { %v6053_v0 = vpop.permute.xlu1 %6052  ;;  %v6058_v37 = vpop.permute.xlu0 %6057  ;;  %8759 = vmatprep.subr.mxu0 %v7119_v17 }
0x1344   :  { %v6062_v25 = vadd.f32 %v6053_v0, %v6038_v38  ;;  %v6063_v1 = vadd.f32 %v6058_v37, %v6039_v39 }
0x1346   :  { %v6066_v61 = vmax.f32 %v6062_v25, 0.0  ;;  %v6067_v2 = vmax.f32 %v6063_v1, 0.0 }
0x1347   :  { %v6776_v35 = vpop.permute.xlu0 %6775  ;;  %v6771_v40 = vpop.permute.xlu1 %6770 }
0x1348   :  { %8707 = vmatprep.mubr.msk.f32.mxu1 %vm2836_vm3, %v6066_v61  ;;  %8715 = vmatprep.mubr.msk.f32.mxu0 %vm2836_vm3, %v6066_v61 }
0x1349   :  { %8708 = vmatmul.mubr.msk.f32.gmra.mrb[46].mxu1 %vm2836_vm3, %v6067_v2  ;;  %8716 = vmatmul.mubr.msk.f32.gmra.mrb[38].mxu0 %vm2836_vm3, %v6067_v2 }
0x134a   :  { %8742 = vmatprep.mubr.msk.f32.mxu0 %vm2836_vm3, %v6064_v54  ;;  %8726 = vmatprep.mubr.msk.f32.mxu1 %vm4210_vm4, %v7104_v45 }
0x134d   :  { %8743 = vmatmul.mubr.msk.f32.vlgmr.msra.gmra.mrb[40].mxu0 %vm2836_vm3, %v6065_v53 }
0x134e   :  { %8745 = vmatprep.mubr.msk.f32.mxu0 %vm2836_vm3, %v6066_v61  ;;  %8760 = vmatpush3.msra.mxu0 %v7119_v17 }
0x1351   :  { %8746 = vmatmul.mubr.msk.f32.gmra.mrb[42].mxu0 %vm2836_vm3, %v6067_v2 }
0x1352   :  { %8761 = vmatprep.mubr.msk.f32.mxu0 %vm2836_vm3, %v6064_v54 }
0x1355   :  { %8762 = vmatmul.mubr.msk.f32.vlgmr.msra.gmra.mrb[44].mxu0 %vm2836_vm3, %v6065_v53 }
0x1356   :  { %8764 = vmatprep.mubr.msk.f32.mxu0 %vm2836_vm3, %v6066_v61 }
0x1359   :  { %8765 = vmatmul.mubr.msk.f32.gmra.mrb[46].mxu0 %vm2836_vm3, %v6067_v2 }
0x1414   :  { %v8706_v47 = vpop.f32.mrb[44].mxu1  ;;  %v8714_v3 = vpop.f32.mrb[36].mxu0 }
0x1415   :  { %v6147_v6 = vpop.f32.mrb[45].mxu1  ;;  %v6236_v62 = vpop.f32.mrb[37].mxu0 }
0x1416   :  { %v9686_v7 = vpack.c.bf16 %v8706_v47, %v6147_v6  ;;  %v9678_v16 = vpack.c.bf16 %v8714_v3, %v6236_v62 }
0x1418   :  { %9679 = vmatprep.subr.bf16.mxu1 %v9678_v16 }
0x1419   :  { %9681 = vmatpush3.bf16.msra.mxu1 %v9678_v16 }
0x141c   :  { %v8709_v41 = vpop.f32.mrb[46].mxu1  ;;  %v8717_v23 = vpop.f32.mrb[38].mxu0 }
0x141d   :  { %v6157_v9 = vpop.f32.mrb[47].mxu1  ;;  %v6246_v22 = vpop.f32.mrb[39].mxu0 }
0x141e   :  { %v9690_v10 = vpack.c.bf16 %v8709_v41, %v6157_v9  ;;  %v9682_v11 = vpack.c.bf16 %v8717_v23, %v6246_v22 }
0x1420   :  { %9683 = vmatprep.subr.bf16.mxu1 %v9682_v11  ;;  %v8744_v12 = vpop.f32.mrb[40].mxu0 }
0x1421   :  { %9685 = vmatpush3.bf16.msra.mxu1 %v9682_v11  ;;  %v6488_v5 = vpop.f32.mrb[41].mxu0 }
0x1422   :  { %v9694_v4 = vpack.c.bf16 %v8744_v12, %v6488_v5  ;;  %9687 = vmatprep.subr.bf16.mxu1 %v9686_v7 }
0x1424   :  { %8727 = vmatmul.mubr.msk.f32.vlgmr.msra.gmra.mrb[48].mxu1 %vm4210_vm4, %v7105_v13  ;;  %v8747_v15 = vpop.f32.mrb[42].mxu0 }
0x1425   :  { %9689 = vmatpush3.bf16.msra.mxu1 %v9686_v7  ;;  %v6498_v18 = vpop.f32.mrb[43].mxu0  ;;  %8737 = vmatprep.mubr.msk.f32.mxu1 %vm4210_vm4, %v6166_v14 }
0x1426   :  { %v9698_v19 = vpack.c.bf16 %v8747_v15, %v6498_v18  ;;  %9691 = vmatprep.subr.bf16.mxu1 %v9690_v10 }
0x1428   :  { %v8763_v21 = vpop.f32.mrb[44].mxu0 }
0x1429   :  { %9693 = vmatpush3.bf16.msra.mxu1 %v9690_v10  ;;  %v6661_v24 = vpop.f32.mrb[45].mxu0 }
0x142a   :  { %v9702_v27 = vpack.c.bf16 %v8763_v21, %v6661_v24  ;;  %9695 = vmatprep.subr.bf16.mxu1 %v9694_v4 }
0x142c   :  { %8738 = vmatmul.mubr.msk.f32.vlgmr.msra.gmra.mrb[48].mxu1 %vm4210_vm4, %v6167_v26  ;;  %v8766_v29 = vpop.f32.mrb[46].mxu0 }
0x142d   :  { %9697 = vmatpush3.bf16.msra.mxu1 %v9694_v4  ;;  %v6671_v30 = vpop.f32.mrb[47].mxu0  ;;  %8756 = vmatprep.mubr.msk.f32.mxu1 %vm4210_vm4, %v7115_v28 }
0x142e   :  { %v9706_v31 = vpack.c.bf16 %v8766_v29, %v6671_v30  ;;  %9699 = vmatprep.subr.bf16.mxu1 %v9698_v19 }
0x1431   :  { %9701 = vmatpush3.bf16.msra.mxu1 %v9698_v19 }
0x1432   :  { %9703 = vmatprep.subr.bf16.mxu1 %v9702_v27 }
0x1434   :  { %8757 = vmatmul.mubr.msk.f32.vlgmr.msra.gmra.mrb[48].mxu1 %vm4210_vm4, %v7116_v20 }
0x1435   :  { %9705 = vmatpush3.bf16.msra.mxu1 %v9702_v27  ;;  %8775 = vmatprep.mubr.msk.f32.mxu1 %vm4210_vm4, %v7124_v32 }
0x1436   :  { %9707 = vmatprep.subr.bf16.mxu1 %v9706_v31 }
0x1439   :  { %9709 = vmatpush3.bf16.msra.mxu1 %v9706_v31 }
0x143c   :  { %8776 = vmatmul.mubr.msk.f32.vlgmr.msra.gmra.mrb[48].mxu1 %vm4210_vm4, %v7125_v33 }
0x150f   :  { %v8777_v36 = vpop.f32.mrb[48].mxu1 }
0x1510   :  { %v6779_v42 = vadd.f32 %v8777_v36, %v6776_v35  ;;  %v6755_v43 = vpop.f32.mrb[49].mxu1 }
0x1511   :  { %v6778_v44 = vadd.f32 %v6771_v40, %v6755_v43 }
0x1512   :  { %6783 = vst.msk [vmem:[%s11188_s16 + $0x8] sm:$0x3] %vm6782_vm6, %v6779_v42 }
0x1513   :  { %6781 = vst.msk [vmem:[%s11188_s16] sm:$0xff] %vm6780_vm7, %v6778_v44 }
0x1514   :  { %6788 = vsyncpa [#allocation3], 1 }

</bundles_post_ra>
